<compile_context>
chip_gen: v7x
topology: tpu7x:2x2x1
jax: 0.10.0
libtpu: 0.0.40
codegen_flags: <defaults>
</compile_context>

<pallas_src>
from functools import partial

import jax
import jax.numpy as jnp
from jax import lax
from jax.experimental import pallas as pl
from jax.experimental.pallas import tpu as pltpu


# ---------------------------------------------------------------------------
# Fused SPP kernel: CBL -> cascaded 5/9/13 max pools -> concat-free CBL
# ---------------------------------------------------------------------------
def _spp_fused_kernel(x_ref, w1_ref, b1_ref, w2_ref, b2_ref, o_ref, buf_ref,
                      *, H, W):
    HW = H * W
    c_ = w1_ref.shape[1]
    OFF = 2 * W                      # largest shift used by the vertical pass
    f32 = jnp.float32

    # ---- first CBL: 1x1 conv (BN scale pre-folded) + bias + SiLU ----------
    y = jnp.dot(x_ref[...], w1_ref[...], preferred_element_type=f32)
    y = y + b1_ref[...]
    y = y * jax.nn.sigmoid(y)                              # (HW, c_) f32

    # ---- cascaded separable 5x5 max pools (SPPF cascade identity) ---------
    # -inf borders of the scratch ring; center writes never touch them.
    border = jnp.full((OFF, c_), -jnp.inf, f32)
    buf_ref[pl.ds(0, OFF), :] = border
    buf_ref[pl.ds(OFF + HW, OFF), :] = border

    # Hoisted constants reused by all three pools (broadcasts are not CSE'd).
    col = lax.broadcasted_iota(jnp.int32, (HW, c_), 0) % W
    neg = jnp.full((HW, c_), -jnp.inf, f32)
    keep_r = [col < (W - d) for d in (1, 2)]   # mask for +w (right) shifts
    keep_l = [col >= d for d in (1, 2)]        # mask for -w (left) shifts

    def pool5(v):
        # Horizontal pass (within an image row), window 5, -inf boundaries.
        buf_ref[pl.ds(OFF, HW), :] = v
        acc = v
        for i, d in enumerate((1, 2)):
            r = buf_ref[pl.ds(OFF + d, HW), :]
            acc = jnp.maximum(acc, jnp.where(keep_r[i], r, neg))
            l = buf_ref[pl.ds(OFF - d, HW), :]
            acc = jnp.maximum(acc, jnp.where(keep_l[i], l, neg))
        # Vertical pass: shifts are whole image rows; borders supply -inf.
        buf_ref[pl.ds(OFF, HW), :] = acc
        out = acc
        for d in (W, 2 * W):
            out = jnp.maximum(out, buf_ref[pl.ds(OFF + d, HW), :])
            out = jnp.maximum(out, buf_ref[pl.ds(OFF - d, HW), :])
        return out

    p5 = pool5(y)        # 5x5
    p9 = pool5(p5)       # == 9x9 of y   (SPPF cascade identity)
    p13 = pool5(p9)      # == 13x13 of y

    # ---- second CBL as a K-split matmul over the four pyramid branches ----
    bdt = w2_ref.dtype   # bf16 weights -> bf16 MXU inputs, f32 accumulation
    acc = jnp.dot(y.astype(bdt), w2_ref[0], preferred_element_type=f32)
    acc = acc + jnp.dot(p5.astype(bdt), w2_ref[1], preferred_element_type=f32)
    acc = acc + jnp.dot(p9.astype(bdt), w2_ref[2], preferred_element_type=f32)
    acc = acc + jnp.dot(p13.astype(bdt), w2_ref[3], preferred_element_type=f32)
    z = acc + b2_ref[...]
    o_ref[...] = (z * jax.nn.sigmoid(z)).astype(o_ref.dtype)


def spp_pallas(x2d, w1, b1, w4, b2, *, N, H, W):
    """x2d: (N*H*W, c1) bf16; w1: (c1, c_) bf16; w4: (4, c_, c2) bf16;
    b1: (1, c_) f32; b2: (1, c2) f32 (BN folded into weights/biases)."""
    HW = H * W
    M, c1 = x2d.shape
    c_ = w1.shape[1]
    c2 = w4.shape[2]
    # TODO(synk): for very large feature maps, additionally tile over H
    # (rows + a 2-row halo) so the per-image block stays well under v7x's
    # 64 MiB VMEM; current per-image blocks are tiny for YOLO SPP shapes.
    return pl.pallas_call(
        partial(_spp_fused_kernel, H=H, W=W),
        out_shape=jax.ShapeDtypeStruct((M, c2), jnp.float32),
        grid_spec=pltpu.PrefetchScalarGridSpec(
            num_scalar_prefetch=0,
            grid=(N,),
            in_specs=[
                pl.BlockSpec((HW, c1), lambda n: (n, 0)),
                pl.BlockSpec((c1, c_), lambda n: (0, 0)),      # weights resident
                pl.BlockSpec((1, c_), lambda n: (0, 0)),
                pl.BlockSpec((4, c_, c2), lambda n: (0, 0, 0)),
                pl.BlockSpec((1, c2), lambda n: (0, 0)),
            ],
            out_specs=pl.BlockSpec((HW, c2), lambda n: (n, 0)),
            scratch_shapes=[pltpu.VMEM((HW + 4 * W, c_), jnp.float32)],
        ),
        compiler_params=pltpu.CompilerParams(
            dimension_semantics=("parallel",),
            vmem_limit_bytes=48 * 1024 * 1024,
        ),
    )(x2d, w1, b1, w4, b2)


# ---------------------------------------------------------------------------
# Parameter construction (deterministic, synthetic); BN folded into conv.
# ---------------------------------------------------------------------------
def fold_bn(gamma, beta, mean, var, eps=1e-5):
    scale = gamma / jnp.sqrt(var + eps)
    bias = beta - mean * scale
    return scale, bias


def make_params(key, c1, c2):
    c_ = c1 // 2
    c_cat = 4 * c_
    ks = jax.random.split(key, 10)
    w1 = jax.random.normal(ks[0], (c1, c_), jnp.float32) * 0.1
    g1 = 1.0 + 0.1 * jax.random.normal(ks[1], (c_,), jnp.float32)
    be1 = 0.1 * jax.random.normal(ks[2], (c_,), jnp.float32)
    m1 = 0.1 * jax.random.normal(ks[3], (c_,), jnp.float32)
    v1 = 0.5 + jnp.abs(jax.random.normal(ks[4], (c_,), jnp.float32))
    s1, b1 = fold_bn(g1, be1, m1, v1)
    w2 = jax.random.normal(ks[5], (c_cat, c2), jnp.float32) * 0.1
    g2 = 1.0 + 0.1 * jax.random.normal(ks[6], (c2,), jnp.float32)
    be2 = 0.1 * jax.random.normal(ks[7], (c2,), jnp.float32)
    m2 = 0.1 * jax.random.normal(ks[8], (c2,), jnp.float32)
    v2 = 0.5 + jnp.abs(jax.random.normal(ks[9], (c2,), jnp.float32))
    s2, b2 = fold_bn(g2, be2, m2, v2)
    # Fold the BN scale into the conv weights (exact, done once in f32).
    return dict(w1=w1 * s1[None, :], b1=b1, w2=w2 * s2[None, :], b2=b2)


# ---------------------------------------------------------------------------
# SPP forward (Pallas) and pure-JAX reference
# ---------------------------------------------------------------------------
POOL_KS = (5, 9, 13)


def spp_forward(x_nchw, params):
    N, C1, H, W = x_nchw.shape
    M = N * H * W
    c_ = params["w1"].shape[1]
    c2 = params["w2"].shape[1]

    x2d = jnp.transpose(x_nchw, (0, 2, 3, 1)).astype(jnp.bfloat16).reshape(M, C1)
    w1 = params["w1"].astype(jnp.bfloat16)
    w4 = params["w2"].reshape(4, c_, c2).astype(jnp.bfloat16)
    b1 = params["b1"].reshape(1, c_).astype(jnp.float32)
    b2 = params["b2"].reshape(1, c2).astype(jnp.float32)

    out2d = spp_pallas(x2d, w1, b1, w4, b2, N=N, H=H, W=W)       # (M, c2) f32
    out = out2d.reshape(N, H, W, c2)
    return jnp.transpose(out, (0, 3, 1, 2))                      # back to NCHW


def spp_reference(x_nchw, params):
    x = jnp.transpose(x_nchw, (0, 2, 3, 1))

    def cbl(t, w, b):
        y = jnp.einsum("nhwc,cd->nhwd", t, w) + b
        return y * jax.nn.sigmoid(y)

    y = cbl(x, params["w1"], params["b1"])

    def pool(t, k):
        p = k // 2
        return lax.reduce_window(
            t, -jnp.inf, lax.max,
            window_dimensions=(1, k, k, 1),
            window_strides=(1, 1, 1, 1),
            padding=((0, 0), (p, p), (p, p), (0, 0)))

    y_cat = jnp.concatenate([y] + [pool(y, k) for k in POOL_KS], axis=-1)
    out = cbl(y_cat, params["w2"], params["b2"])
    return jnp.transpose(out, (0, 3, 1, 2))


if __name__ == "__main__":
    key = jax.random.PRNGKey(0)
    k_x, k_p = jax.random.split(key)

    N, c1, c2, H, W = 2, 4, 8, 16, 16
    x = jax.random.normal(k_x, (N, c1, H, W), jnp.float32)
    params = make_params(k_p, c1, c2)

    out = jax.block_until_ready(spp_forward(x, params))

    ref = spp_reference(x, params)
    assert out.shape == (N, c2, H, W), out.shape
    max_err = float(jnp.max(jnp.abs(out - ref)))
    # bf16 matmuls => loosened tolerance vs the f32 reference.
    assert jnp.allclose(out, ref, atol=2e-2, rtol=2e-2), max_err
    print("KERNEL_OK")
</pallas_src>

<mosaic_0001>
module attributes {stable_mosaic.version = 11 : i64} {
  func.func @_spp_fused_kernel(%arg0: i32, %arg1: memref<256x4xbf16, #tpu.memory_space<vmem>>, %arg2: memref<4x2xbf16, #tpu.memory_space<vmem>>, %arg3: memref<1x2xf32, #tpu.memory_space<vmem>>, %arg4: memref<4x2x8xbf16, #tpu.memory_space<vmem>>, %arg5: memref<1x8xf32, #tpu.memory_space<vmem>>, %arg6: memref<256x8xf32, #tpu.memory_space<vmem>>, %arg7: memref<320x2xf32, #tpu.memory_space<vmem>>) attributes {dimension_semantics = [#tpu.dimension_semantics<parallel>], iteration_bounds = array<i64: 2>, scalar_prefetch = 0 : i64, scratch_operands = 1 : i64, tpu.core_type = #tpu.core_type<tc>, window_params = [{transform_indices = @transform_0, window_bounds = array<i64: 256, 4>}, {pipeline_mode = #tpu.pipeline_mode<synchronous>, transform_indices = @transform_1, window_bounds = array<i64: 4, 2>}, {pipeline_mode = #tpu.pipeline_mode<synchronous>, transform_indices = @transform_2, window_bounds = array<i64: 1, 2>}, {pipeline_mode = #tpu.pipeline_mode<synchronous>, transform_indices = @transform_3, window_bounds = array<i64: 4, 2, 8>}, {pipeline_mode = #tpu.pipeline_mode<synchronous>, transform_indices = @transform_4, window_bounds = array<i64: 1, 8>}, {transform_indices = @transform_5, window_bounds = array<i64: 256, 8>}]} {
    %c0 = arith.constant 0 : index
    %c0_0 = arith.constant 0 : index
    %0 = vector.load %arg1[%c0, %c0_0] : memref<256x4xbf16, #tpu.memory_space<vmem>>, vector<256x4xbf16>
    %c0_1 = arith.constant 0 : index
    %c0_2 = arith.constant 0 : index
    %1 = vector.load %arg2[%c0_1, %c0_2] : memref<4x2xbf16, #tpu.memory_space<vmem>>, vector<4x2xbf16>
    %cst = arith.constant dense<0.000000e+00> : vector<256x2xf32>
    %2 = tpu.matmul %0, %1, %cst {dimension_numbers = #tpu.dot_dimension_numbers<[1], [0], [0], [1], [0, 0, 1, 1], [], []>} : vector<256x4xbf16>, vector<4x2xbf16>, vector<256x2xf32> -> vector<256x2xf32>
    %c0_3 = arith.constant 0 : index
    %c0_4 = arith.constant 0 : index
    %3 = vector.load %arg3[%c0_3, %c0_4] : memref<1x2xf32, #tpu.memory_space<vmem>>, vector<1x2xf32>
    %4 = vector.broadcast %3 : vector<1x2xf32> to vector<256x2xf32>
    %5 = arith.addf %2, %4 : vector<256x2xf32>
    %6 = arith.negf %5 : vector<256x2xf32>
    %7 = math.exp %6 : vector<256x2xf32>
    %cst_5 = arith.constant 1.000000e+00 : f32
    %8 = vector.broadcast %cst_5 : f32 to vector<256x2xf32>
    %9 = arith.addf %8, %7 : vector<256x2xf32>
    %10 = arith.divf %8, %9 : vector<256x2xf32>
    %11 = arith.mulf %5, %10 : vector<256x2xf32>
    %cst_6 = arith.constant 0xFF800000 : f32
    %12 = vector.broadcast %cst_6 : f32 to vector<32x2xf32>
    %c0_7 = arith.constant 0 : index
    %c0_8 = arith.constant 0 : index
    %13 = vector.load %arg7[%c0_7, %c0_8] : memref<320x2xf32, #tpu.memory_space<vmem>>, vector<32x2xf32>
    tpu.vector_store %arg7[%c0_7, %c0_8], %12 {strides = array<i32>} : memref<320x2xf32, #tpu.memory_space<vmem>>, vector<32x2xf32>,
    %c288 = arith.constant 288 : index
    %c0_9 = arith.constant 0 : index
    %14 = vector.load %arg7[%c288, %c0_9] : memref<320x2xf32, #tpu.memory_space<vmem>>, vector<32x2xf32>
    tpu.vector_store %arg7[%c288, %c0_9], %12 {strides = array<i32>} : memref<320x2xf32, #tpu.memory_space<vmem>>, vector<32x2xf32>,
    %15 = tpu.iota {dimensions = array<i32: 0>} : vector<256x2xi32>
    %c16_i32 = arith.constant 16 : i32
    %c0_i32 = arith.constant 0 : i32
    %16 = arith.cmpi eq, %c16_i32, %c0_i32 : i32
    %c1_i32 = arith.constant 1 : i32
    %17 = arith.select %16, %c1_i32, %c16_i32 : i32
    %18 = vector.broadcast %17 : i32 to vector<256x2xi32>
    %19 = arith.remsi %15, %18 : vector<256x2xi32>
    %c0_i32_10 = arith.constant 0 : i32
    %20 = vector.broadcast %c0_i32_10 : i32 to vector<256x2xi32>
    %21 = arith.cmpi ne, %19, %20 : vector<256x2xi32>
    %c0_i32_11 = arith.constant 0 : i32
    %22 = vector.broadcast %c0_i32_11 : i32 to vector<256x2xi32>
    %23 = arith.cmpi slt, %19, %22 : vector<256x2xi32>
    %c0_i32_12 = arith.constant 0 : i32
    %24 = arith.cmpi slt, %17, %c0_i32_12 : i32
    %25 = vector.broadcast %24 : i1 to vector<256x2xi1>
    %26 = vector.broadcast %25 : vector<256x2xi1> to vector<256x2xi1>
    %27 = arith.xori %23, %26 : vector<256x2xi1>
    %28 = arith.andi %27, %21 : vector<256x2xi1>
    %29 = vector.broadcast %17 : i32 to vector<256x2xi32>
    %30 = arith.addi %19, %29 : vector<256x2xi32>
    %31 = arith.select %28, %30, %19 : vector<256x2xi1>, vector<256x2xi32>
    %cst_13 = arith.constant 0xFF800000 : f32
    %32 = vector.broadcast %cst_13 : f32 to vector<256x2xf32>
    %c15_i32 = arith.constant 15 : i32
    %33 = vector.broadcast %c15_i32 : i32 to vector<256x2xi32>
    %34 = arith.cmpi slt, %31, %33 : vector<256x2xi32>
    %c14_i32 = arith.constant 14 : i32
    %35 = vector.broadcast %c14_i32 : i32 to vector<256x2xi32>
    %36 = arith.cmpi slt, %31, %35 : vector<256x2xi32>
    %c1_i32_14 = arith.constant 1 : i32
    %37 = vector.broadcast %c1_i32_14 : i32 to vector<256x2xi32>
    %38 = arith.cmpi sge, %31, %37 : vector<256x2xi32>
    %c2_i32 = arith.constant 2 : i32
    %39 = vector.broadcast %c2_i32 : i32 to vector<256x2xi32>
    %40 = arith.cmpi sge, %31, %39 : vector<256x2xi32>
    %c32 = arith.constant 32 : index
    %c0_15 = arith.constant 0 : index
    %41 = vector.load %arg7[%c32, %c0_15] : memref<320x2xf32, #tpu.memory_space<vmem>>, vector<256x2xf32>
    tpu.vector_store %arg7[%c32, %c0_15], %11 {strides = array<i32>} : memref<320x2xf32, #tpu.memory_space<vmem>>, vector<256x2xf32>,
    %c33 = arith.constant 33 : index
    %c0_16 = arith.constant 0 : index
    %42 = vector.load %arg7[%c33, %c0_16] : memref<320x2xf32, #tpu.memory_space<vmem>>, vector<256x2xf32>
    %43 = arith.select %34, %42, %32 : vector<256x2xi1>, vector<256x2xf32>
    %44 = arith.maximumf %11, %43 : vector<256x2xf32>
    %c31 = arith.constant 31 : index
    %c0_17 = arith.constant 0 : index
    %45 = vector.load %arg7[%c31, %c0_17] : memref<320x2xf32, #tpu.memory_space<vmem>>, vector<256x2xf32>
    %46 = arith.select %38, %45, %32 : vector<256x2xi1>, vector<256x2xf32>
    %47 = arith.maximumf %44, %46 : vector<256x2xf32>
    %c34 = arith.constant 34 : index
    %c0_18 = arith.constant 0 : index
    %48 = vector.load %arg7[%c34, %c0_18] : memref<320x2xf32, #tpu.memory_space<vmem>>, vector<256x2xf32>
    %49 = arith.select %36, %48, %32 : vector<256x2xi1>, vector<256x2xf32>
    %50 = arith.maximumf %47, %49 : vector<256x2xf32>
    %c30 = arith.constant 30 : index
    %c0_19 = arith.constant 0 : index
    %51 = vector.load %arg7[%c30, %c0_19] : memref<320x2xf32, #tpu.memory_space<vmem>>, vector<256x2xf32>
    %52 = arith.select %40, %51, %32 : vector<256x2xi1>, vector<256x2xf32>
    %53 = arith.maximumf %50, %52 : vector<256x2xf32>
    %c32_20 = arith.constant 32 : index
    %c0_21 = arith.constant 0 : index
    %54 = vector.load %arg7[%c32_20, %c0_21] : memref<320x2xf32, #tpu.memory_space<vmem>>, vector<256x2xf32>
    tpu.vector_store %arg7[%c32_20, %c0_21], %53 {strides = array<i32>} : memref<320x2xf32, #tpu.memory_space<vmem>>, vector<256x2xf32>,
    %c48 = arith.constant 48 : index
    %c0_22 = arith.constant 0 : index
    %55 = vector.load %arg7[%c48, %c0_22] : memref<320x2xf32, #tpu.memory_space<vmem>>, vector<256x2xf32>
    %56 = arith.maximumf %53, %55 : vector<256x2xf32>
    %c16 = arith.constant 16 : index
    %c0_23 = arith.constant 0 : index
    %57 = vector.load %arg7[%c16, %c0_23] : memref<320x2xf32, #tpu.memory_space<vmem>>, vector<256x2xf32>
    %58 = arith.maximumf %56, %57 : vector<256x2xf32>
    %c64 = arith.constant 64 : index
    %c0_24 = arith.constant 0 : index
    %59 = vector.load %arg7[%c64, %c0_24] : memref<320x2xf32, #tpu.memory_space<vmem>>, vector<256x2xf32>
    %60 = arith.maximumf %58, %59 : vector<256x2xf32>
    %c0_25 = arith.constant 0 : index
    %c0_26 = arith.constant 0 : index
    %61 = vector.load %arg7[%c0_25, %c0_26] : memref<320x2xf32, #tpu.memory_space<vmem>>, vector<256x2xf32>
    %62 = arith.maximumf %60, %61 : vector<256x2xf32>
    %c32_27 = arith.constant 32 : index
    %c0_28 = arith.constant 0 : index
    %63 = vector.load %arg7[%c32_27, %c0_28] : memref<320x2xf32, #tpu.memory_space<vmem>>, vector<256x2xf32>
    tpu.vector_store %arg7[%c32_27, %c0_28], %62 {strides = array<i32>} : memref<320x2xf32, #tpu.memory_space<vmem>>, vector<256x2xf32>,
    %c33_29 = arith.constant 33 : index
    %c0_30 = arith.constant 0 : index
    %64 = vector.load %arg7[%c33_29, %c0_30] : memref<320x2xf32, #tpu.memory_space<vmem>>, vector<256x2xf32>
    %65 = arith.select %34, %64, %32 : vector<256x2xi1>, vector<256x2xf32>
    %66 = arith.maximumf %62, %65 : vector<256x2xf32>
    %c31_31 = arith.constant 31 : index
    %c0_32 = arith.constant 0 : index
    %67 = vector.load %arg7[%c31_31, %c0_32] : memref<320x2xf32, #tpu.memory_space<vmem>>, vector<256x2xf32>
    %68 = arith.select %38, %67, %32 : vector<256x2xi1>, vector<256x2xf32>
    %69 = arith.maximumf %66, %68 : vector<256x2xf32>
    %c34_33 = arith.constant 34 : index
    %c0_34 = arith.constant 0 : index
    %70 = vector.load %arg7[%c34_33, %c0_34] : memref<320x2xf32, #tpu.memory_space<vmem>>, vector<256x2xf32>
    %71 = arith.select %36, %70, %32 : vector<256x2xi1>, vector<256x2xf32>
    %72 = arith.maximumf %69, %71 : vector<256x2xf32>
    %c30_35 = arith.constant 30 : index
    %c0_36 = arith.constant 0 : index
    %73 = vector.load %arg7[%c30_35, %c0_36] : memref<320x2xf32, #tpu.memory_space<vmem>>, vector<256x2xf32>
    %74 = arith.select %40, %73, %32 : vector<256x2xi1>, vector<256x2xf32>
    %75 = arith.maximumf %72, %74 : vector<256x2xf32>
    %c32_37 = arith.constant 32 : index
    %c0_38 = arith.constant 0 : index
    %76 = vector.load %arg7[%c32_37, %c0_38] : memref<320x2xf32, #tpu.memory_space<vmem>>, vector<256x2xf32>
    tpu.vector_store %arg7[%c32_37, %c0_38], %75 {strides = array<i32>} : memref<320x2xf32, #tpu.memory_space<vmem>>, vector<256x2xf32>,
    %c48_39 = arith.constant 48 : index
    %c0_40 = arith.constant 0 : index
    %77 = vector.load %arg7[%c48_39, %c0_40] : memref<320x2xf32, #tpu.memory_space<vmem>>, vector<256x2xf32>
    %78 = arith.maximumf %75, %77 : vector<256x2xf32>
    %c16_41 = arith.constant 16 : index
    %c0_42 = arith.constant 0 : index
    %79 = vector.load %arg7[%c16_41, %c0_42] : memref<320x2xf32, #tpu.memory_space<vmem>>, vector<256x2xf32>
    %80 = arith.maximumf %78, %79 : vector<256x2xf32>
    %c64_43 = arith.constant 64 : index
    %c0_44 = arith.constant 0 : index
    %81 = vector.load %arg7[%c64_43, %c0_44] : memref<320x2xf32, #tpu.memory_space<vmem>>, vector<256x2xf32>
    %82 = arith.maximumf %80, %81 : vector<256x2xf32>
    %c0_45 = arith.constant 0 : index
    %c0_46 = arith.constant 0 : index
    %83 = vector.load %arg7[%c0_45, %c0_46] : memref<320x2xf32, #tpu.memory_space<vmem>>, vector<256x2xf32>
    %84 = arith.maximumf %82, %83 : vector<256x2xf32>
    %c32_47 = arith.constant 32 : index
    %c0_48 = arith.constant 0 : index
    %85 = vector.load %arg7[%c32_47, %c0_48] : memref<320x2xf32, #tpu.memory_space<vmem>>, vector<256x2xf32>
    tpu.vector_store %arg7[%c32_47, %c0_48], %84 {strides = array<i32>} : memref<320x2xf32, #tpu.memory_space<vmem>>, vector<256x2xf32>,
    %c33_49 = arith.constant 33 : index
    %c0_50 = arith.constant 0 : index
    %86 = vector.load %arg7[%c33_49, %c0_50] : memref<320x2xf32, #tpu.memory_space<vmem>>, vector<256x2xf32>
    %87 = arith.select %34, %86, %32 : vector<256x2xi1>, vector<256x2xf32>
    %88 = arith.maximumf %84, %87 : vector<256x2xf32>
    %c31_51 = arith.constant 31 : index
    %c0_52 = arith.constant 0 : index
    %89 = vector.load %arg7[%c31_51, %c0_52] : memref<320x2xf32, #tpu.memory_space<vmem>>, vector<256x2xf32>
    %90 = arith.select %38, %89, %32 : vector<256x2xi1>, vector<256x2xf32>
    %91 = arith.maximumf %88, %90 : vector<256x2xf32>
    %c34_53 = arith.constant 34 : index
    %c0_54 = arith.constant 0 : index
    %92 = vector.load %arg7[%c34_53, %c0_54] : memref<320x2xf32, #tpu.memory_space<vmem>>, vector<256x2xf32>
    %93 = arith.select %36, %92, %32 : vector<256x2xi1>, vector<256x2xf32>
    %94 = arith.maximumf %91, %93 : vector<256x2xf32>
    %c30_55 = arith.constant 30 : index
    %c0_56 = arith.constant 0 : index
    %95 = vector.load %arg7[%c30_55, %c0_56] : memref<320x2xf32, #tpu.memory_space<vmem>>, vector<256x2xf32>
    %96 = arith.select %40, %95, %32 : vector<256x2xi1>, vector<256x2xf32>
    %97 = arith.maximumf %94, %96 : vector<256x2xf32>
    %c32_57 = arith.constant 32 : index
    %c0_58 = arith.constant 0 : index
    %98 = vector.load %arg7[%c32_57, %c0_58] : memref<320x2xf32, #tpu.memory_space<vmem>>, vector<256x2xf32>
    tpu.vector_store %arg7[%c32_57, %c0_58], %97 {strides = array<i32>} : memref<320x2xf32, #tpu.memory_space<vmem>>, vector<256x2xf32>,
    %c48_59 = arith.constant 48 : index
    %c0_60 = arith.constant 0 : index
    %99 = vector.load %arg7[%c48_59, %c0_60] : memref<320x2xf32, #tpu.memory_space<vmem>>, vector<256x2xf32>
    %100 = arith.maximumf %97, %99 : vector<256x2xf32>
    %c16_61 = arith.constant 16 : index
    %c0_62 = arith.constant 0 : index
    %101 = vector.load %arg7[%c16_61, %c0_62] : memref<320x2xf32, #tpu.memory_space<vmem>>, vector<256x2xf32>
    %102 = arith.maximumf %100, %101 : vector<256x2xf32>
    %c64_63 = arith.constant 64 : index
    %c0_64 = arith.constant 0 : index
    %103 = vector.load %arg7[%c64_63, %c0_64] : memref<320x2xf32, #tpu.memory_space<vmem>>, vector<256x2xf32>
    %104 = arith.maximumf %102, %103 : vector<256x2xf32>
    %c0_65 = arith.constant 0 : index
    %c0_66 = arith.constant 0 : index
    %105 = vector.load %arg7[%c0_65, %c0_66] : memref<320x2xf32, #tpu.memory_space<vmem>>, vector<256x2xf32>
    %106 = arith.maximumf %104, %105 : vector<256x2xf32>
    %107 = arith.truncf %11 : vector<256x2xf32> to vector<256x2xbf16>
    %c0_67 = arith.constant 0 : index
    %c0_68 = arith.constant 0 : index
    %c0_69 = arith.constant 0 : index
    %108 = vector.load %arg4[%c0_67, %c0_68, %c0_69] : memref<4x2x8xbf16, #tpu.memory_space<vmem>>, vector<1x2x8xbf16>
    %109 = vector.shape_cast %108 : vector<1x2x8xbf16> to vector<2x8xbf16>
    %cst_70 = arith.constant dense<0.000000e+00> : vector<256x8xf32>
    %110 = tpu.matmul %107, %109, %cst_70 {dimension_numbers = #tpu.dot_dimension_numbers<[1], [0], [0], [1], [0, 0, 1, 1], [], []>} : vector<256x2xbf16>, vector<2x8xbf16>, vector<256x8xf32> -> vector<256x8xf32>
    %111 = arith.truncf %62 : vector<256x2xf32> to vector<256x2xbf16>
    %c1 = arith.constant 1 : index
    %c0_71 = arith.constant 0 : index
    %c0_72 = arith.constant 0 : index
    %112 = vector.load %arg4[%c1, %c0_71, %c0_72] : memref<4x2x8xbf16, #tpu.memory_space<vmem>>, vector<1x2x8xbf16>
    %113 = vector.shape_cast %112 : vector<1x2x8xbf16> to vector<2x8xbf16>
    %cst_73 = arith.constant dense<0.000000e+00> : vector<256x8xf32>
    %114 = tpu.matmul %111, %113, %cst_73 {dimension_numbers = #tpu.dot_dimension_numbers<[1], [0], [0], [1], [0, 0, 1, 1], [], []>} : vector<256x2xbf16>, vector<2x8xbf16>, vector<256x8xf32> -> vector<256x8xf32>
    %115 = arith.addf %110, %114 : vector<256x8xf32>
    %116 = arith.truncf %84 : vector<256x2xf32> to vector<256x2xbf16>
    %c2 = arith.constant 2 : index
    %c0_74 = arith.constant 0 : index
    %c0_75 = arith.constant 0 : index
    %117 = vector.load %arg4[%c2, %c0_74, %c0_75] : memref<4x2x8xbf16, #tpu.memory_space<vmem>>, vector<1x2x8xbf16>
    %118 = vector.shape_cast %117 : vector<1x2x8xbf16> to vector<2x8xbf16>
    %cst_76 = arith.constant dense<0.000000e+00> : vector<256x8xf32>
    %119 = tpu.matmul %116, %118, %cst_76 {dimension_numbers = #tpu.dot_dimension_numbers<[1], [0], [0], [1], [0, 0, 1, 1], [], []>} : vector<256x2xbf16>, vector<2x8xbf16>, vector<256x8xf32> -> vector<256x8xf32>
    %120 = arith.addf %115, %119 : vector<256x8xf32>
    %121 = arith.truncf %106 : vector<256x2xf32> to vector<256x2xbf16>
    %c3 = arith.constant 3 : index
    %c0_77 = arith.constant 0 : index
    %c0_78 = arith.constant 0 : index
    %122 = vector.load %arg4[%c3, %c0_77, %c0_78] : memref<4x2x8xbf16, #tpu.memory_space<vmem>>, vector<1x2x8xbf16>
    %123 = vector.shape_cast %122 : vector<1x2x8xbf16> to vector<2x8xbf16>
    %cst_79 = arith.constant dense<0.000000e+00> : vector<256x8xf32>
    %124 = tpu.matmul %121, %123, %cst_79 {dimension_numbers = #tpu.dot_dimension_numbers<[1], [0], [0], [1], [0, 0, 1, 1], [], []>} : vector<256x2xbf16>, vector<2x8xbf16>, vector<256x8xf32> -> vector<256x8xf32>
    %125 = arith.addf %120, %124 : vector<256x8xf32>
    %c0_80 = arith.constant 0 : index
    %c0_81 = arith.constant 0 : index
    %126 = vector.load %arg5[%c0_80, %c0_81] : memref<1x8xf32, #tpu.memory_space<vmem>>, vector<1x8xf32>
    %127 = vector.broadcast %126 : vector<1x8xf32> to vector<256x8xf32>
    %128 = arith.addf %125, %127 : vector<256x8xf32>
    %129 = arith.negf %128 : vector<256x8xf32>
    %130 = math.exp %129 : vector<256x8xf32>
    %cst_82 = arith.constant 1.000000e+00 : f32
    %131 = vector.broadcast %cst_82 : f32 to vector<256x8xf32>
    %132 = arith.addf %131, %130 : vector<256x8xf32>
    %133 = arith.divf %131, %132 : vector<256x8xf32>
    %134 = arith.mulf %128, %133 : vector<256x8xf32>
    %c0_83 = arith.constant 0 : index
    %c0_84 = arith.constant 0 : index
    %135 = vector.load %arg6[%c0_83, %c0_84] : memref<256x8xf32, #tpu.memory_space<vmem>>, vector<256x8xf32>
    tpu.vector_store %arg6[%c0_83, %c0_84], %134 {strides = array<i32>} : memref<256x8xf32, #tpu.memory_space<vmem>>, vector<256x8xf32>,
    return
  }
  func.func @transform_0(%arg0: i32) -> (i32, i32) {
    %c0_i32 = arith.constant 0 : i32
    %c0_i32_0 = arith.constant 0 : i32
    return %arg0, %c0_i32 : i32, i32
  }
  func.func @transform_1(%arg0: i32) -> (i32, i32) {
    %c0_i32 = arith.constant 0 : i32
    %c0_i32_0 = arith.constant 0 : i32
    %c0_i32_1 = arith.constant 0 : i32
    return %c0_i32, %c0_i32_0 : i32, i32
  }
  func.func @transform_2(%arg0: i32) -> (i32, i32) {
    %c0_i32 = arith.constant 0 : i32
    %c0_i32_0 = arith.constant 0 : i32
    %c0_i32_1 = arith.constant 0 : i32
    return %c0_i32, %c0_i32_0 : i32, i32
  }
  func.func @transform_3(%arg0: i32) -> (i32, i32, i32) {
    %c0_i32 = arith.constant 0 : i32
    %c0_i32_0 = arith.constant 0 : i32
    %c0_i32_1 = arith.constant 0 : i32
    %c0_i32_2 = arith.constant 0 : i32
    return %c0_i32, %c0_i32_0, %c0_i32_1 : i32, i32, i32
  }
  func.func @transform_4(%arg0: i32) -> (i32, i32) {
    %c0_i32 = arith.constant 0 : i32
    %c0_i32_0 = arith.constant 0 : i32
    %c0_i32_1 = arith.constant 0 : i32
    return %c0_i32, %c0_i32_0 : i32, i32
  }
  func.func @transform_5(%arg0: i32) -> (i32, i32) {
    %c0_i32 = arith.constant 0 : i32
    %c0_i32_0 = arith.constant 0 : i32
    return %arg0, %c0_i32 : i32, i32
  }
}

</mosaic_0001>

<bundles_post_ra>
// kernel: tpu_custom_call.1
= control target key start
LH: loop header
LB: loop body
LE: loop exit
PB: predicated region body
PF: predicated region fallthrough
CT: control target
= control target key end

     0   :  { %s5383_s18 = smov 0   ;;  %s9021_s0 = inlined_call_operand.vmem [shape: bf16[512,4], index: 0, kind: input, shape index: {}]   ;;  %s9022_s1 = inlined_call_operand.vmem [shape: bf16[4,2], index: 1, kind: input, shape index: {}]   ;;  %s9023_s2 = inlined_call_operand.vmem [shape: f32[1,2], index: 2, kind: input, shape index: {}]   ;;  %s9024_s3 = inlined_call_operand.vmem [shape: bf16[4,2,8], index: 3, kind: input, shape index: {}]   ;;  %s9025_s4 = inlined_call_operand.vmem [shape: f32[1,8], index: 4, kind: input, shape index: {}]   ;;  %s9026_s5 = inlined_call_operand.vmem [shape: f32[512,8], index: 5, kind: output, shape index: {}]  }
   0x1 LB: > { %s4525_s19 = sadd.s32 4294967295, %s5350_s18   ;;  %p4529_p0 = scmp.ge.s32.totalorder %s5350_s18, 1  ;;  %s5350_s18 = sphi %s5383_s18, %s15_s18  }
   0x2   : > { %p188_p1 = scmp.lt.s32.totalorder %s5350_s18, 3 }
   0x4   : > { %p189_p2 = pnand %p4529_p0, %p188_p1 }
   0x6   : > { %192 = sbr.rel (%p189_p2) target bundleno = 965 (0x3c5), region = 40 }
   0xd   : > { %v261_v0 = vld [vmem:[%s9022_s1] sm:$0x3]  ;;  %vm398_vm0 = vcmask 1041408   ;;  %s4530_s22 = sshll.u32 %s4525_s19, 5  ;;  %vm349_vm1 = vcmask 31744   ;;  %vm9093_vm2 = vcmask 15360   ;;  %v796_v22 = vlaneseq }
   0xe   : > { %5054 = vmatprep.subr.msk.bf16.mxu0 %vm398_vm0, %v261_v0  ;;  %v400_v1 = vsel %vm398_vm0, %v261_v0, 0  ;;  %p217_p3 = scmp.lt.s32.totalorder %s4530_s22, 63  ;;  %v5352_v18 = vmov -inf   ;;  %v3205_v19 = vld [vmem:[%s9024_s3] sm:$0x1]  ;;  %vm9068_vm3 = vcmask 1040384  }
   0xf   : > { %4787 = vmatpush3.bf16.msra.mxu0 %v400_v1  ;;  %792 = vst.msk [vmem:[#allocation2 + $0x120] sm:$0xff] %vm9093_vm2, %v5352_v18  ;;  %793 = vst.msk [vmem:[#allocation2 + $0x128] sm:$0xff] %vm9093_vm2, %v5352_v18  ;;  %5057 = vmatprep.subr.msk.bf16.mxu1 %vm9068_vm3, %v3205_v19  ;;  %v5447_v20 = vsel %vm9068_vm3, %v3205_v19, 0  ;;  %v4599_v21 = vld [vmem:[%s9024_s3 + $0x1] sm:$0x1]  ;;  %v5454_v23 = vshrl.u32 %v796_v22, 7 }
  0x10   : > { %s10380_s22 = smov (!%p217_p3, %s4530_s22), 63  ;;  %788 = vst.msk [vmem:[#allocation2] sm:$0xff] %vm9093_vm2, %v5352_v18  ;;  %789 = vst.msk [vmem:[#allocation2 + $0x8] sm:$0xff] %vm9093_vm2, %v5352_v18  ;;  %4957 = vmatpush3.bf16.msra.mxu1 %v5447_v20  ;;  %5055 = vmatprep.subr.msk.bf16.mxu0 %vm9068_vm3, %v4599_v21  ;;  %v5459_v24 = vld [vmem:[%s9023_s2] ss:$0 sm:$0xff]  ;;  %v3274_v34 = vsel %vm9068_vm3, %v4599_v21, 0 }
  0x11   : > { %s4531_s23 = sshll.u32 %s10380_s22, 2  ;;  %790 = vst.msk [vmem:[#allocation2 + $0x10] sm:$0xff] %vm9093_vm2, %v5352_v18  ;;  %791 = vst.msk [vmem:[#allocation2 + $0x18] sm:$0xff] %vm9093_vm2, %v5352_v18  ;;  %v5462_v25 = vadd.s32 8, %v5454_v23  ;;  %v5465_v27 = vadd.s32 32, %v5454_v23  ;;  %v5475_v33 = vadd.s32 40, %v5454_v23 }
  0x12   : > { %s5400_s26 = scalar_lea.vmem %s9021_s0, %s4531_s23  ;;  %794 = vst.msk [vmem:[#allocation2 + $0x130] sm:$0xff] %vm9093_vm2, %v5352_v18  ;;  %795 = vst.msk [vmem:[#allocation2 + $0x138] sm:$0xff] %vm9093_vm2, %v5352_v18  ;;  %v5483_v38 = vadd.s32 48, %v5454_v23  ;;  %v5486_v39 = vadd.s32 56, %v5454_v23  ;;  %v5494_v43 = vadd.s32 64, %v5454_v23  ;;  %v5499_v45 = vadd.s32 72, %v5454_v23 }
  0x13   : > { %v5069_v2 = vld [vmem:[%s5400_s26] sm:$0xff]   ;;  %v5070_v3 = vld [vmem:[%s5400_s26 + $0x8] sm:$0xff]   ;;  %v5071_v4 = vld [vmem:[%s5400_s26 + $0x10] sm:$0xff]   ;;  %9402 = vst [vmem:[#allocation3_spill] sm:$0xff] %v5447_v20  ;;  %v840_v32 = vand.u32 15, %v5462_v25  ;;  %v5502_v46 = vadd.s32 80, %v5454_v23 }
  0x14   : > { %4788 = vmatprep.mubr.msk.bf16.mxu0 %vm349_vm1, %v5069_v2  ;;  %v5072_v5 = vld [vmem:[%s5400_s26 + $0x18] sm:$0xff]   ;;  %v5073_v6 = vld [vmem:[%s5400_s26 + $0x20] sm:$0xff]   ;;  %v5074_v7 = vld [vmem:[%s5400_s26 + $0x28] sm:$0xff]   ;;  %v5507_v49 = vadd.s32 88, %v5454_v23  ;;  %v5512_v52 = vadd.s32 96, %v5454_v23  ;;  %v5516_v55 = vadd.s32 104, %v5454_v23 }
  0x15   : > { %4789 = vmatmul.mubr.msk.bf16.vlgmr.msra.gmra.mrb[0].mxu0 %vm349_vm1, %v5070_v3  ;;  %v5075_v8 = vld [vmem:[%s5400_s26 + $0x30] sm:$0xff]   ;;  %v5076_v9 = vld [vmem:[%s5400_s26 + $0x38] sm:$0xff]   ;;  %v5077_v10 = vld [vmem:[%s5400_s26 + $0x40] sm:$0xff]   ;;  %v5519_v56 = vadd.s32 112, %v5454_v23  ;;  %v5527_v61 = vadd.s32 16, %v5454_v23  ;;  %v5534_v1 = vadd.s32 120, %v5454_v23 }
  0x16   : > { %4792 = vmatprep.mubr.msk.bf16.mxu0 %vm349_vm1, %v5071_v4  ;;  %v5078_v11 = vld [vmem:[%s5400_s26 + $0x48] sm:$0xff]   ;;  %v5079_v12 = vld [vmem:[%s5400_s26 + $0x50] sm:$0xff]   ;;  %v5080_v13 = vld [vmem:[%s5400_s26 + $0x58] sm:$0xff]   ;;  %4821 = vmatpush3.bf16.msra.mxu0 %v3274_v34  ;;  %v5537_v2 = vadd.s32 128, %v5454_v23  ;;  %v5565_v21 = vadd.s32 144, %v5454_v23  ;;  %vm5670_vm6 = vcmp.lt.s32.totalorder %v840_v32, 15 }
  0x17   : > { %v5081_v14 = vld [vmem:[%s5400_s26 + $0x60] sm:$0xff]   ;;  %v5082_v15 = vld [vmem:[%s5400_s26 + $0x68] sm:$0xff]   ;;  %v5083_v16 = vld [vmem:[%s5400_s26 + $0x70] sm:$0xff]   ;;  %5056 = vmatprep.subr.msk.bf16.mxu0 %vm9068_vm3, %v3205_v19  ;;  %9403 = vst [vmem:[#allocation4_spill] sm:$0xff] %v5527_v61  ;;  %v5685_v48 = vadd.s32 232, %v5454_v23  ;;  %vm5693_vm7 = vcmp.lt.s32.totalorder %v840_v32, 14 }
  0x18   : > { %v5084_v17 = vld [vmem:[%s5400_s26 + $0x78] sm:$0xff]   ;;  %v5562_v18 = vld [vmem:[%s9024_s3 + $0x2] sm:$0x1]  ;;  %v9429_v42 = vmov 0  ;;  %s4533_s16 = sshll.u32 %s10380_s22, 3 }
  0x19   : > { %5058 = vmatprep.subr.msk.bf16.mxu1 %vm9068_vm3, %v5562_v18  ;;  %9428 = vst [vmem:[#allocation23_spill] sm:$0xff] %v5685_v48  ;;  %v9430_v42 = vsel %vm5693_vm7, 4294967295, %v9429_v42  ;;  %v9456_v48 = vand.u32 15, %v5475_v33  ;;  %s8834_s20 = scalar_lea.vmem %s9026_s5, %s4533_s16 }
  0x1a   : > { %9431 = vst [vmem:[#allocation24_spill] sm:$0xff] %v9430_v42 }
  0x1b   : > { %vm5783_vm12 = vcmp.lt.s32.totalorder %v9456_v48, 14 }
  0x1d   : > { %4793 = vmatmul.mubr.msk.bf16.gmra.mrb[4].mxu0 %vm349_vm1, %v5072_v5 }
  0x1e   : > { %4796 = vmatprep.mubr.msk.bf16.mxu0 %vm349_vm1, %v5073_v6 }
  0x25   : > { %4797 = vmatmul.mubr.msk.bf16.gmra.mrb[8].mxu0 %vm349_vm1, %v5074_v7  ;;  %v5545_v7 = vadd.s32 136, %v5454_v23 }
  0x26   : > { %4800 = vmatprep.mubr.msk.bf16.mxu0 %vm349_vm1, %v5075_v8 }
  0x2d   : > { %4801 = vmatmul.mubr.msk.bf16.gmra.mrb[12].mxu0 %vm349_vm1, %v5076_v9 }
  0x2e   : > { %4804 = vmatprep.mubr.msk.bf16.mxu0 %vm349_vm1, %v5077_v10 }
  0x35   : > { %4805 = vmatmul.mubr.msk.bf16.gmra.mrb[16].mxu0 %vm349_vm1, %v5078_v11  ;;  %v5622_v11 = vadd.s32 208, %v5454_v23 }
  0x36   : > { %4808 = vmatprep.mubr.msk.bf16.mxu0 %vm349_vm1, %v5079_v12 }
  0x37   : > { %9411 = vst [vmem:[#allocation12_spill] sm:$0xff] %v5622_v11 }
  0x3d   : > { %4809 = vmatmul.mubr.msk.bf16.gmra.mrb[20].mxu0 %vm349_vm1, %v5080_v13  ;;  %v833_v13 = vand.u32 15, %v5454_v23 }
  0x3e   : > { %4812 = vmatprep.mubr.msk.bf16.mxu0 %vm349_vm1, %v5081_v14 }
  0x3f   : > { %vm5648_vm4 = vcmp.ge.s32.totalorder %v833_v13, 1  ;;  %vm5654_vm5 = vcmp.ge.s32.totalorder %v833_v13, 2  ;;  %v9423_v13 = vmov 0 }
  0x40   : > { %v9424_v13 = vsel %vm5670_vm6, 4294967295, %v9423_v13 }
  0x41   : > { %9425 = vst [vmem:[#allocation20_spill] sm:$0xff] %v9424_v13 }
  0x45   : > { %4813 = vmatmul.mubr.msk.bf16.gmra.mrb[24].mxu0 %vm349_vm1, %v5082_v15 }
  0x46   : > { %4816 = vmatprep.mubr.msk.bf16.mxu0 %vm349_vm1, %v5083_v16 }
  0x4d   : > { %4817 = vmatmul.mubr.msk.bf16.gmra.mrb[28].mxu0 %vm349_vm1, %v5084_v17  ;;  %v5628_v17 = vadd.s32 216, %v5454_v23 }
  0x4f   : > { %9412 = vst [vmem:[#allocation13_spill] sm:$0xff] %v5628_v17 }
  0xe8   : > { %v4790_v26 = vpop.f32.mrb[0].mxu0 }
  0xe9   : > { %v5468_v28 = vadd.f32 %v4790_v26, %v5459_v24  ;;  %v436_v29 = vpop.f32.mrb[1].mxu0  ;;  %v5569_v26 = vadd.s32 24, %v5454_v23 }
  0xea   : > { %v5471_v30 = vadd.f32 %v5459_v24, %v436_v29  ;;  %v4791_v31 = vpop.f32.mrb[2].mxu0 }
  0xeb   : > { %v4569_v35 = vmul.f32 -1.442695, %v5468_v28  ;;  %v5480_v36 = vadd.f32 %v4791_v31, %v5459_v24  ;;  %v439_v37 = vpop.f32.mrb[3].mxu0 }
  0xec   : > { %v4567_v40 = vmul.f32 -1.442695, %v5471_v30  ;;  %v5490_v41 = vadd.f32 %v5459_v24, %v439_v37  ;;  %v5577_v37 = vadd.s32 160, %v5454_v23 }
  0xed   : > { %5085 = vpow2.f32 %v4569_v35  ;;  %v4570_v44 = vmul.f32 -1.442695, %v5480_v36  ;;  %v5574_v35 = vadd.s32 152, %v5454_v23 }
  0xee   : > { %5087 = vpow2.f32 %v4567_v40  ;;  %v4568_v47 = vmul.f32 -1.442695, %v5490_v41  ;;  %9405 = vst [vmem:[#allocation6_spill] sm:$0xff] %v5577_v37 }
  0xef   : > { %5089 = vpow2.f32 %v4570_v44  ;;  %9404 = vst [vmem:[#allocation5_spill] sm:$0xff] %v5574_v35 }
  0xf0   : > { %5091 = vpow2.f32 %v4568_v47  ;;  %v4794_v53 = vpop.f32.mrb[4].mxu0 }
  0xf1   : > { %v5522_v57 = vadd.f32 %v4794_v53, %v5459_v24  ;;  %v452_v58 = vpop.f32.mrb[5].mxu0 }
  0xf2   : > { %v5530_v62 = vadd.f32 %v5459_v24, %v452_v58  ;;  %v4795_v63 = vpop.f32.mrb[6].mxu0  ;;  %v5583_v58 = vadd.s32 168, %v5454_v23 }
  0xf3   : > { %v4573_v3 = vmul.f32 -1.442695, %v5522_v57  ;;  %v5541_v4 = vadd.f32 %v4795_v63, %v5459_v24  ;;  %v455_v5 = vpop.f32.mrb[7].mxu0  ;;  %v5586_v63 = vadd.s32 176, %v5454_v23 }
  0xf4   : > { %v4571_v8 = vmul.f32 -1.442695, %v5530_v62  ;;  %v5549_v9 = vadd.f32 %v5459_v24, %v455_v5  ;;  %9406 = vst [vmem:[#allocation7_spill] sm:$0xff] %v5583_v58 }
  0xf5   : > { %5093 = vpow2.f32 %v4573_v3  ;;  %v4574_v12 = vmul.f32 -1.442695, %v5541_v4  ;;  %9407 = vst [vmem:[#allocation8_spill] sm:$0xff] %v5586_v63 }
  0xf6   : > { %5095 = vpow2.f32 %v4571_v8  ;;  %v4572_v15 = vmul.f32 -1.442695, %v5549_v9 }
  0xf7   : > { %v5086_v19 = vpop.eup %5085  ;;  %5097 = vpow2.f32 %v4574_v12 }
  0xf8   : > { %v5088_v29 = vpop.eup %5087  ;;  %v661_v31 = vadd.f32 1.0, %v5086_v19  ;;  %5099 = vpow2.f32 %v4572_v15  ;;  %v4798_v34 = vpop.f32.mrb[8].mxu0  ;;  %v5592_v15 = vadd.s32 184, %v5454_v23 }
  0xf9   : > { %v5090_v40 = vpop.eup %5089  ;;  %v659_v44 = vadd.f32 1.0, %v5088_v29  ;;  %v5580_v47 = vadd.f32 %v4798_v34, %v5459_v24  ;;  %v468_v53 = vpop.f32.mrb[9].mxu0 }
  0xfa   : > { %v5092_v3 = vpop.eup %5091  ;;  %5101 = vrcp.f32 %v661_v31  ;;  %v662_v5 = vadd.f32 1.0, %v5090_v40  ;;  %v5589_v8 = vadd.f32 %v5459_v24, %v468_v53  ;;  %v4799_v12 = vpop.f32.mrb[10].mxu0  ;;  %9408 = vst [vmem:[#allocation9_spill] sm:$0xff] %v5592_v15  ;;  %v5603_v40 = vadd.s32 192, %v5454_v23 }
  0xfb   : > { %5103 = vrcp.f32 %v659_v44  ;;  %v660_v19 = vadd.f32 1.0, %v5092_v3  ;;  %v4577_v29 = vmul.f32 -1.442695, %v5580_v47  ;;  %v5596_v34 = vadd.f32 %v4799_v12, %v5459_v24  ;;  %v471_v14 = vpop.f32.mrb[11].mxu0 }
  0xfc   : > { %5105 = vrcp.f32 %v662_v5  ;;  %v4575_v22 = vmul.f32 -1.442695, %v5589_v8  ;;  %v5600_v31 = vadd.f32 %v5459_v24, %v471_v14  ;;  %9409 = vst [vmem:[#allocation10_spill] sm:$0xff] %v5603_v40  ;;  %v5616_v3 = vadd.s32 200, %v5454_v23 }
  0xfd   : > { %5107 = vrcp.f32 %v660_v19  ;;  %v4578_v53 = vmul.f32 -1.442695, %v5596_v34 }
  0xfe   : > { %5109 = vpow2.f32 %v4577_v29  ;;  %v4576_v12 = vmul.f32 -1.442695, %v5600_v31  ;;  %9410 = vst [vmem:[#allocation11_spill] sm:$0xff] %v5616_v3 }
  0xff   : > { %v5094_v16 = vpop.eup %5093  ;;  %5111 = vpow2.f32 %v4575_v22 }
 0x100   : > { %v5096_v10 = vpop.eup %5095  ;;  %v665_v6 = vadd.f32 1.0, %v5094_v16  ;;  %5113 = vpow2.f32 %v4578_v53  ;;  %v4802_v44 = vpop.f32.mrb[12].mxu0 }
 0x101   : > { %v5098_v5 = vpop.eup %5097  ;;  %v663_v0 = vadd.f32 1.0, %v5096_v10  ;;  %5115 = vpow2.f32 %v4576_v12  ;;  %v5619_v22 = vadd.f32 %v4802_v44, %v5459_v24  ;;  %v484_v14 = vpop.f32.mrb[13].mxu0 }
 0x102   : > { %v5100_v19 = vpop.eup %5099  ;;  %5117 = vrcp.f32 %v665_v6  ;;  %v666_v16 = vadd.f32 1.0, %v5098_v5  ;;  %v5625_v53 = vadd.f32 %v5459_v24, %v484_v14  ;;  %v4803_v29 = vpop.f32.mrb[14].mxu0  ;;  %v5639_v14 = vadd.s32 224, %v5454_v23 }
 0x103   : > { %5119 = vrcp.f32 %v663_v0  ;;  %v664_v10 = vadd.f32 1.0, %v5100_v19  ;;  %v4581_v12 = vmul.f32 -1.442695, %v5619_v22  ;;  %v5632_v44 = vadd.f32 %v4803_v29, %v5459_v24  ;;  %v487_v60 = vpop.f32.mrb[15].mxu0 }
 0x104   : > { %v5102_v59 = vpop.eup %5101  ;;  %5121 = vrcp.f32 %v666_v16  ;;  %v4579_v6 = vmul.f32 -1.442695, %v5625_v53  ;;  %v5636_v5 = vadd.f32 %v5459_v24, %v487_v60  ;;  %9413 = vst [vmem:[#allocation14_spill] sm:$0xff] %v5639_v14  ;;  %v9415_v16 = vmov 0 }
 0x105   : > { %v5104_v54 = vpop.eup %5103  ;;  %v5642_v0 = vmul.f32 %v5102_v59, %v5468_v28  ;;  %5123 = vrcp.f32 %v664_v10  ;;  %v4582_v19 = vmul.f32 -1.442695, %v5632_v44  ;;  %v9416_v16 = vsel %vm5648_vm4, 4294967295, %v9415_v16 }
 0x106   : > { %9417 = vst [vmem:[#allocation16_spill] sm:$0xff] %v9416_v16  ;;  %v9418_v60 = vmov 0  ;;  %v5106_v51 = vpop.eup %5105  ;;  %v5659_v28 = vmul.f32 %v5104_v54, %v5471_v30  ;;  %5125 = vpow2.f32 %v4581_v12  ;;  %v4580_v59 = vmul.f32 -1.442695, %v5636_v5 }
 0x107   : > { %9414 = vst [vmem:[#allocation15_spill] sm:$0xff] %v5642_v0  ;;  %v9419_v60 = vsel %vm5654_vm5, 4294967295, %v9418_v60  ;;  %v5108_v29 = vpop.eup %5107  ;;  %1343 = vst.msk [vmem:[#allocation2 + $0x30] sm:$0xff] %vm9093_vm2, %v5642_v0  ;;  %v5666_v50 = vmul.f32 %v5106_v51, %v5480_v36  ;;  %5127 = vpow2.f32 %v4579_v6  ;;  %v5676_v54 = vadd.s32 248, %v5454_v23 }
 0x108   : > { %9420 = vst [vmem:[#allocation17_spill] sm:$0xff] %v9419_v60  ;;  %9421 = vst [vmem:[#allocation18_spill] sm:$0xff] %v5659_v28  ;;  %v5110_v12 = vpop.eup %5109  ;;  %v5681_v10 = vmul.f32 %v5108_v29, %v5490_v41  ;;  %5129 = vpow2.f32 %v4582_v19  ;;  %v4806_v36 = vpop.f32.mrb[16].mxu0  ;;  %v5708_v14 = vadd.s32 240, %v5454_v23 }
 0x109   : > { %9422 = vst [vmem:[#allocation19_spill] sm:$0xff] %v5666_v50  ;;  %9426 = vst [vmem:[#allocation21_spill] sm:$0xff] %v5676_v54  ;;  %v5112_v6 = vpop.eup %5111  ;;  %v669_v41 = vadd.f32 1.0, %v5110_v12  ;;  %5131 = vpow2.f32 %v4580_v59  ;;  %v5698_v19 = vadd.f32 %v4806_v36, %v5459_v24  ;;  %v500_v29 = vpop.f32.mrb[17].mxu0 }
 0x10a   : > { %1341 = vst.msk [vmem:[#allocation2 + $0x20] sm:$0xff] %vm9093_vm2, %v5659_v28  ;;  %9427 = vst [vmem:[#allocation22_spill] sm:$0xff] %v5681_v10  ;;  %v5114_v51 = vpop.eup %5113  ;;  %v667_v30 = vadd.f32 1.0, %v5112_v6  ;;  %v5705_v25 = vadd.f32 %v5459_v24, %v500_v29  ;;  %v4807_v32 = vpop.f32.mrb[18].mxu0 }
 0x10b   : > { %1344 = vst.msk [vmem:[#allocation2 + $0x38] sm:$0xff] %vm9093_vm2, %v5666_v50  ;;  %1342 = vst.msk [vmem:[#allocation2 + $0x28] sm:$0xff] %vm9093_vm2, %v5681_v10  ;;  %v5116_v59 = vpop.eup %5115  ;;  %5133 = vrcp.f32 %v669_v41  ;;  %v670_v12 = vadd.f32 1.0, %v5114_v51  ;;  %v4585_v36 = vmul.f32 -1.442695, %v5698_v19  ;;  %v5712_v17 = vadd.f32 %v4807_v32, %v5459_v24  ;;  %v503_v11 = vpop.f32.mrb[19].mxu0 }
 0x10c   : > { %9432 = vst [vmem:[#allocation25_spill] sm:$0xff] %v5708_v14  ;;  %v5118_v3 = vpop.eup %5117  ;;  %5135 = vrcp.f32 %v667_v30  ;;  %v668_v20 = vadd.f32 1.0, %v5116_v59  ;;  %v4583_v6 = vmul.f32 -1.442695, %v5705_v25  ;;  %v5716_v29 = vadd.f32 %v5459_v24, %v503_v11 }
 0x10d   : > { %v5120_v40 = vpop.eup %5119  ;;  %v5719_v23 = vmul.f32 %v5118_v3, %v5522_v57  ;;  %v9434_v51 = vand.u32 15, %v5465_v27  ;;  %v9435_v41 = vmov 0  ;;  %5137 = vrcp.f32 %v670_v12 }
 0x10e   : > { %v4586_v32 = vmul.f32 -1.442695, %v5712_v17  ;;  %v5122_v59 = vpop.eup %5121  ;;  %v5730_v15 = vmul.f32 %v5120_v40, %v5530_v62  ;;  %v9440_v57 = vmov 0  ;;  %5139 = vrcp.f32 %v668_v20 }
 0x10f   : > { %9433 = vst [vmem:[#allocation26_spill] sm:$0xff] %v5719_v23  ;;  %vm5723_vm8 = vcmp.ge.s32.totalorder %v9434_v51, 1  ;;  %v9439_v11 = vmov %v9434_v51  ;;  %v4584_v3 = vmul.f32 -1.442695, %v5716_v29  ;;  %v5124_v12 = vpop.eup %5123  ;;  %1347 = vst.msk [vmem:[#allocation2 + $0x50] sm:$0xff] %vm9093_vm2, %v5719_v23  ;;  %v5743_v30 = vmul.f32 %v5122_v59, %v5541_v4 }
 0x110   : > { %v9436_v41 = vsel %vm5723_vm8, 4294967295, %v9435_v41  ;;  %9438 = vst [vmem:[#allocation28_spill] sm:$0xff] %v5730_v15  ;;  %vm5734_vm9 = vcmp.ge.s32.totalorder %v9439_v11, 2  ;;  %5141 = vpow2.f32 %v4585_v36  ;;  %v5752_v20 = vsel %vm9068_vm3, %v5562_v18, 0  ;;  %v5126_v11 = vpop.eup %5125  ;;  %1345 = vst.msk [vmem:[#allocation2 + $0x40] sm:$0xff] %vm9093_vm2, %v5730_v15  ;;  %v4810_v18 = vpop.f32.mrb[20].mxu0 }
 0x111   : > { %9437 = vst [vmem:[#allocation27_spill] sm:$0xff] %v9436_v41  ;;  %v9441_v57 = vsel %vm5734_vm9, 4294967295, %v9440_v57  ;;  %9443 = vst [vmem:[#allocation30_spill] sm:$0xff] %v5743_v30  ;;  %v5746_v27 = vld [vmem:[#allocation2 + $0x1f] sm:$0xff]  ;;  %v5757_v51 = vmul.f32 %v5124_v12, %v5549_v9  ;;  %v9448_v4 = vand.u32 15, %v5475_v33  ;;  %v9449_v36 = vmov 0  ;;  %v5128_v12 = vpop.eup %5127 }
 0x112   : > { %9442 = vst [vmem:[#allocation29_spill] sm:$0xff] %v9441_v57  ;;  %9444 = vst [vmem:[#allocation31_spill] sm:$0xff] %v5746_v27  ;;  %v5748_v40 = vld [vmem:[#allocation2 + $0x1e] sm:$0xff]  ;;  %v9452_v59 = vand.u32 15, %v5483_v38  ;;  %v9453_v62 = vmov 0  ;;  %5143 = vpow2.f32 %v4583_v6  ;;  %v9457_v6 = vmov 0  ;;  %v5130_v63 = vpop.eup %5129 }
 0x113   : > { %9445 = vst [vmem:[#allocation32_spill] sm:$0xff] %v5748_v40  ;;  %9446 = vst [vmem:[#allocation33_spill] sm:$0xff] %v5752_v20  ;;  %vm5761_vm10 = vcmp.lt.s32.totalorder %v9448_v4, 15  ;;  %v1374_v4 = vld [vmem:[#allocation2 + $0x29] sm:$0xff]  ;;  %v9458_v6 = vsel %vm5783_vm12, 4294967295, %v9457_v6  ;;  %v673_v54 = vadd.f32 1.0, %v5126_v11  ;;  %5145 = vpow2.f32 %v4586_v32  ;;  %v5132_v11 = vpop.eup %5131 }
 0x114   : > { %9447 = vst [vmem:[#allocation34_spill] sm:$0xff] %v5757_v51  ;;  %v9450_v36 = vsel %vm5761_vm10, 4294967295, %v9449_v36  ;;  %vm5767_vm11 = vcmp.ge.s32.totalorder %v9452_v59, 1  ;;  %1348 = vst.msk [vmem:[#allocation2 + $0x58] sm:$0xff] %vm9093_vm2, %v5743_v30  ;;  %v5788_v14 = vadd.f32 %v4810_v18, %v5459_v24  ;;  %v516_v9 = vpop.f32.mrb[21].mxu0  ;;  %v1406_v58 = vsel %vm5670_vm6, %v1374_v4, -inf }
 0x115   : > { %9451 = vst [vmem:[#allocation35_spill] sm:$0xff] %v9450_v36  ;;  %v9454_v62 = vsel %vm5767_vm11, 4294967295, %v9453_v62  ;;  %9459 = vst [vmem:[#allocation37_spill] sm:$0xff] %v9458_v6  ;;  %v9460_v40 = vmov %v9452_v59  ;;  %v9461_v59 = vmov 0  ;;  %v671_v48 = vadd.f32 1.0, %v5128_v12  ;;  %v4811_v32 = vpop.f32.mrb[22].mxu0  ;;  %v5134_v33 = vpop.eup %5133 }
 0x116   : > { %9455 = vst [vmem:[#allocation36_spill] sm:$0xff] %v9454_v62  ;;  %vm5794_vm13 = vcmp.ge.s32.totalorder %v9460_v40, 2  ;;  %1346 = vst.msk [vmem:[#allocation2 + $0x48] sm:$0xff] %vm9093_vm2, %v5757_v51  ;;  %5147 = vpow2.f32 %v4584_v3  ;;  %v5802_v18 = vld [vmem:[#allocation2 + $0x21] sm:$0xff]  ;;  %v1438_v4 = vmax.f32 %v5681_v10, %v1406_v58  ;;  %v1566_v13 = vld [vmem:[#allocation2 + $0x2a] sm:$0xff]  ;;  %v674_v38 = vadd.f32 1.0, %v5130_v63 }
 0x117   : > { %v9462_v59 = vsel %vm5794_vm13, 4294967295, %v9461_v59  ;;  %9464 = vst [vmem:[#allocation39_spill] sm:$0xff] %v5802_v18  ;;  %5149 = vrcp.f32 %v673_v54  ;;  %v4589_v40 = vmul.f32 -1.442695, %v5788_v14  ;;  %v1470_v60 = vld [vmem:[#allocation2 + $0x27] sm:$0xff]  ;;  %v1598_v27 = vsel %vm5693_vm7, %v1566_v13, -inf  ;;  %v5136_v54 = vpop.eup %5135 }
 0x118   : > { %9463 = vst [vmem:[#allocation38_spill] sm:$0xff] %v9462_v59  ;;  %5151 = vrcp.f32 %v671_v48  ;;  %v672_v16 = vadd.f32 1.0, %v5132_v11  ;;  %v5809_v12 = vadd.f32 %v5459_v24, %v516_v9  ;;  %v519_v3 = vpop.f32.mrb[23].mxu0  ;;  %v1534_v50 = vmax.f32 %v1438_v4, %v1470_v60  ;;  %v5138_v4 = vpop.eup %5137  ;;  %v1662_v42 = vld [vmem:[#allocation2 + $0x26] sm:$0xff]  ;;  %v5853_v18 = vld [vmem:[#allocation2 + $0x3e] sm:$0xff] }
 0x119   : > { %5153 = vrcp.f32 %v674_v38  ;;  %v5812_v58 = vadd.f32 %v4811_v32, %v5459_v24  ;;  %v5815_v63 = vadd.f32 %v5459_v24, %v519_v3  ;;  %v5818_v10 = vmul.f32 %v5134_v33, %v5580_v47  ;;  %v1473_v3 = vld [vmem:[#allocation2 + $0x3f] sm:$0xff] }
 0x11a   : > { %9465 = vst [vmem:[#allocation40_spill] sm:$0xff] %v5809_v12  ;;  %v9469_v13 = vand.u32 15, %v5486_v39  ;;  %v9470_v48 = vmov 0  ;;  %v9474_v60 = vmov 0  ;;  %v9477_v32 = vand.u32 15, %v5494_v43 }
 0x11b   : > { %9466 = vst [vmem:[#allocation41_spill] sm:$0xff] %v5812_v58  ;;  %9467 = vst [vmem:[#allocation42_spill] sm:$0xff] %v5815_v63  ;;  %v9478_v11 = vmov 0  ;;  %5155 = vrcp.f32 %v672_v16  ;;  %v4587_v47 = vmul.f32 -1.442695, %v5809_v12  ;;  %v1630_v38 = vmax.f32 %v1534_v50, %v1598_v27  ;;  %v1379_v50 = vld [vmem:[#allocation2 + $0x51] sm:$0xff] }
 0x11c   : > { %9468 = vst [vmem:[#allocation43_spill] sm:$0xff] %v5818_v10  ;;  %vm5822_vm14 = vcmp.lt.s32.totalorder %v9469_v13, 15  ;;  %v9473_v9 = vmov %v9469_v13  ;;  %vm5834_vm0 = vcmp.ge.s32.totalorder %v9477_v32, 1  ;;  %v5842_v39 = vmul.f32 %v5136_v54, %v5589_v8  ;;  %1351 = vst.msk [vmem:[#allocation2 + $0x70] sm:$0xff] %vm9093_vm2, %v5818_v10  ;;  %v5865_v54 = vld [vmem:[#allocation2 + $0x22] sm:$0xff]  ;;  %v1571_v36 = vld [vmem:[#allocation2 + $0x52] sm:$0xff] }
 0x11d   : > { %v9471_v48 = vsel %vm5822_vm14, 4294967295, %v9470_v48  ;;  %vm5828_vm15 = vcmp.lt.s32.totalorder %v9473_v9, 14  ;;  %v9479_v11 = vsel %vm5834_vm0, 4294967295, %v9478_v11  ;;  %v9482_v13 = vmov %v9477_v32  ;;  %v5140_v32 = vpop.eup %5139  ;;  %9488 = vst [vmem:[#allocation51_spill] sm:$0xff] %v5865_v54  ;;  %v1377_v28 = vld [vmem:[#allocation2 + $0x41] sm:$0xff]  ;;  %v5945_v59 = vld [vmem:[#allocation2 + $0x56] sm:$0xff] }
 0x11e   : > { %9472 = vst [vmem:[#allocation44_spill] sm:$0xff] %v9471_v48  ;;  %v9475_v60 = vsel %vm5828_vm15, 4294967295, %v9474_v60  ;;  %9480 = vst [vmem:[#allocation46_spill] sm:$0xff] %v9479_v11  ;;  %vm5846_vm1 = vcmp.ge.s32.totalorder %v9482_v13, 2  ;;  %v9483_v9 = vmov 0  ;;  %5157 = vpow2.f32 %v4589_v40  ;;  %v5142_v27 = vpop.eup %5141  ;;  %v5863_v40 = vld [vmem:[#allocation2 + $0x2f] sm:$0xff] }
 0x11f   : > { %9476 = vst [vmem:[#allocation45_spill] sm:$0xff] %v9475_v60  ;;  %9481 = vst [vmem:[#allocation47_spill] sm:$0xff] %v5842_v39  ;;  %v9484_v9 = vsel %vm5846_vm1, 4294967295, %v9483_v9  ;;  %v4590_v16 = vmul.f32 -1.442695, %v5812_v58  ;;  %v1505_v33 = vsel %vm5723_vm8, %v1473_v3, -inf  ;;  %v5858_v43 = vmul.f32 %v5138_v4, %v5596_v34  ;;  %v5144_v3 = vpop.eup %5143 }
 0x120   : > { %9485 = vst [vmem:[#allocation48_spill] sm:$0xff] %v9484_v9  ;;  %5159 = vpow2.f32 %v4587_v47  ;;  %v5861_v8 = vmul.f32 -1.442695, %v5815_v63  ;;  %9487 = vst [vmem:[#allocation50_spill] sm:$0xff] %v5863_v40  ;;  %v5867_v13 = vmax.f32 %v1630_v38, %v1662_v42  ;;  %v1443_v41 = vmax.f32 %v5719_v23, %v1379_v50  ;;  %v4814_v50 = vpop.f32.mrb[24].mxu0  ;;  %v5890_v23 = vld [vmem:[#allocation2 + $0x2e] sm:$0xff] }
 0x121   : > { %9486 = vst [vmem:[#allocation49_spill] sm:$0xff] %v5858_v43  ;;  %1349 = vst.msk [vmem:[#allocation2 + $0x60] sm:$0xff] %vm9093_vm2, %v5842_v39  ;;  %v5876_v34 = vmul.f32 %v5140_v32, %v5600_v31  ;;  %v9491_v47 = vand.u32 15, %v5499_v45  ;;  %v9492_v4 = vmov 0  ;;  %v9495_v42 = vand.u32 15, %v5502_v46  ;;  %v1378_v63 = vld [vmem:[#allocation2 + $0x49] sm:$0xff] }
 0x122   : > { %9489 = vst [vmem:[#allocation52_spill] sm:$0xff] %v5867_v13  ;;  %v9496_v38 = vmov 0  ;;  %9499 = vst [vmem:[#allocation56_spill] sm:$0xff] %v5890_v23  ;;  %v1441_v31 = vmax.f32 %v5730_v15, %v1377_v28  ;;  %v1475_v32 = vld [vmem:[#allocation2 + $0x4f] sm:$0xff]  ;;  %v677_v40 = vadd.f32 1.0, %v5142_v27  ;;  %5161 = vpow2.f32 %v4590_v16  ;;  %v532_v58 = vpop.f32.mrb[25].mxu0  ;;  %v5146_v23 = vpop.eup %5145 }
 0x123   : > { %9490 = vst [vmem:[#allocation53_spill] sm:$0xff] %v5876_v34  ;;  %vm5880_vm3 = vcmp.lt.s32.totalorder %v9491_v47, 15  ;;  %vm5886_vm8 = vcmp.ge.s32.totalorder %v9495_v42, 1  ;;  %1352 = vst.msk [vmem:[#allocation2 + $0x78] sm:$0xff] %vm9093_vm2, %v5858_v43  ;;  %v9500_v54 = vmov %v9491_v47  ;;  %v9501_v42 = vmov 0  ;;  %v1570_v47 = vld [vmem:[#allocation2 + $0x4a] sm:$0xff] }
 0x124   : > { %v9493_v4 = vsel %vm5880_vm3, 4294967295, %v9492_v4  ;;  %v9497_v38 = vsel %vm5886_vm8, 4294967295, %v9496_v38  ;;  %vm5899_vm7 = vcmp.lt.s32.totalorder %v9500_v54, 14  ;;  %1758 = vst.msk [vmem:[#allocation2 + $0x28] sm:$0xff] %vm9093_vm2, %v5867_v13  ;;  %v1410_v28 = vsel %vm5761_vm10, %v1378_v63, -inf  ;;  %1350 = vst.msk [vmem:[#allocation2 + $0x68] sm:$0xff] %vm9093_vm2, %v5876_v34  ;;  %v5148_v13 = vpop.eup %5147 }
 0x125   : > { %9494 = vst [vmem:[#allocation54_spill] sm:$0xff] %v9493_v4  ;;  %9498 = vst [vmem:[#allocation55_spill] sm:$0xff] %v9497_v38  ;;  %v9502_v42 = vsel %vm5899_vm7, 4294967295, %v9501_v42  ;;  %v1507_v15 = vsel %vm5767_vm11, %v1475_v32, -inf  ;;  %v9504_v45 = vand.u32 15, %v5502_v46  ;;  %v9505_v54 = vmov 0  ;;  %v5150_v0 = vpop.eup %5149 }
 0x126   : > { %9503 = vst [vmem:[#allocation57_spill] sm:$0xff] %v9502_v42  ;;  %v675_v27 = vadd.f32 1.0, %v5144_v3  ;;  %v1442_v63 = vmax.f32 %v5757_v51, %v1410_v28  ;;  %v1537_v62 = vmax.f32 %v1441_v31, %v1505_v33  ;;  %v1539_v32 = vmax.f32 %v1443_v41, %v1507_v15  ;;  %v5922_v20 = vpop.f32.mrb[26].mxu0  ;;  %v1474_v12 = vld [vmem:[#allocation2 + $0x47] sm:$0xff]  ;;  %v5152_v33 = vpop.eup %5151 }
 0x127   : > { %vm5911_vm6 = vcmp.ge.s32.totalorder %v9504_v45, 2  ;;  %v1602_v46 = vsel %vm5783_vm12, %v1570_v47, -inf  ;;  %v1667_v45 = vld [vmem:[#allocation2 + $0x4e] sm:$0xff]  ;;  %v1569_v37 = vld [vmem:[#allocation2 + $0x42] sm:$0xff]  ;;  %5163 = vrcp.f32 %v677_v40  ;;  %v678_v3 = vadd.f32 1.0, %v5146_v23  ;;  %v5928_v61 = vpop.f32.mrb[27].mxu0 }
 0x128   : > { %v9506_v54 = vsel %vm5911_vm6, 4294967295, %v9505_v54  ;;  %v1699_v35 = vsel %vm5794_vm13, %v1667_v45, -inf  ;;  %v5926_v16 = vadd.f32 1.0, %v5148_v13  ;;  %v1538_v15 = vmax.f32 %v1442_v63, %v1474_v12  ;;  %v5154_v45 = vpop.eup %5153  ;;  %v5939_v40 = vld [vmem:[#allocation2 + $0x39] sm:$0xff] }
 0x129   : > { %9507 = vst [vmem:[#allocation58_spill] sm:$0xff] %v9506_v54  ;;  %v1633_v41 = vmax.f32 %v1537_v62, %v1569_v37  ;;  %v1635_v31 = vmax.f32 %v1539_v32, %v1571_v36  ;;  %v5931_v47 = vmul.f32 %v5150_v0, %v5619_v22  ;;  %v9509_v28 = vand.u32 15, %v5507_v49  ;;  %9513 = vst [vmem:[#allocation61_spill] sm:$0xff] %v5939_v40  ;;  %v5941_v23 = vld [vmem:[#allocation2 + $0x3a] sm:$0xff]  ;;  %v5156_v32 = vpop.eup %5155 }
 0x12a   : > { %v9510_v51 = vmov 0  ;;  %9514 = vst [vmem:[#allocation62_spill] sm:$0xff] %v5941_v23  ;;  %v5943_v13 = vld [vmem:[#allocation2 + $0x57] sm:$0xff]  ;;  %v5948_v37 = vmul.f32 %v5152_v33, %v5625_v53  ;;  %v9517_v0 = vmov 0  ;;  %v9520_v62 = vand.u32 15, %v5512_v52 }
 0x12b   : > { %9508 = vst [vmem:[#allocation59_spill] sm:$0xff] %v5931_v47  ;;  %vm5935_vm2 = vcmp.lt.s32.totalorder %v9509_v28, 15  ;;  %v9516_v22 = vmov %v9509_v28  ;;  %v9521_v36 = vmov 0  ;;  %v9525_v63 = vmov 0  ;;  %v1572_v6 = vld [vmem:[#allocation2 + $0x5a] sm:$0xff]  ;;  %v1382_v48 = vld [vmem:[#allocation2 + $0x69] sm:$0xff] }
 0x12c   : > { %v9511_v51 = vsel %vm5935_vm2, 4294967295, %v9510_v51  ;;  %9515 = vst [vmem:[#allocation63_spill] sm:$0xff] %v5948_v37  ;;  %vm5952_vm13 = vcmp.lt.s32.totalorder %v9516_v22, 14  ;;  %vm5958_vm12 = vcmp.ge.s32.totalorder %v9520_v62, 1  ;;  %v9524_v12 = vmov %v9520_v62  ;;  %v1380_v62 = vld [vmem:[#allocation2 + $0x59] sm:$0xff]  ;;  %v1478_v4 = vld [vmem:[#allocation2 + $0x67] sm:$0xff] }
 0x12d   : > { %9512 = vst [vmem:[#allocation60_spill] sm:$0xff] %v9511_v51  ;;  %v9518_v0 = vsel %vm5952_vm13, 4294967295, %v9517_v0  ;;  %v9522_v36 = vsel %vm5958_vm12, 4294967295, %v9521_v36  ;;  %vm5964_vm11 = vcmp.ge.s32.totalorder %v9524_v12, 2  ;;  %5165 = vrcp.f32 %v675_v27  ;;  %v1477_v12 = vld [vmem:[#allocation2 + $0x5f] sm:$0xff]  ;;  %v5158_v27 = vpop.eup %5157 }
 0x12e   : > { %9519 = vst [vmem:[#allocation64_spill] sm:$0xff] %v9518_v0  ;;  %9523 = vst [vmem:[#allocation65_spill] sm:$0xff] %v9522_v36  ;;  %v9526_v63 = vsel %vm5964_vm11, 4294967295, %v9525_v63  ;;  %v5969_v53 = vadd.f32 %v4814_v50, %v5459_v24  ;;  %v5972_v49 = vadd.f32 %v5459_v24, %v532_v58  ;;  %v1634_v33 = vmax.f32 %v1538_v15, %v1602_v46  ;;  %v5987_v58 = vpop.f32.mrb[28].mxu0  ;;  %v1666_v46 = vld [vmem:[#allocation2 + $0x46] sm:$0xff]  ;;  %v9675_v36 = vld [vmem:[#allocation42_spill] sm:$0xff] }
 0x12f   : > { %9527 = vst [vmem:[#allocation66_spill] sm:$0xff] %v9526_v63  ;;  %v9528_v28 = vsel %vm5734_vm9, %v5853_v18, -inf  ;;  %v5980_v52 = vmax.f32 %v1635_v31, %v1699_v35  ;;  %vm9531_vm10 = vcmask 15360   ;;  %v5985_v50 = vmul.f32 %v5154_v45, %v5632_v44  ;;  %v1383_v31 = vld [vmem:[#allocation2 + $0x71] sm:$0xff]  ;;  %v6030_v11 = vpop.f32.mrb[29].mxu0 }
 0x130   : > { %v5978_v22 = vmax.f32 %v1633_v41, %v9528_v28  ;;  %1355 = vst.msk [vmem:[#allocation2 + $0x90] sm:$0xff] %vm9531_vm10, %v5931_v47  ;;  %v1412_v18 = vsel %vm5822_vm14, %v1380_v62, -inf  ;;  %v1509_v35 = vsel %vm5834_vm0, %v1477_v12, -inf  ;;  %v1604_v15 = vsel %vm5828_vm15, %v1572_v6, -inf  ;;  %v1669_v41 = vld [vmem:[#allocation2 + $0x5e] sm:$0xff]  ;;  %1353 = vst.msk [vmem:[#allocation2 + $0x80] sm:$0xff] %vm9531_vm10, %v5948_v37  ;;  %v5160_v6 = vpop.eup %5159 }
 0x131   : > { %9530 = vst [vmem:[#allocation68_spill] sm:$0xff] %v5980_v52  ;;  %9532 = vst [vmem:[#allocation69_spill] sm:$0xff] %v5985_v50  ;;  %v5998_v44 = vmul.f32 %v5156_v32, %v5636_v5  ;;  %v9534_v45 = vand.u32 15, %v5516_v55  ;;  %v9535_v28 = vmov 0  ;;  %v9538_v62 = vand.u32 15, %v5519_v56 }
 0x132   : > { %9529 = vst [vmem:[#allocation67_spill] sm:$0xff] %v5978_v22  ;;  %v9539_v12 = vmov 0  ;;  %v6012_v60 = vmax.f32 %v1634_v33, %v1666_v46  ;;  %1761 = vst.msk [vmem:[#allocation2 + $0x40] sm:$0xff] %vm9531_vm10, %v5978_v22  ;;  %v1444_v5 = vmax.f32 %v5743_v30, %v1412_v18  ;;  %v1701_v32 = vsel %vm5846_vm1, %v1669_v41, -inf  ;;  %v1479_v30 = vld [vmem:[#allocation2 + $0x6f] sm:$0xff] }
 0x133   : > { %9533 = vst [vmem:[#allocation70_spill] sm:$0xff] %v5998_v44  ;;  %vm6002_vm9 = vcmp.lt.s32.totalorder %v9534_v45, 15  ;;  %vm6008_vm0 = vcmp.ge.s32.totalorder %v9538_v62, 1  ;;  %vm9543_vm15 = vmmov %vm9531_vm10  ;;  %v1447_v45 = vmax.f32 %v5818_v10, %v1383_v31  ;;  %v1381_v62 = vld [vmem:[#allocation2 + $0x61] sm:$0xff]  ;;  %v9545_v33 = vand.u32 15, %v5516_v55 }
 0x134   : > { %v9536_v28 = vsel %vm6002_vm9, 4294967295, %v9535_v28  ;;  %v9540_v12 = vsel %vm6008_vm0, 4294967295, %v9539_v12  ;;  %9542 = vst [vmem:[#allocation73_spill] sm:$0xff] %v6012_v60  ;;  %1763 = vst.msk [vmem:[#allocation2 + $0x50] sm:$0xff] %vm9543_vm15, %v5980_v52  ;;  %v9546_v46 = vmov 0  ;;  %v1445_v18 = vmax.f32 %v5842_v39, %v1381_v62  ;;  %v5162_v62 = vpop.eup %5161  ;;  %v1574_v39 = vld [vmem:[#allocation2 + $0x6a] sm:$0xff] }
 0x135   : > { %9537 = vst [vmem:[#allocation71_spill] sm:$0xff] %v9536_v28  ;;  %9541 = vst [vmem:[#allocation72_spill] sm:$0xff] %v9540_v12  ;;  %vm6026_vm5 = vcmp.lt.s32.totalorder %v9545_v33, 14  ;;  %v9549_v31 = vand.u32 15, %v5519_v56  ;;  %v9550_v10 = vmov 0  ;;  %5167 = vrcp.f32 %v678_v3  ;;  %v6045_v33 = vpop.f32.mrb[30].mxu0 }
 0x136   : > { %vm9544_vm14 = vmmov %vm9531_vm10  ;;  %v9547_v46 = vsel %vm6026_vm5, 4294967295, %v9546_v46  ;;  %1762 = vst.msk [vmem:[#allocation2 + $0x48] sm:$0xff] %vm9531_vm10, %v6012_v60  ;;  %v1540_v41 = vmax.f32 %v1444_v5, %v5943_v13  ;;  %v1414_v56 = vsel %vm5880_vm3, %v1382_v48, -inf  ;;  %5169 = vrcp.f32 %v5926_v16  ;;  %v6055_v9 = vpop.f32.mrb[31].mxu0  ;;  %v1671_v60 = vld [vmem:[#allocation2 + $0x6e] sm:$0xff]  ;;  %v1573_v48 = vld [vmem:[#allocation2 + $0x62] sm:$0xff]  ;;  %v5164_v16 = vpop.eup %5163 }
 0x137   : > { %1356 = vst.msk [vmem:[#allocation2 + $0x98] sm:$0xff] %vm9544_vm14, %v5985_v50  ;;  %9548 = vst [vmem:[#allocation74_spill] sm:$0xff] %v9547_v46  ;;  %vm6037_vm15 = vcmp.ge.s32.totalorder %v9549_v31, 2  ;;  %v1511_v31 = vsel %vm5886_vm8, %v1479_v30, -inf  ;;  %v1446_v3 = vmax.f32 %v5876_v34, %v1414_v56  ;;  %v1541_v55 = vmax.f32 %v1445_v18, %v1509_v35  ;;  %v1575_v5 = vld [vmem:[#allocation2 + $0x72] sm:$0xff]  ;;  %v1576_v18 = vld [vmem:[#allocation2 + $0x7a] sm:$0xff] }
 0x138   : > { %v9551_v10 = vsel %vm6037_vm15, 4294967295, %v9550_v10  ;;  %vm9553_vm14 = vmmov %vm9531_vm10  ;;  %v1543_v57 = vmax.f32 %v1447_v45, %v1511_v31  ;;  %v1606_v52 = vsel %vm5899_vm7, %v1574_v39, -inf  ;;  %v1636_v13 = vmax.f32 %v1540_v41, %v1604_v15  ;;  %v1384_v45 = vld [vmem:[#allocation2 + $0x79] sm:$0xff] }
 0x139   : > { %9552 = vst [vmem:[#allocation75_spill] sm:$0xff] %v9551_v10  ;;  %1354 = vst.msk [vmem:[#allocation2 + $0x88] sm:$0xff] %vm9553_vm14, %v5998_v44  ;;  %v1703_v30 = vsel %vm5911_vm6, %v1671_v60, -inf  ;;  %v681_v38 = vadd.f32 1.0, %v5158_v27  ;;  %v679_v22 = vadd.f32 1.0, %v5160_v6  ;;  %v1542_v23 = vmax.f32 %v1446_v3, %v1478_v4  ;;  %v1481_v39 = vld [vmem:[#allocation2 + $0x7f] sm:$0xff]  ;;  %v5166_v60 = vpop.eup %5165 }
 0x13a   : > { %v1637_v50 = vmax.f32 %v1541_v55, %v1573_v48  ;;  %v1639_v40 = vmax.f32 %v1543_v57, %v1575_v5  ;;  %v682_v56 = vadd.f32 1.0, %v5162_v62  ;;  %v6063_v35 = vmax.f32 %v1636_v13, %v5945_v59  ;;  %v1480_v27 = vld [vmem:[#allocation2 + $0x77] sm:$0xff] }
 0x13b   : > { %v6066_v15 = vmul.f32 %v5164_v16, %v5698_v19  ;;  %5171 = vrcp.f32 %v681_v38  ;;  %v6069_v41 = vmul.f32 -1.442695, %v5969_v53  ;;  %v1638_v6 = vmax.f32 %v1542_v23, %v1606_v52  ;;  %v1673_v55 = vld [vmem:[#allocation2 + $0x7e] sm:$0xff]  ;;  %v1672_v38 = vld [vmem:[#allocation2 + $0x76] sm:$0xff]  ;;  %v1670_v23 = vld [vmem:[#allocation2 + $0x66] sm:$0xff] }
 0x13c   : > { %v6071_v4 = vmax.f32 %v1637_v50, %v1701_v32  ;;  %v6073_v57 = vmax.f32 %v1639_v40, %v1703_v30  ;;  %v1416_v59 = vsel %vm5935_vm2, %v1384_v45, -inf  ;;  %v9554_v31 = vand.u32 15, %v5569_v26  ;;  %1764 = vst.msk [vmem:[#allocation2 + $0x58] sm:$0xff] %vm9531_vm10, %v6063_v35  ;;  %vm9558_vm2 = vmmov %vm9531_vm10 }
 0x13d   : > { %v9555_v19 = vmov 0  ;;  %v1448_v52 = vmax.f32 %v5858_v43, %v1416_v59  ;;  %v1513_v40 = vsel %vm5958_vm12, %v1481_v39, -inf  ;;  %v1608_v50 = vsel %vm5952_vm13, %v1576_v18, -inf  ;;  %1359 = vst.msk [vmem:[#allocation2 + $0xb0] sm:$0xff] %vm9558_vm2, %v6066_v15 }
 0x13e   : > { %v1387_v62 = vld [vmem:[#allocation2 + $0x91] sm:$0xff]  ;;  %vm6079_vm14 = vcmp.lt.s32.totalorder %v9554_v31, 15  ;;  %v1705_v32 = vsel %vm5964_vm11, %v1673_v55, -inf  ;;  %v9559_v13 = vand.u32 15, %v5534_v1  ;;  %v9560_v5 = vmov 0  ;;  %1765 = vst.msk [vmem:[#allocation2 + $0x60] sm:$0xff] %vm9558_vm2, %v6071_v4  ;;  %vm9571_vm11 = vmmov %vm9558_vm2 }
 0x13f   : > { %v9556_v19 = vsel %vm6079_vm14, 4294967295, %v9555_v19  ;;  %v9564_v30 = vmov 0  ;;  %v9567_v16 = vand.u32 15, %v5537_v2  ;;  %v9568_v45 = vmov 0  ;;  %1767 = vst.msk [vmem:[#allocation2 + $0x70] sm:$0xff] %vm9571_vm11, %v6073_v57  ;;  %vm9576_vm11 = vmmov %vm9558_vm2 }
 0x140   : > { %9557 = vst [vmem:[#allocation76_spill] sm:$0xff] %v9556_v19  ;;  %v1385_v3 = vld [vmem:[#allocation2 + $0x81] sm:$0xff]  ;;  %vm6096_vm10 = vcmp.lt.s32.totalorder %v9559_v13, 15  ;;  %v9563_v48 = vmov %v9559_v13  ;;  %v6112_v39 = vmax.f32 %v1638_v6, %v1670_v23  ;;  %v1451_v1 = vmax.f32 %v5931_v47, %v1387_v62  ;;  %v1386_v18 = vld [vmem:[#allocation2 + $0x89] sm:$0xff] }
 0x141   : > { %v9561_v5 = vsel %vm6096_vm10, 4294967295, %v9560_v5  ;;  %vm6102_vm6 = vcmp.lt.s32.totalorder %v9563_v48, 14  ;;  %vm6108_vm13 = vcmp.ge.s32.totalorder %v9567_v16, 1  ;;  %v1449_v59 = vmax.f32 %v5948_v37, %v1385_v3  ;;  %v1483_v55 = vld [vmem:[#allocation2 + $0x8f] sm:$0xff]  ;;  %v5168_v3 = vpop.eup %5167  ;;  %v1482_v47 = vld [vmem:[#allocation2 + $0x87] sm:$0xff] }
 0x142   : > { %9562 = vst [vmem:[#allocation77_spill] sm:$0xff] %v9561_v5  ;;  %v9565_v30 = vsel %vm6102_vm6, 4294967295, %v9564_v30  ;;  %v9569_v45 = vsel %vm6108_vm13, 4294967295, %v9568_v45  ;;  %v6121_v31 = vmul.f32 %v5166_v60, %v5705_v25  ;;  %v9572_v13 = vmov %v9567_v16  ;;  %v1578_v16 = vld [vmem:[#allocation2 + $0x8a] sm:$0xff]  ;;  %1766 = vst.msk [vmem:[#allocation2 + $0x68] sm:$0xff] %vm9576_vm11, %v6112_v39 }
 0x143   : > { %9566 = vst [vmem:[#allocation78_spill] sm:$0xff] %v9565_v30  ;;  %9570 = vst [vmem:[#allocation79_spill] sm:$0xff] %v9569_v45  ;;  %vm6125_vm12 = vcmp.ge.s32.totalorder %v9572_v13, 2  ;;  %v9573_v6 = vmov 0  ;;  %v1544_v23 = vmax.f32 %v1448_v52, %v1480_v27  ;;  %v1418_v48 = vsel %vm6002_vm9, %v1386_v18, -inf  ;;  %v1675_v27 = vld [vmem:[#allocation2 + $0x8e] sm:$0xff]  ;;  %v5170_v52 = vpop.eup %5169 }
 0x144   : > { %v9574_v6 = vsel %vm6125_vm12, 4294967295, %v9573_v6  ;;  %v1515_v62 = vsel %vm6008_vm0, %v1483_v55, -inf  ;;  %5173 = vrcp.f32 %v679_v22  ;;  %v1450_v25 = vmax.f32 %v5998_v44, %v1418_v48  ;;  %1357 = vst.msk [vmem:[#allocation2 + $0xa0] sm:$0xff] %vm9558_vm2, %v6121_v31  ;;  %v1579_v55 = vld [vmem:[#allocation2 + $0x92] sm:$0xff]  ;;  %v1577_v22 = vld [vmem:[#allocation2 + $0x82] sm:$0xff] }
 0x145   : > { %9575 = vst [vmem:[#allocation80_spill] sm:$0xff] %v9574_v6  ;;  %v1545_v2 = vmax.f32 %v1449_v59, %v1513_v40  ;;  %v1547_v60 = vmax.f32 %v1451_v1, %v1515_v62  ;;  %v1610_v13 = vsel %vm6026_vm5, %v1578_v16, -inf  ;;  %v1640_v18 = vmax.f32 %v1544_v23, %v1608_v50  ;;  %v9616_v30 = vld [vmem:[#allocation6_spill] sm:$0xff] }
 0x146   : > { %v1707_v37 = vsel %vm6037_vm15, %v1675_v27, -inf  ;;  %v6143_v43 = vmul.f32 %v5168_v3, %v5712_v17  ;;  %v9577_v40 = vand.u32 15, %v5545_v7  ;;  %v9578_v1 = vmov 0  ;;  %v5172_v7 = vpop.eup %5171 }
 0x147   : > { %5175 = vrcp.f32 %v682_v56  ;;  %v1546_v59 = vmax.f32 %v1450_v25, %v1482_v47  ;;  %v1641_v48 = vmax.f32 %v1545_v2, %v1577_v22  ;;  %v1643_v62 = vmax.f32 %v1547_v60, %v1579_v55 }
 0x148   : > { %vm6147_vm11 = vcmp.lt.s32.totalorder %v9577_v40, 15  ;;  %v6152_v50 = vmul.f32 %v5170_v52, %v5716_v29  ;;  %v9581_v23 = vand.u32 15, %v5565_v21  ;;  %v9582_v16 = vmov 0  ;;  %v6189_v21 = vld [vmem:[#allocation2 + $0x97] sm:$0xff] }
 0x149   : > { %v9579_v1 = vsel %vm6147_vm11, 4294967295, %v9578_v1  ;;  %v6160_v17 = vmax.f32 %v1640_v18, %v1672_v38  ;;  %vm9585_vm15 = vcmask 15360   ;;  %v3198_v56 = vpack.c.bf16 %v6143_v43, %v6066_v15  ;;  %v6191_v52 = vld [vmem:[#allocation2 + $0x96] sm:$0xff] }
 0x14a   : > { %9580 = vst [vmem:[#allocation81_spill] sm:$0xff] %v9579_v1  ;;  %vm6156_vm2 = vcmp.ge.s32.totalorder %v9581_v23, 1  ;;  %1360 = vst.msk [vmem:[#allocation2 + $0xb8] sm:$0xff] %vm9585_vm15, %v6143_v43  ;;  %v9586_v47 = vmov %v9577_v40  ;;  %v9587_v3 = vmov 0  ;;  %v9590_v29 = vmov %v9581_v23 }
 0x14b   : > { %v9583_v16 = vsel %vm6156_vm2, 4294967295, %v9582_v16  ;;  %vm6168_vm5 = vcmp.lt.s32.totalorder %v9586_v47, 14  ;;  %vm6174_vm0 = vcmp.ge.s32.totalorder %v9590_v29, 2  ;;  %v9591_v25 = vmov 0  ;;  %1358 = vst.msk [vmem:[#allocation2 + $0xa8] sm:$0xff] %vm9585_vm15, %v6152_v50  ;;  %vm9596_vm9 = vmmov %vm9585_vm15  ;;  %v1388_v55 = vld [vmem:[#allocation2 + $0x99] sm:$0xff] }
 0x14c   : > { %9584 = vst [vmem:[#allocation82_spill] sm:$0xff] %v9583_v16  ;;  %v9588_v3 = vsel %vm6168_vm5, 4294967295, %v9587_v3  ;;  %v9592_v25 = vsel %vm6174_vm0, 4294967295, %v9591_v25  ;;  %5177 = vpow2.f32 %v5861_v8  ;;  %v4591_v38 = vmul.f32 -1.442695, %v5972_v49  ;;  %1768 = vst.msk [vmem:[#allocation2 + $0x78] sm:$0xff] %vm9596_vm9, %v6160_v17 }
 0x14d   : > { %9589 = vst [vmem:[#allocation83_spill] sm:$0xff] %v9588_v3  ;;  %9593 = vst [vmem:[#allocation84_spill] sm:$0xff] %v9592_v25  ;;  %v1642_v2 = vmax.f32 %v1546_v59, %v1610_v13  ;;  %v6180_v60 = vmax.f32 %v1641_v48, %v1705_v32  ;;  %v6182_v27 = vmax.f32 %v1643_v62, %v1707_v37  ;;  %5179 = vpow2.f32 %v6069_v41  ;;  %v1674_v8 = vld [vmem:[#allocation2 + $0x86] sm:$0xff]  ;;  %v6205_v13 = vld [vmem:[#allocation2 + $0x31] sm:$0xff] }
 0x14e   : > { %5181 = vpow2.f32 %v4591_v38  ;;  %v6195_v32 = vadd.f32 %v5922_v20, %v5459_v24  ;;  %v6199_v37 = vadd.f32 %v5459_v24, %v5928_v61  ;;  %v6203_v41 = vadd.f32 %v5987_v58, %v5459_v24  ;;  %vm9598_vm15 = vmmov %vm9596_vm9  ;;  %v1485_v22 = vld [vmem:[#allocation2 + $0x9f] sm:$0xff]  ;;  %v9599_v62 = vld [vmem:[#allocation4_spill] sm:$0xff] }
 0x14f   : > { %9594 = vst [vmem:[#allocation85_spill] sm:$0xff] %v6180_v60  ;;  %9595 = vst [vmem:[#allocation86_spill] sm:$0xff] %v6182_v27  ;;  %v6207_v18 = vmax.f32 %v1642_v2, %v1674_v8  ;;  %v6214_v20 = vmul.f32 %v5172_v7, %v5788_v14  ;;  %v6218_v61 = vadd.f32 %v5459_v24, %v6030_v11  ;;  %v1580_v40 = vld [vmem:[#allocation2 + $0x9a] sm:$0xff]  ;;  %v9600_v23 = vand.u32 15, %v9599_v62  ;;  %v5174_v7 = vpop.eup %5173  ;;  %v9606_v8 = vld [vmem:[#allocation69_spill] sm:$0xff] }
 0x150   : > { %1769 = vst.msk [vmem:[#allocation2 + $0x80] sm:$0xff] %vm9596_vm9, %v6180_v60  ;;  %v6222_v58 = vadd.f32 %v6045_v33, %v5459_v24  ;;  %v4594_v59 = vmul.f32 -1.442695, %v6195_v32  ;;  %v6227_v48 = vadd.f32 %v5459_v24, %v6055_v9  ;;  %v3197_v14 = vpack.c.bf16 %v6152_v50, %v6121_v31  ;;  %v9604_v33 = vld [vmem:[#allocation61_spill] sm:$0xff]  ;;  %v6248_v38 = vld [vmem:[#allocation2 + $0x9e] sm:$0xff]  ;;  %vm9605_vm7 = vmmov %vm9598_vm15 }
 0x151   : > { %9597 = vst [vmem:[#allocation87_spill] sm:$0xff] %v6207_v18  ;;  %1771 = vst.msk [vmem:[#allocation2 + $0x90] sm:$0xff] %vm9598_vm15, %v6182_v27  ;;  %vm6233_vm9 = vcmp.ge.s32.totalorder %v9600_v23, 1  ;;  %v9601_v11 = vmov 0  ;;  %v1420_v24 = vsel %vm6096_vm10, %v1388_v55, -inf  ;;  %v1517_v9 = vsel %vm6108_vm13, %v1485_v22, -inf  ;;  %v5176_v46 = vpop.eup %5175 }
 0x152   : > { %v9602_v11 = vsel %vm6233_vm9, 4294967295, %v9601_v11  ;;  %1770 = vst.msk [vmem:[#allocation2 + $0x88] sm:$0xff] %vm9598_vm15, %v6207_v18  ;;  %v1612_v29 = vsel %vm6102_vm6, %v1580_v40, -inf  ;;  %v4592_v2 = vmul.f32 -1.442695, %v6199_v37  ;;  %v1452_v23 = vmax.f32 %v9606_v8, %v1420_v24  ;;  %v9607_v47 = vld [vmem:[#allocation5_spill] sm:$0xff] }
 0x153   : > { %9603 = vst [vmem:[#allocation4_spill] sm:$0xff] %v9602_v11  ;;  %1363 = vst.msk [vmem:[#allocation2 + $0xd0] sm:$0xff] %vm9605_vm7, %v6214_v20  ;;  %v9608_v44 = vand.u32 15, %v9607_v47  ;;  %v9609_v22 = vmov 0  ;;  %v9613_v34 = vmov 0  ;;  %v9617_v45 = vand.u32 15, %v9616_v30 }
 0x154   : > { %v9618_v24 = vmov 0  ;;  %5183 = vpow2.f32 %v4594_v59  ;;  %v4597_v55 = vmul.f32 -1.442695, %v6203_v41  ;;  %vm9621_vm13 = vcmask 15360   ;;  %v1391_v47 = vld [vmem:[#allocation2 + $0xb1] sm:$0xff]  ;;  %v1390_v28 = vld [vmem:[#allocation2 + $0xa9] sm:$0xff] }
 0x155   : > { %vm6259_vm15 = vcmp.lt.s32.totalorder %v9608_v44, 15  ;;  %v9612_v40 = vmov %v9608_v44  ;;  %vm6271_vm7 = vcmp.ge.s32.totalorder %v9617_v45, 1  ;;  %4872 = vmatprep.mubr.msk.bf16.mxu1 %vm9621_vm13, %v3197_v14  ;;  %v4649_v44 = vld [vmem:[%s9024_s3 + $0x3] sm:$0x1]  ;;  %v9623_v5 = vmov %v9617_v45  ;;  %vm9627_vm8 = vmmov %vm9621_vm13  ;;  %v9629_v30 = vld [vmem:[#allocation33_spill] sm:$0xff] }
 0x156   : > { %v9610_v22 = vsel %vm6259_vm15, 4294967295, %v9609_v22  ;;  %vm6265_vm6 = vcmp.lt.s32.totalorder %v9612_v40, 14  ;;  %v9619_v24 = vsel %vm6271_vm7, 4294967295, %v9618_v24  ;;  %v9622_v40 = vld [vmem:[#allocation40_spill] sm:$0xff]  ;;  %vm6285_vm10 = vcmp.ge.s32.totalorder %v9623_v5, 2  ;;  %4873 = vmatmul.mubr.msk.bf16.vlgmr.msra.gmra.mrb[0].mxu1 %vm9627_vm8, %v3198_v56  ;;  %v9628_v14 = vld [vmem:[#allocation15_spill] sm:$0xff] }
 0x157   : > { %9611 = vst [vmem:[#allocation61_spill] sm:$0xff] %v9610_v22  ;;  %v9614_v34 = vsel %vm6265_vm6, 4294967295, %v9613_v34  ;;  %9620 = vst [vmem:[#allocation6_spill] sm:$0xff] %v9619_v24  ;;  %v6281_v8 = vmul.f32 %v5174_v7, %v9622_v40  ;;  %v9624_v45 = vmov 0  ;;  %5185 = vpow2.f32 %v4592_v2  ;;  %v1389_v40 = vld [vmem:[#allocation2 + $0xa1] sm:$0xff]  ;;  %4889 = vmatpush3.bf16.msra.mxu1 %v9629_v30  ;;  %v1487_v63 = vld [vmem:[#allocation2 + $0xaf] sm:$0xff] }
 0x158   : > { %9615 = vst [vmem:[#allocation5_spill] sm:$0xff] %v9614_v34  ;;  %v9625_v45 = vsel %vm6285_vm10, 4294967295, %v9624_v45  ;;  %v4595_v59 = vmul.f32 -1.442695, %v6218_v61  ;;  %v1439_v10 = vmax.f32 %v9628_v14, %v6205_v13  ;;  %v1548_v12 = vmax.f32 %v1452_v23, %v6189_v21  ;;  %v9630_v13 = vld [vmem:[#allocation41_spill] sm:$0xff] }
 0x159   : > { %9626 = vst [vmem:[#allocation40_spill] sm:$0xff] %v9625_v45  ;;  %v1455_v7 = vmax.f32 %v6066_v15, %v1391_v47  ;;  %5187 = vpow2.f32 %v4597_v55  ;;  %v4598_v5 = vmul.f32 -1.442695, %v6222_v58  ;;  %v1422_v2 = vsel %vm6147_vm11, %v1390_v28, -inf  ;;  %1361 = vst.msk [vmem:[#allocation2 + $0xc0] sm:$0xff] %vm9627_vm8, %v6281_v8  ;;  %v5178_v55 = vpop.eup %5177  ;;  %v1679_v30 = vld [vmem:[#allocation2 + $0xae] sm:$0xff] }
 0x15a   : > { %v1453_v56 = vmax.f32 %v6121_v31, %v1389_v40  ;;  %v6303_v21 = vmul.f32 %v5176_v46, %v9630_v13  ;;  %5189 = vpow2.f32 %v4595_v59  ;;  %v9631_v15 = vand.u32 15, %v5569_v26  ;;  %v1582_v40 = vld [vmem:[#allocation2 + $0xaa] sm:$0xff]  ;;  %v5180_v46 = vpop.eup %5179  ;;  %v1567_v22 = vld [vmem:[#allocation2 + $0x32] sm:$0xff] }
 0x15b   : > { %v9632_v23 = vmov 0  ;;  %vm9635_vm3 = vcmask 1040384   ;;  %v1644_v28 = vmax.f32 %v1548_v12, %v1612_v29  ;;  %v1454_v31 = vmax.f32 %v6152_v50, %v1422_v2  ;;  %v1486_v59 = vld [vmem:[#allocation2 + $0xa7] sm:$0xff]  ;;  %v5182_v50 = vpop.eup %5181  ;;  %v6340_v2 = vld [vmem:[#allocation2 + $0xb6] sm:$0xff] }
 0x15c   : > { %vm6307_vm13 = vcmp.lt.s32.totalorder %v9631_v15, 14  ;;  %5059 = vmatprep.subr.msk.bf16.mxu1 %vm9635_vm3, %v4649_v44  ;;  %v1519_v47 = vsel %vm6156_vm2, %v1487_v63, -inf  ;;  %5191 = vpow2.f32 %v4598_v5  ;;  %v1549_v13 = vmax.f32 %v1453_v56, %v1517_v9  ;;  %vm9636_vm3 = vmmov %vm9627_vm8  ;;  %v1583_v9 = vld [vmem:[#allocation2 + $0xb2] sm:$0xff]  ;;  %v1581_v5 = vld [vmem:[#allocation2 + $0xa2] sm:$0xff] }
 0x15d   : > { %v9633_v23 = vsel %vm6307_vm13, 4294967295, %v9632_v23  ;;  %v1551_v26 = vmax.f32 %v1455_v7, %v1519_v47  ;;  %v1614_v15 = vsel %vm6168_vm5, %v1582_v40, -inf  ;;  %v1711_v44 = vsel %vm6174_vm0, %v1679_v30, -inf  ;;  %1364 = vst.msk [vmem:[#allocation2 + $0xd8] sm:$0xff] %vm9636_vm3, %v6303_v21  ;;  %vm9655_vm0 = vmmov %vm9636_vm3  ;;  %v6390_v16 = vld [vmem:[#allocation2 + $0x50] sm:$0xff] }
 0x15e   : > { %9634 = vst [vmem:[#allocation33_spill] sm:$0xff] %v9633_v23  ;;  %v9637_v12 = vand.u32 15, %v9599_v62  ;;  %v9638_v63 = vmov 0  ;;  %v6328_v29 = vmax.f32 %v1644_v28, %v6191_v52  ;;  %v1550_v7 = vmax.f32 %v1454_v31, %v1486_v59  ;;  %v9643_v28 = vld [vmem:[#allocation19_spill] sm:$0xff]  ;;  %v1488_v59 = vld [vmem:[#allocation2 + $0xb7] sm:$0xff] }
 0x15f   : > { %v680_v56 = vadd.f32 1.0, %v5178_v55  ;;  %v1645_v47 = vmax.f32 %v1549_v13, %v1581_v5  ;;  %v1647_v40 = vmax.f32 %v1551_v26, %v1583_v9  ;;  %v685_v30 = vadd.f32 1.0, %v5180_v46  ;;  %v1678_v55 = vld [vmem:[#allocation2 + $0xa6] sm:$0xff] }
 0x160   : > { %vm6323_vm8 = vcmp.ge.s32.totalorder %v9637_v12, 2  ;;  %9641 = vst [vmem:[#allocation88_spill] sm:$0xff] %v6328_v29  ;;  %v683_v14 = vadd.f32 1.0, %v5182_v50  ;;  %1772 = vst.msk [vmem:[#allocation2 + $0x98] sm:$0xff] %vm9636_vm3, %v6328_v29  ;;  %v1646_v62 = vmax.f32 %v1550_v7, %v1614_v15  ;;  %v4596_v12 = vmul.f32 -1.442695, %v6227_v48 }
 0x161   : > { %v9639_v63 = vsel %vm6323_vm8, 4294967295, %v9638_v63  ;;  %5193 = vrcp.f32 %v680_v56  ;;  %v9642_v52 = vsel %vm6079_vm14, %v9604_v33, -inf  ;;  %v9644_v46 = vsel %vm6125_vm12, %v6248_v38, -inf  ;;  %v9647_v15 = vld [vmem:[#allocation50_spill] sm:$0xff]  ;;  %v5184_v33 = vpop.eup %5183  ;;  %v9650_v38 = vld [vmem:[#allocation31_spill] sm:$0xff] }
 0x162   : > { %9640 = vst [vmem:[#allocation41_spill] sm:$0xff] %v9639_v63  ;;  %v1440_v31 = vmax.f32 %v9643_v28, %v9642_v52  ;;  %v6346_v13 = vmax.f32 %v1645_v47, %v9644_v46  ;;  %v6348_v26 = vmax.f32 %v1647_v40, %v1711_v44  ;;  %5195 = vrcp.f32 %v685_v30  ;;  %v1392_v7 = vld [vmem:[#allocation2 + $0xb9] sm:$0xff]  ;;  %v5186_v25 = vpop.eup %5185 }
 0x163   : > { %v1503_v50 = vsel %vm6233_vm9, %v9647_v15, -inf  ;;  %v6353_v9 = vmax.f32 %v1646_v62, %v1678_v55  ;;  %v6355_v5 = vld [vmem:[#allocation2 + $0xbf] sm:$0xff]  ;;  %5197 = vrcp.f32 %v683_v14  ;;  %v9651_v47 = vsel %vm5648_vm4, %v9650_v38, -inf  ;;  %v1472_v38 = vld [vmem:[#allocation2 + $0x37] sm:$0xff] }
 0x164   : > { %9645 = vst [vmem:[#allocation89_spill] sm:$0xff] %v6346_v13  ;;  %9646 = vst [vmem:[#allocation90_spill] sm:$0xff] %v6348_v26  ;;  %v1584_v56 = vld [vmem:[#allocation2 + $0xba] sm:$0xff]  ;;  %v1535_v28 = vmax.f32 %v1439_v10, %v1503_v50  ;;  %v1424_v62 = vsel %vm6259_vm15, %v1392_v7, -inf  ;;  %v686_v10 = vadd.f32 1.0, %v5184_v33  ;;  %v5188_v50 = vpop.eup %5187  ;;  %5199 = vpow2.f32 %v4596_v12 }
 0x165   : > { %9648 = vst [vmem:[#allocation50_spill] sm:$0xff] %v6353_v9  ;;  %v9652_v46 = vld [vmem:[#allocation18_spill] sm:$0xff]  ;;  %v9653_v44 = vld [vmem:[#allocation39_spill] sm:$0xff]  ;;  %1773 = vst.msk [vmem:[#allocation2 + $0xa0] sm:$0xff] %vm9636_vm3, %v6346_v13  ;;  %v1616_v55 = vsel %vm6265_vm6, %v1584_v56, -inf  ;;  %v5190_v14 = vpop.eup %5189  ;;  %v689_v33 = vadd.f32 1.0, %v5188_v50 }
 0x166   : > { %v9654_v40 = vmax.f32 %v9652_v46, %v9653_v44  ;;  %1775 = vst.msk [vmem:[#allocation2 + $0xb0] sm:$0xff] %vm9655_vm0, %v6348_v26  ;;  %v6375_v15 = vld [vmem:[#allocation2 + $0xbe] sm:$0xff]  ;;  %vm9656_vm3 = vmmov %vm9655_vm0  ;;  %v6383_v44 = vld [vmem:[#allocation2 + $0xd1] sm:$0xff]  ;;  %5201 = vrcp.f32 %v686_v10  ;;  %v1536_v46 = vmax.f32 %v1440_v31, %v1472_v38  ;;  %v5192_v34 = vpop.eup %5191  ;;  %v1631_v6 = vmax.f32 %v1535_v28, %v1567_v22 }
 0x167   : > { %1774 = vst.msk [vmem:[#allocation2 + $0xa8] sm:$0xff] %vm9656_vm3, %v6353_v9  ;;  %v9658_v12 = vld [vmem:[#allocation51_spill] sm:$0xff]  ;;  %v6393_v56 = vld [vmem:[#allocation2 + $0x58] sm:$0xff]  ;;  %v9660_v50 = vld [vmem:[#allocation56_spill] sm:$0xff]  ;;  %v9670_v0 = vmov 0  ;;  %vm9685_vm5 = vcmask 15360  }
 0x168   : > { %v1533_v30 = vmax.f32 %v9654_v40, %v9651_v47  ;;  %v1456_v47 = vmax.f32 %v6143_v43, %v1424_v62  ;;  %v684_v40 = vadd.f32 1.0, %v5186_v25  ;;  %v687_v43 = vadd.f32 1.0, %v5190_v14  ;;  %v9657_v62 = vld [vmem:[#allocation62_spill] sm:$0xff]  ;;  %9659 = vst [vmem:[#allocation31_spill] sm:$0xff] %v6393_v56  ;;  %v6395_v10 = vld [vmem:[#allocation2 + $0x60] sm:$0xff]  ;;  %v9661_v22 = vld [vmem:[#allocation17_spill] sm:$0xff] }
 0x169   : > { %v1600_v7 = vsel %vm6307_vm13, %v9657_v62, -inf  ;;  %v690_v25 = vadd.f32 1.0, %v5192_v34  ;;  %v1695_v14 = vsel %vm6323_vm8, %v9660_v50, -inf  ;;  %v6400_v38 = vld [vmem:[#allocation2 + $0x40] sm:$0xff]  ;;  %v1664_v34 = vld [vmem:[#allocation2 + $0x36] sm:$0xff]  ;;  %vm9662_vm0 = vnez %v9661_v22  ;;  %v9663_v28 = vld [vmem:[#allocation32_spill] sm:$0xff] }
 0x16a   : > { %v1552_v3 = vmax.f32 %v1456_v47, %v1488_v59  ;;  %5203 = vrcp.f32 %v684_v40  ;;  %v1629_v1 = vmax.f32 %v1533_v30, %v9658_v12  ;;  %v1632_v59 = vmax.f32 %v1536_v46, %v1600_v7  ;;  %v6402_v47 = vld [vmem:[#allocation2 + $0x68] sm:$0xff]  ;;  %v6404_v40 = vld [vmem:[#allocation2 + $0x70] sm:$0xff]  ;;  %vm9686_vm2 = vmmov %vm9685_vm5 }
 0x16b   : > { %5205 = vrcp.f32 %v689_v33  ;;  %v9664_v30 = vsel %vm9662_vm0, %v9663_v28, -inf  ;;  %v6414_v46 = vld [vmem:[#allocation2 + $0x48] sm:$0xff]  ;;  %v5194_v62 = vpop.eup %5193  ;;  %vm9688_vm11 = vmmov %vm9686_vm2  ;;  %v9695_v22 = vmov 0  ;;  %v9717_v9 = vmov 0  ;;  %v6589_v13 = vld [vmem:[#allocation2 + $0x10] sm:$0xff] }
 0x16c   : > { %v1648_v31 = vmax.f32 %v1552_v3, %v1616_v55  ;;  %5207 = vrcp.f32 %v687_v43  ;;  %v6410_v33 = vmax.f32 %v1629_v1, %v9664_v30  ;;  %v6412_v3 = vmax.f32 %v1631_v6, %v1695_v14  ;;  %v9665_v55 = vld [vmem:[#allocation67_spill] sm:$0xff]  ;;  %v6418_v43 = vld [vmem:[#allocation2 + $0x78] sm:$0xff]  ;;  %v9673_v6 = vld [vmem:[#allocation73_spill] sm:$0xff]  ;;  %v5196_v7 = vpop.eup %5195 }
 0x16d   : > { %5209 = vrcp.f32 %v690_v25  ;;  %9666 = vst [vmem:[#allocation39_spill] sm:$0xff] %v6418_v43  ;;  %v9668_v25 = vld [vmem:[#allocation7_spill] sm:$0xff]  ;;  %v1728_v1 = vmax.f32 %v1632_v59, %v1664_v34  ;;  %v9674_v28 = vld [vmem:[#allocation68_spill] sm:$0xff]  ;;  %v6434_v51 = vmul.f32 %v5194_v62, %v9675_v36  ;;  %v9682_v59 = vmov 0  ;;  %v9693_v36 = vld [vmem:[#allocation9_spill] sm:$0xff] }
 0x16e   : > { %v6421_v12 = vmax.f32 %v1648_v31, %v6340_v2  ;;  %v9669_v50 = vand.u32 15, %v9668_v25  ;;  %v1827_v30 = vmax.f32 %v9674_v28, %v6395_v10  ;;  %v9677_v31 = vmov 0  ;;  %1757 = vst.msk [vmem:[#allocation2 + $0x20] sm:$0xff] %vm9685_vm5, %v6410_v33  ;;  %v6456_v62 = vld [vmem:[#allocation2 + $0x80] sm:$0xff]  ;;  %v5198_v25 = vpop.eup %5197  ;;  %vm9698_vm12 = vmmov %vm9688_vm11 }
 0x16f   : > { %1759 = vst.msk [vmem:[#allocation2 + $0x30] sm:$0xff] %vm9686_vm2, %v6412_v3  ;;  %v1828_v34 = vmax.f32 %v6063_v35, %v6402_v47  ;;  %9687 = vst [vmem:[#allocation67_spill] sm:$0xff] %v6456_v62  ;;  %v6469_v14 = vmul.f32 %v5196_v7, %v5969_v53  ;;  %v9694_v35 = vand.u32 15, %v9693_v36  ;;  %v3199_v53 = vpack.c.bf16 %v6434_v51, %v6281_v8 }
 0x170   : > { %9667 = vst [vmem:[#allocation62_spill] sm:$0xff] %v6421_v12  ;;  %vm6425_vm3 = vcmp.lt.s32.totalorder %v9669_v50, 15  ;;  %v9676_v2 = vmov %v9669_v50  ;;  %v9680_v50 = vld [vmem:[#allocation8_spill] sm:$0xff]  ;;  %1776 = vst.msk [vmem:[#allocation2 + $0xb8] sm:$0xff] %vm9688_vm11, %v6421_v12  ;;  %v6480_v23 = vmax.f32 %v1827_v30, %v6400_v38  ;;  %v6491_v7 = vmul.f32 %v5198_v25, %v5972_v49  ;;  %v9703_v30 = vld [vmem:[#allocation10_spill] sm:$0xff]  ;;  %v5200_v25 = vpop.eup %5199 }
 0x171   : > { %v9671_v0 = vsel %vm6425_vm3, 4294967295, %v9670_v0  ;;  %vm6438_vm6 = vcmp.lt.s32.totalorder %v9676_v2, 14  ;;  %v9681_v63 = vand.u32 15, %v9680_v50  ;;  %v9689_v28 = vand.u32 15, %v9680_v50  ;;  %1760 = vst.msk [vmem:[#allocation2 + $0x38] sm:$0xff] %vm9698_vm12, %v1728_v1  ;;  %v6482_v50 = vld [vmem:[#allocation2 + $0x88] sm:$0xff]  ;;  %v5202_v11 = vpop.eup %5201  ;;  %vm9714_vm13 = vmmov %vm9688_vm11  ;;  %4876 = vmatprep.mubr.msk.bf16.mxu1 %vm9688_vm11, %v3199_v53 }
 0x172   : > { %9672 = vst [vmem:[#allocation51_spill] sm:$0xff] %v9671_v0  ;;  %v9678_v31 = vsel %vm6438_vm6, 4294967295, %v9677_v31  ;;  %v9690_v2 = vmov 0  ;;  %vm6473_vm2 = vcmp.lt.s32.totalorder %v9694_v35, 15  ;;  %9699 = vst [vmem:[#allocation68_spill] sm:$0xff] %v6482_v50  ;;  %vm6495_vm12 = vcmp.lt.s32.totalorder %v9694_v35, 14 }
 0x173   : > { %9679 = vst [vmem:[#allocation56_spill] sm:$0xff] %v9678_v31  ;;  %vm6444_vm15 = vcmp.ge.s32.totalorder %v9681_v63, 1  ;;  %v1829_v63 = vmax.f32 %v6071_v4, %v6404_v40  ;;  %vm6464_vm5 = vcmp.ge.s32.totalorder %v9689_v28, 2  ;;  %v9696_v22 = vsel %vm6473_vm2, 4294967295, %v9695_v22  ;;  %1362 = vst.msk [vmem:[#allocation2 + $0xc8] sm:$0xff] %vm9688_vm11, %v6434_v51 }
 0x174   : > { %v9683_v59 = vsel %vm6444_vm15, 4294967295, %v9682_v59  ;;  %v9691_v2 = vsel %vm6464_vm5, 4294967295, %v9690_v2  ;;  %9697 = vst [vmem:[#allocation73_spill] sm:$0xff] %v9696_v22  ;;  %v1824_v4 = vmax.f32 %v1728_v1, %v6414_v46  ;;  %v1830_v28 = vmax.f32 %v6112_v39, %v6418_v43  ;;  %v6505_v39 = vld [vmem:[#allocation2 + $0x28] sm:$0xff]  ;;  %1367 = vst.msk [vmem:[#allocation2 + $0xf0] sm:$0xff] %vm9688_vm11, %v6469_v14  ;;  %v5204_v42 = vpop.eup %5203 }
 0x175   : > { %9684 = vst [vmem:[#allocation32_spill] sm:$0xff] %v9683_v59  ;;  %9692 = vst [vmem:[#allocation7_spill] sm:$0xff] %v9691_v2  ;;  %v9700_v1 = vmov 0  ;;  %v9704_v19 = vand.u32 15, %v9703_v30  ;;  %v9705_v12 = vmov 0  ;;  %v6508_v54 = vmax.f32 %v1828_v34, %v6414_v46  ;;  %v6591_v29 = vld [vmem:[#allocation2 + $0x20] sm:$0xff] }
 0x176   : > { %v9701_v1 = vsel %vm6495_vm12, 4294967295, %v9700_v1  ;;  %9708 = vst [vmem:[#allocation9_spill] sm:$0xff] %v6505_v39  ;;  %v1865_v49 = vmax.f32 %v1829_v63, %v6390_v16  ;;  %v9711_v35 = vmov 0  ;;  %v1866_v34 = vmax.f32 %v1830_v28, %v6393_v56  ;;  %1365 = vst.msk [vmem:[#allocation2 + $0xe0] sm:$0xff] %vm9714_vm13, %v6491_v7 }
 0x177   : > { %9702 = vst [vmem:[#allocation42_spill] sm:$0xff] %v9701_v1  ;;  %vm6501_vm8 = vcmp.ge.s32.totalorder %v9704_v19, 1  ;;  %9709 = vst [vmem:[#allocation10_spill] sm:$0xff] %v6508_v54  ;;  %v9710_v36 = vmov %v9704_v19  ;;  %v1860_v19 = vmax.f32 %v1824_v4, %v6505_v39  ;;  %v1831_v63 = vmax.f32 %v6073_v57, %v6456_v62  ;;  %v9715_v57 = vld [vmem:[#allocation11_spill] sm:$0xff] }
 0x178   : > { %v9706_v12 = vsel %vm6501_vm8, 4294967295, %v9705_v12  ;;  %vm6515_vm0 = vcmp.ge.s32.totalorder %v9710_v36, 2  ;;  %v688_v52 = vadd.f32 1.0, %v5200_v25  ;;  %v1899_v4 = vmax.f32 %v1865_v49, %v6456_v62  ;;  %vm9721_vm13 = vmmov %vm9688_vm11  ;;  %9738 = vst [vmem:[#allocation97_spill] sm:$0xff] %v6591_v29 }
 0x179   : > { %9707 = vst [vmem:[#allocation8_spill] sm:$0xff] %v9706_v12  ;;  %v9712_v35 = vsel %vm6515_vm0, 4294967295, %v9711_v35  ;;  %v1832_v36 = vmax.f32 %v6160_v17, %v6482_v50  ;;  %v6534_v28 = vmul.f32 %v5202_v11, %v6195_v32  ;;  %v9716_v26 = vand.u32 15, %v9715_v57  ;;  %v5206_v32 = vpop.eup %5205  ;;  %v9843_v12 = vld [vmem:[#allocation31_spill] sm:$0xff] }
 0x17a   : > { %9713 = vst [vmem:[#allocation91_spill] sm:$0xff] %v9712_v35  ;;  %v1894_v53 = vmax.f32 %v1860_v19, %v6393_v56  ;;  %v9720_v25 = vpack.c.bf16 %v6303_v21, %v6214_v20  ;;  %v1900_v49 = vmax.f32 %v1866_v34, %v6482_v50  ;;  %v6549_v17 = vmax.f32 %v1831_v63, %v6395_v10  ;;  %v6560_v19 = vld [vmem:[#allocation2 + $0x18] sm:$0xff]  ;;  %v5208_v63 = vpop.eup %5207  ;;  %v6587_v50 = vld [vmem:[#allocation2 + $0x30] sm:$0xff] }
 0x17b   : > { %vm6538_vm14 = vcmp.lt.s32.totalorder %v9716_v26, 15  ;;  %v6552_v11 = vmul.f32 %v5204_v42, %v6199_v37  ;;  %v9723_v26 = vld [vmem:[#allocation12_spill] sm:$0xff]  ;;  %v9725_v62 = vmov 0  ;;  %5211 = vrcp.f32 %v688_v52  ;;  %1368 = vst.msk [vmem:[#allocation2 + $0xf8] sm:$0xff] %vm9721_vm13, %v6534_v28 }
 0x17c   : > { %v9718_v9 = vsel %vm6538_vm14, 4294967295, %v9717_v9  ;;  %4877 = vmatmul.mubr.msk.bf16.gmra.mrb[4].mxu1 %vm9721_vm13, %v9720_v25  ;;  %9722 = vst [vmem:[#allocation92_spill] sm:$0xff] %v6549_v17  ;;  %v9724_v30 = vand.u32 15, %v9723_v26  ;;  %v6563_v25 = vmax.f32 %v1899_v4, %v6400_v38  ;;  %v6566_v34 = vmax.f32 %v1832_v36, %v6402_v47  ;;  %v1394_v43 = vld [vmem:[#allocation2 + $0xc9] sm:$0xff] }
 0x17d   : > { %9719 = vst [vmem:[#allocation11_spill] sm:$0xff] %v9718_v9  ;;  %v3202_v42 = vpack.c.bf16 %v6534_v28, %v6469_v14  ;;  %v9730_v37 = vand.u32 15, %v9715_v57  ;;  %v9734_v52 = vand.u32 15, %v9723_v26  ;;  %v9735_v4 = vmov 0  ;;  %v5210_v26 = vpop.eup %5209  ;;  %1366 = vst.msk [vmem:[#allocation2 + $0xe8] sm:$0xff] %vm9721_vm13, %v6552_v11  ;;  %v1683_v0 = vld [vmem:[#allocation2 + $0xce] sm:$0xff] }
 0x17e   : > { %vm6556_vm11 = vcmp.ge.s32.totalorder %v9724_v30, 1  ;;  %9728 = vst [vmem:[#allocation93_spill] sm:$0xff] %v6563_v25  ;;  %9729 = vst [vmem:[#allocation94_spill] sm:$0xff] %v6566_v34  ;;  %v9731_v30 = vmov 0  ;;  %v6585_v36 = vmul.f32 %v5206_v32, %v6203_v41  ;;  %v6594_v57 = vmax.f32 %v1894_v53, %v6560_v19  ;;  %v9745_v53 = vld [vmem:[#allocation14_spill] sm:$0xff] }
 0x17f   : > { %v9726_v62 = vsel %vm6556_vm11, 4294967295, %v9725_v62  ;;  %vm6574_vm1 = vcmp.lt.s32.totalorder %v9730_v37, 14  ;;  %vm6580_vm9 = vcmp.ge.s32.totalorder %v9734_v52, 2  ;;  %v6597_v37 = vmax.f32 %v1900_v49, %v6414_v46  ;;  %v9740_v52 = vld [vmem:[#allocation13_spill] sm:$0xff]  ;;  %v6618_v34 = vld [vmem:[#allocation2 + $0x38] sm:$0xff]  ;;  %1965 = vst.msk [vmem:[#allocation2 + $0x60] sm:$0xff] %vm9721_vm13, %v6563_v25 }
 0x180   : > { %9727 = vst [vmem:[#allocation12_spill] sm:$0xff] %v9726_v62  ;;  %v9732_v30 = vsel %vm6574_vm1, 4294967295, %v9731_v30  ;;  %v9736_v4 = vsel %vm6580_vm9, 4294967295, %v9735_v4  ;;  %v3201_v41 = vpack.c.bf16 %v6552_v11, %v6491_v7  ;;  %v6604_v32 = vmul.f32 %v5208_v63, %v6218_v61  ;;  %9750 = vst [vmem:[#allocation99_spill] sm:$0xff] %v6618_v34  ;;  %v1493_v31 = vld [vmem:[#allocation2 + $0xdf] sm:$0xff]  ;;  %v9844_v62 = vld [vmem:[#allocation88_spill] sm:$0xff] }
 0x181   : > { %9733 = vst [vmem:[#allocation95_spill] sm:$0xff] %v9732_v30  ;;  %9737 = vst [vmem:[#allocation96_spill] sm:$0xff] %v9736_v4  ;;  %v9741_v27 = vand.u32 15, %v9740_v52  ;;  %v9742_v18 = vmov 0  ;;  %v9746_v60 = vand.u32 15, %v9745_v53  ;;  %v9747_v49 = vmov 0 }
 0x182   : > { %9739 = vst [vmem:[#allocation98_spill] sm:$0xff] %v6597_v37  ;;  %v1821_v17 = vmax.f32 %v6410_v33, %v6587_v50  ;;  %v9751_v61 = vmax.f32 %v6412_v3, %v6400_v38  ;;  %v9754_v54 = vmov 0  ;;  %v6639_v33 = vmul.f32 %v5210_v26, %v6222_v58  ;;  %v9757_v3 = vld [vmem:[#allocation52_spill] sm:$0xff]  ;;  %v1588_v59 = vld [vmem:[#allocation2 + $0xda] sm:$0xff] }
 0x183   : > { %vm6608_vm4 = vcmp.lt.s32.totalorder %v9741_v27, 15  ;;  %vm6614_vm9 = vcmp.ge.s32.totalorder %v9746_v60, 1  ;;  %v1393_v27 = vld [vmem:[#allocation2 + $0xc1] sm:$0xff]  ;;  %v9753_v60 = vand.u32 15, %v9740_v52  ;;  %v9759_v25 = vmax.f32 %v9665_v55, %v6390_v16 }
 0x184   : > { %v9743_v18 = vsel %vm6608_vm4, 4294967295, %v9742_v18  ;;  %v9748_v49 = vsel %vm6614_vm9, 4294967295, %v9747_v49  ;;  %v6626_v63 = vmax.f32 %v9751_v61, %v6591_v29  ;;  %vm9752_vm4 = vmmov %vm9721_vm13  ;;  %v1822_v61 = vmax.f32 %v9757_v3, %v6618_v34  ;;  %v1491_v3 = vld [vmem:[#allocation2 + $0xcf] sm:$0xff]  ;;  %v1397_v1 = vld [vmem:[#allocation2 + $0xe1] sm:$0xff] }
 0x185   : > { %9744 = vst [vmem:[#allocation13_spill] sm:$0xff] %v9743_v18  ;;  %9749 = vst [vmem:[#allocation14_spill] sm:$0xff] %v9748_v49  ;;  %vm6634_vm9 = vcmp.lt.s32.totalorder %v9753_v60, 14  ;;  %v6649_v39 = vmax.f32 %v9759_v25, %v6587_v50  ;;  %v9760_v52 = vmax.f32 %v9673_v6, %v6393_v56  ;;  %v1426_v58 = vsel %vm6425_vm3, %v1394_v43, -inf  ;;  %v1586_v29 = vld [vmem:[#allocation2 + $0xca] sm:$0xff] }
 0x186   : > { %1371 = vst.msk [vmem:[#allocation2 + $0x110] sm:$0xff] %vm9752_vm4, %v6585_v36  ;;  %v9755_v54 = vsel %vm6634_vm9, 4294967295, %v9754_v54  ;;  %vm9758_vm1 = vmmov %vm9752_vm4  ;;  %v1457_v26 = vmax.f32 %v6281_v8, %v1393_v27  ;;  %v9762_v55 = vand.u32 15, %v9745_v53  ;;  %v9763_v25 = vmov 0  ;;  %v9767_v6 = vld [vmem:[#allocation21_spill] sm:$0xff]  ;;  %v1490_v27 = vld [vmem:[#allocation2 + $0xc7] sm:$0xff] }
 0x187   : > { %9756 = vst [vmem:[#allocation100_spill] sm:$0xff] %v9755_v54  ;;  %1960 = vst.msk [vmem:[#allocation2 + $0x38] sm:$0xff] %vm9758_vm1, %v6594_v57  ;;  %v6655_v60 = vmax.f32 %v9760_v52, %v6618_v34  ;;  %v9768_v52 = vand.u32 15, %v9767_v6  ;;  %v9769_v56 = vmov 0  ;;  %v6677_v43 = vmax.f32 %v1821_v17, %v6589_v13  ;;  %v6702_v34 = vld [vmem:[#allocation2 + $0xde] sm:$0xff] }
 0x188   : > { %vm9761_vm4 = vmmov %vm9758_vm1  ;;  %vm6664_vm1 = vcmp.ge.s32.totalorder %v9762_v55, 2  ;;  %v1458_v53 = vmax.f32 %v6434_v51, %v1426_v58  ;;  %v1523_v55 = vsel %vm6444_vm15, %v1491_v3, -inf  ;;  %v9774_v58 = vmax.f32 %v6214_v20, %v6383_v44  ;;  %v1585_v20 = vld [vmem:[#allocation2 + $0xc2] sm:$0xff] }
 0x189   : > { %1966 = vst.msk [vmem:[#allocation2 + $0x68] sm:$0xff] %vm9761_vm4, %v6597_v37  ;;  %v9764_v25 = vsel %vm6664_vm1, 4294967295, %v9763_v25  ;;  %vm9766_vm13 = vmmov %vm9761_vm4  ;;  %vm6672_vm9 = vcmp.lt.s32.totalorder %v9768_v52, 15  ;;  %4880 = vmatprep.mubr.msk.bf16.mxu1 %vm9761_vm4, %v3201_v41  ;;  %v1618_v52 = vsel %vm6438_vm6, %v1586_v29, -inf  ;;  %v1396_v37 = vld [vmem:[#allocation2 + $0xd9] sm:$0xff]  ;;  %v9773_v41 = vsel %vm6271_vm7, %v6355_v5, -inf }
 0x18a   : > { %9765 = vst [vmem:[#allocation52_spill] sm:$0xff] %v9764_v25  ;;  %1369 = vst.msk [vmem:[#allocation2 + $0x100] sm:$0xff] %vm9766_vm13, %v6604_v32  ;;  %v9770_v56 = vsel %vm6672_vm9, 4294967295, %v9769_v56  ;;  %v1553_v51 = vmax.f32 %v1457_v26, %v9773_v41  ;;  %v1555_v3 = vmax.f32 %v9774_v58, %v1523_v55  ;;  %v1715_v29 = vsel %vm6464_vm5, %v1683_v0, -inf  ;;  %v1587_v5 = vld [vmem:[#allocation2 + $0xd2] sm:$0xff] }
 0x18b   : > { %9771 = vst [vmem:[#allocation21_spill] sm:$0xff] %v9770_v56  ;;  %vm9772_vm13 = vmmov %vm9761_vm4  ;;  %v1428_v8 = vsel %vm6473_vm2, %v1396_v37, -inf  ;;  %v9775_v17 = vand.u32 15, %v9767_v6  ;;  %v9776_v24 = vmov 0  ;;  %v1554_v26 = vmax.f32 %v1458_v53, %v1490_v27  ;;  %v1492_v55 = vld [vmem:[#allocation2 + $0xd7] sm:$0xff] }
 0x18c   : > { %1372 = vst.msk [vmem:[#allocation2 + $0x118] sm:$0xff] %vm9772_vm13, %v6639_v33  ;;  %v1460_v44 = vmax.f32 %v6303_v21, %v1428_v8  ;;  %v1525_v0 = vsel %vm6501_vm8, %v1493_v31, -inf  ;;  %v1620_v37 = vsel %vm6495_vm12, %v1588_v59, -inf  ;;  %4881 = vmatmul.mubr.msk.bf16.gmra.mrb[8].mxu1 %vm9772_vm13, %v3202_v42  ;;  %v1649_v41 = vmax.f32 %v1553_v51, %v1585_v20  ;;  %v1399_v58 = vld [vmem:[#allocation2 + $0xf1] sm:$0xff]  ;;  %v1398_v59 = vld [vmem:[#allocation2 + $0xe9] sm:$0xff]  ;;  %v5212_v51 = vpop.eup %5211 }
 0x18d   : > { %vm6706_vm4 = vcmp.lt.s32.totalorder %v9775_v17, 14  ;;  %v1651_v6 = vmax.f32 %v1555_v3, %v1587_v5  ;;  %v1717_v17 = vsel %vm6515_vm0, %v6702_v34, -inf  ;;  %v6720_v53 = vmax.f32 %v1822_v61, %v6560_v19  ;;  %v1684_v21 = vld [vmem:[#allocation2 + $0xd6] sm:$0xff]  ;;  %v1682_v3 = vld [vmem:[#allocation2 + $0xc6] sm:$0xff] }
 0x18e   : > { %v9777_v24 = vsel %vm6706_vm4, 4294967295, %v9776_v24  ;;  %v1650_v8 = vmax.f32 %v1554_v26, %v1618_v52  ;;  %v1556_v27 = vmax.f32 %v1460_v44, %v1492_v55  ;;  %v1463_v31 = vmax.f32 %v6469_v14, %v1399_v58  ;;  %v1494_v52 = vld [vmem:[#allocation2 + $0xe7] sm:$0xff]  ;;  %v1495_v26 = vld [vmem:[#allocation2 + $0xef] sm:$0xff] }
 0x18f   : > { %9778 = vst [vmem:[#allocation101_spill] sm:$0xff] %v9777_v24  ;;  %v9779_v34 = vsel %vm6285_vm10, %v6375_v15, -inf  ;;  %v6731_v19 = vmax.f32 %v1651_v6, %v1715_v29  ;;  %v1430_v61 = vsel %vm6538_vm14, %v1398_v59, -inf  ;;  %v1461_v14 = vmax.f32 %v6491_v7, %v1397_v1  ;;  %v1591_v55 = vld [vmem:[#allocation2 + $0xf2] sm:$0xff]  ;;  %vm9780_vm14 = vmmov %vm9772_vm13 }
 0x190   : > { %v6729_v5 = vmax.f32 %v1649_v41, %v9779_v34  ;;  %v6736_v20 = vmax.f32 %v1650_v8, %v1682_v3  ;;  %v1652_v44 = vmax.f32 %v1556_v27, %v1620_v37  ;;  %v1462_v58 = vmax.f32 %v6552_v11, %v1430_v61  ;;  %v1589_v41 = vld [vmem:[#allocation2 + $0xe2] sm:$0xff]  ;;  %v1590_v34 = vld [vmem:[#allocation2 + $0xea] sm:$0xff]  ;;  %v1688_v42 = vld [vmem:[#allocation2 + $0xf6] sm:$0xff] }
 0x191   : > { %v1527_v15 = vsel %vm6556_vm11, %v1495_v26, -inf  ;;  %v1687_v29 = vld [vmem:[#allocation2 + $0xee] sm:$0xff]  ;;  %1779 = vst.msk [vmem:[#allocation2 + $0xd0] sm:$0xff] %vm9780_vm14, %v6731_v19  ;;  %v1557_v7 = vmax.f32 %v1461_v14, %v1525_v0  ;;  %vm9781_vm0 = vnez %v9732_v30  ;;  %vm9782_vm12 = vnez %v9736_v4  ;;  %v1400_v6 = vld [vmem:[#allocation2 + $0xf9] sm:$0xff]  ;;  %vm9783_vm11 = vmmov %vm9772_vm13 }
 0x192   : > { %1777 = vst.msk [vmem:[#allocation2 + $0xc0] sm:$0xff] %vm9772_vm13, %v6729_v5  ;;  %v1559_v1 = vmax.f32 %v1463_v31, %v1527_v15  ;;  %v1622_v37 = vsel %vm9781_vm0, %v1590_v34, -inf  ;;  %v1719_v11 = vsel %vm9782_vm12, %v1687_v29, -inf  ;;  %v6749_v8 = vld [vmem:[#allocation2 + $0xff] sm:$0xff]  ;;  %v6753_v59 = vmax.f32 %v1652_v44, %v1684_v21  ;;  %v1496_v44 = vld [vmem:[#allocation2 + $0xf7] sm:$0xff] }
 0x193   : > { %v1592_v27 = vld [vmem:[#allocation2 + $0xfa] sm:$0xff]  ;;  %1778 = vst.msk [vmem:[#allocation2 + $0xc8] sm:$0xff] %vm9783_vm11, %v6736_v20  ;;  %v1558_v3 = vmax.f32 %v1462_v58, %v1494_v52  ;;  %vm9784_vm14 = vnez %v9743_v18  ;;  %vm9785_vm13 = vnez %v9748_v49  ;;  %v6762_v14 = vld [vmem:[#allocation2 + $0x111] sm:$0xff]  ;;  %v1653_v15 = vmax.f32 %v1557_v7, %v1589_v41  ;;  %v1686_v41 = vld [vmem:[#allocation2 + $0xe6] sm:$0xff] }
 0x194   : > { %v1432_v0 = vsel %vm9784_vm14, %v1400_v6, -inf  ;;  %v6760_v61 = vld [vmem:[#allocation2 + $0xfe] sm:$0xff]  ;;  %v1655_v34 = vmax.f32 %v1559_v1, %v1591_v55  ;;  %vm9786_vm11 = vnez %v9755_v54  ;;  %vm9787_vm12 = vcmask 15360  }
 0x195   : > { %v1404_v26 = vld [vmem:[#allocation2 + $0x119] sm:$0xff]  ;;  %v1464_v29 = vmax.f32 %v6534_v28, %v1432_v0  ;;  %v1624_v21 = vsel %vm9786_vm11, %v1592_v27, -inf  ;;  %1780 = vst.msk [vmem:[#allocation2 + $0xd8] sm:$0xff] %vm9787_vm12, %v6753_v59  ;;  %v1654_v58 = vmax.f32 %v1558_v3, %v1622_v37  ;;  %v6778_v7 = vmax.f32 %v1653_v15, %v1717_v17 }
 0x196   : > { %v1596_v52 = vld [vmem:[#allocation2 + $0x11a] sm:$0xff]  ;;  %v1436_v31 = vsel %vm6672_vm9, %v1404_v26, -inf  ;;  %v6780_v1 = vmax.f32 %v1655_v34, %v1719_v11  ;;  %v9793_v6 = vmov 0  ;;  %v6789_v26 = vld [vmem:[#allocation2 + $0x8] sm:$0xff]  ;;  %v6796_v11 = vmul.f32 %v5212_v51, %v6227_v48  ;;  %v9802_v34 = vld [vmem:[#allocation25_spill] sm:$0xff] }
 0x197   : > { %v6776_v28 = vld [vmem:[#allocation2] sm:$0xff]  ;;  %9789 = vst [vmem:[#allocation103_spill] sm:$0xff] %v6778_v7  ;;  %v1560_v27 = vmax.f32 %v1464_v29, %v1496_v44  ;;  %v1468_v37 = vmax.f32 %v6639_v33, %v1436_v31  ;;  %9796 = vst [vmem:[#allocation105_spill] sm:$0xff] %v6789_v26  ;;  %v6791_v55 = vmax.f32 %v1654_v58, %v1686_v41  ;;  %v1500_v56 = vld [vmem:[#allocation2 + $0x117] sm:$0xff]  ;;  %v1628_v17 = vsel %vm6706_vm4, %v1596_v52, -inf }
 0x198   : > { %9788 = vst [vmem:[#allocation102_spill] sm:$0xff] %v6776_v28  ;;  %9790 = vst [vmem:[#allocation104_spill] sm:$0xff] %v6780_v1  ;;  %v9791_v3 = vld [vmem:[#allocation23_spill] sm:$0xff]  ;;  %v9799_v15 = vmov 0  ;;  %v9803_v29 = vand.u32 15, %v9802_v34  ;;  %v9804_v44 = vmov 0  ;;  %v1892_v58 = vmax.f32 %v6720_v53, %v6414_v46 }
 0x199   : > { %v9792_v0 = vand.u32 15, %v9791_v3  ;;  %9797 = vst [vmem:[#allocation106_spill] sm:$0xff] %v6791_v55  ;;  %vm9807_vm4 = vcmask 15360   ;;  %v1656_v48 = vmax.f32 %v1560_v27, %v1624_v21  ;;  %v1564_v51 = vmax.f32 %v1468_v37, %v1500_v56  ;;  %v6886_v54 = vld [vmem:[#allocation2 + $0xa0] sm:$0xff]  ;;  %v6925_v4 = vld [vmem:[#allocation2 + $0xb8] sm:$0xff] }
 0x19a   : > { %vm6806_vm11 = vcmp.ge.s32.totalorder %v9803_v29, 1  ;;  %1781 = vst.msk [vmem:[#allocation2 + $0xe0] sm:$0xff] %vm9807_vm4, %v6778_v7  ;;  %vm9808_vm14 = vmmov %vm9807_vm4  ;;  %v9809_v52 = vmov %v9803_v29  ;;  %v9810_v41 = vmov 0  ;;  %v9813_v3 = vmax.f32 %v6677_v43, %v6400_v38  ;;  %v6847_v43 = vld [vmem:[#allocation2 + $0x61] sm:$0xff] }
 0x19b   : > { %vm6785_vm12 = vcmp.lt.s32.totalorder %v9792_v0, 15  ;;  %v9798_v31 = vmov %v9792_v0  ;;  %v9805_v44 = vsel %vm6806_vm11, 4294967295, %v9804_v44  ;;  %1783 = vst.msk [vmem:[#allocation2 + $0xf0] sm:$0xff] %vm9808_vm14, %v6780_v1  ;;  %vm6818_vm0 = vcmp.ge.s32.totalorder %v9809_v52, 2  ;;  %vm9815_vm14 = vmmov %vm9807_vm4  ;;  %v6867_v29 = vld [vmem:[#allocation2 + $0x128] sm:$0xff]  ;;  %v9821_v52 = vld [vmem:[#allocation9_spill] sm:$0xff] }
 0x19c   : > { %v9794_v6 = vsel %vm6785_vm12, 4294967295, %v9793_v6  ;;  %vm6800_vm9 = vcmp.lt.s32.totalorder %v9798_v31, 14  ;;  %9806 = vst [vmem:[#allocation25_spill] sm:$0xff] %v9805_v44  ;;  %v9811_v41 = vsel %vm6818_vm0, 4294967295, %v9810_v41  ;;  %v6826_v0 = vmax.f32 %v9813_v3, %v6776_v28  ;;  %1782 = vst.msk [vmem:[#allocation2 + $0xe8] sm:$0xff] %vm9807_vm4, %v6791_v55  ;;  %v9823_v3 = vld [vmem:[#allocation10_spill] sm:$0xff] }
 0x19d   : > { %9795 = vst [vmem:[#allocation23_spill] sm:$0xff] %v9794_v6  ;;  %v9800_v15 = vsel %vm6800_vm9, 4294967295, %v9799_v15  ;;  %9812 = vst [vmem:[#allocation108_spill] sm:$0xff] %v9811_v41  ;;  %v9814_v46 = vmax.f32 %v6626_v63, %v6390_v16  ;;  %v3203_v56 = vpack.c.bf16 %v6796_v11, %v6604_v32  ;;  %v6841_v21 = vmax.f32 %v1892_v58, %v6789_v26  ;;  %v6927_v30 = vld [vmem:[#allocation2 + $0xc0] sm:$0xff]  ;;  %v9853_v6 = vld [vmem:[#allocation20_spill] sm:$0xff] }
 0x19e   : > { %9801 = vst [vmem:[#allocation107_spill] sm:$0xff] %v9800_v15  ;;  %1370 = vst.msk [vmem:[#allocation2 + $0x108] sm:$0xff] %vm9815_vm14, %v6796_v11  ;;  %v1895_v38 = vmax.f32 %v6649_v39, %v6395_v10  ;;  %v1896_v63 = vmax.f32 %v6655_v60, %v6402_v47  ;;  %v6849_v27 = vmax.f32 %v1656_v48, %v1688_v42  ;;  %v6863_v60 = vld [vmem:[#allocation2 + $0x90] sm:$0xff]  ;;  %v6865_v42 = vld [vmem:[#allocation2 + $0x98] sm:$0xff] }
 0x19f   : > { %v6832_v53 = vmax.f32 %v9814_v46, %v6589_v13  ;;  %v1660_v37 = vmax.f32 %v1564_v51, %v1628_v17  ;;  %1957 = vst.msk [vmem:[#allocation2 + $0x20] sm:$0xff] %vm9807_vm4, %v6826_v0  ;;  %vm9817_vm14 = vmmov %vm9807_vm4  ;;  %v9818_v39 = vmax.f32 %v6480_v23, %v6404_v40  ;;  %v1692_v17 = vld [vmem:[#allocation2 + $0x116] sm:$0xff]  ;;  %v3206_v58 = vpack.c.bf16 %v6841_v21, %v6826_v0  ;;  %v9824_v46 = vld [vmem:[#allocation39_spill] sm:$0xff] }
 0x1a0   : > { %9816 = vst [vmem:[#allocation109_spill] sm:$0xff] %v6849_v27  ;;  %9819 = vst [vmem:[#allocation110_spill] sm:$0xff] %v6867_v29  ;;  %v9820_v48 = vld [vmem:[#allocation97_spill] sm:$0xff]  ;;  %v6877_v23 = vmax.f32 %v1896_v63, %v9821_v52 }
 0x1a1   : > { %1959 = vst.msk [vmem:[#allocation2 + $0x30] sm:$0xff] %vm9817_vm14, %v6832_v53  ;;  %v3207_v31 = vpack.c.bf16 %v6594_v57, %v6832_v53  ;;  %v6861_v34 = vmax.f32 %v9818_v39, %v6587_v50  ;;  %v6874_v51 = vmax.f32 %v1895_v38, %v9820_v48  ;;  %v9822_v50 = vld [vmem:[#allocation99_spill] sm:$0xff]  ;;  %v9825_v39 = vmax.f32 %v9823_v3, %v9824_v46  ;;  %vm9826_vm14 = vmmov %vm9807_vm4  ;;  %v9829_v38 = vld [vmem:[#allocation93_spill] sm:$0xff] }
 0x1a2   : > { %1958 = vst.msk [vmem:[#allocation2 + $0x28] sm:$0xff] %vm9807_vm4, %v6841_v21  ;;  %4884 = vmatprep.mubr.msk.bf16.mxu1 %vm9826_vm14, %v3203_v56  ;;  %1784 = vst.msk [vmem:[#allocation2 + $0xf8] sm:$0xff] %vm9807_vm4, %v6849_v27  ;;  %v6890_v18 = vmax.f32 %v1660_v37, %v1692_v17  ;;  %v9830_v48 = vld [vmem:[#allocation98_spill] sm:$0xff]  ;;  %v9833_v56 = vld [vmem:[#allocation92_spill] sm:$0xff] }
 0x1a3   : > { %v6883_v24 = vmax.f32 %v9825_v39, %v9822_v50  ;;  %vm9828_vm8 = vmmov %vm9807_vm4  ;;  %v9831_v50 = vpack.c.bf16 %v6639_v33, %v6585_v36  ;;  %v1901_v3 = vmax.f32 %v9833_v56, %v6863_v60  ;;  %v6904_v39 = vld [vmem:[#allocation2 + $0xa8] sm:$0xff]  ;;  %v6906_v37 = vld [vmem:[#allocation2 + $0xb0] sm:$0xff]  ;;  %1961 = vst.msk [vmem:[#allocation2 + $0x40] sm:$0xff] %vm9807_vm4, %v6874_v51  ;;  %v3208_v33 = vpack.c.bf16 %v6877_v23, %v6874_v51 }
 0x1a4   : > { %9827 = vst [vmem:[#allocation97_spill] sm:$0xff] %v6890_v18  ;;  %1963 = vst.msk [vmem:[#allocation2 + $0x50] sm:$0xff] %vm9828_vm8, %v6861_v34  ;;  %v6908_v17 = vld [vmem:[#allocation2 + $0x112] sm:$0xff]  ;;  %v9850_v27 = vld [vmem:[#allocation3_spill] sm:$0xff] }
 0x1a5   : > { %vm9832_vm14 = vmmov %vm9807_vm4  ;;  %v9837_v56 = vld [vmem:[#allocation94_spill] sm:$0xff]  ;;  %v1401_v29 = vld [vmem:[#allocation2 + $0x101] sm:$0xff] }
 0x1a6   : > { %4885 = vmatmul.mubr.msk.bf16.gmra.mrb[12].mxu1 %vm9832_vm14, %v9831_v50  ;;  %vm9834_vm8 = vmmov %vm9807_vm4  ;;  %v1902_v63 = vmax.f32 %v9837_v56, %v6865_v42  ;;  %v6935_v50 = vmax.f32 %v1901_v3, %v6390_v16  ;;  %v9840_v56 = vld [vmem:[#allocation87_spill] sm:$0xff]  ;;  %v9845_v16 = vld [vmem:[#allocation89_spill] sm:$0xff]  ;;  %v1465_v1 = vmax.f32 %v6604_v32, %v1401_v29 }
 0x1a7   : > { %4822 = vmatprep.mubr.msk.bf16.mxu0 %vm9834_vm8, %v3206_v58  ;;  %vm9835_vm2 = vmmov %vm9807_vm4  ;;  %v9838_v58 = vld [vmem:[#allocation85_spill] sm:$0xff]  ;;  %v1834_v9 = vmax.f32 %v9840_v56, %v6865_v42  ;;  %v2085_v44 = vld [vmem:[#allocation2 + $0x1f] sm:$0xff] }
 0x1a8   : > { %1962 = vst.msk [vmem:[#allocation2 + $0x48] sm:$0xff] %vm9835_vm2, %v6877_v23  ;;  %vm9836_vm14 = vmmov %vm9835_vm2  ;;  %v1833_v52 = vmax.f32 %v9838_v58, %v6863_v60  ;;  %v9841_v58 = vld [vmem:[#allocation86_spill] sm:$0xff]  ;;  %v6943_v22 = vmax.f32 %v1902_v63, %v9843_v12  ;;  %v1499_v45 = vld [vmem:[#allocation2 + $0x10f] sm:$0xff] }
 0x1a9   : > { %1964 = vst.msk [vmem:[#allocation2 + $0x58] sm:$0xff] %vm9836_vm14, %v6883_v24  ;;  %vm9839_vm8 = vmmov %vm9835_vm2  ;;  %v1835_v35 = vmax.f32 %v9841_v58, %v6886_v54  ;;  %v6955_v56 = vmax.f32 %v1834_v9, %v9824_v46  ;;  %v9848_v63 = vld [vmem:[#allocation50_spill] sm:$0xff]  ;;  %v1594_v55 = vld [vmem:[#allocation2 + $0x10a] sm:$0xff]  ;;  %v9851_v9 = vsel %vm9785_vm13, %v6749_v8, -inf }
 0x1aa   : > { %1788 = vst.msk [vmem:[#allocation2 + $0x118] sm:$0xff] %vm9835_vm2, %v6890_v18  ;;  %4823 = vmatmul.mubr.msk.bf16.vlgmr.msra.gmra.mrb[32].mxu0 %vm9839_vm8, %v3207_v31  ;;  %vm9842_vm4 = vmmov %vm9835_vm2  ;;  %v6946_v2 = vmax.f32 %v1833_v52, %v6404_v40  ;;  %v1402_v18 = vld [vmem:[#allocation2 + $0x109] sm:$0xff]  ;;  %v9849_v58 = vld [vmem:[#allocation90_spill] sm:$0xff]  ;;  %v1561_v26 = vmax.f32 %v1465_v1, %v9851_v9  ;;  %vm9854_vm8 = vnez %v9853_v6 }
 0x1ab   : > { %4826 = vmatprep.mubr.msk.bf16.mxu0 %vm9842_vm4, %v3208_v33  ;;  %vm9846_vm14 = vmmov %vm9835_vm2  ;;  %v9847_v33 = vld [vmem:[#allocation67_spill] sm:$0xff]  ;;  %4855 = vmatpush3.bf16.msra.mxu0 %v9850_v27  ;;  %v1434_v3 = vsel %vm6785_vm12, %v1402_v18, -inf  ;;  %1968 = vst.msk [vmem:[#allocation2 + $0x78] sm:$0xff] %vm9835_vm2, %v6943_v22  ;;  %v1531_v27 = vsel %vm6806_vm11, %v1499_v45, -inf  ;;  %v1626_v18 = vsel %vm6800_vm9, %v1594_v55, -inf  ;;  %v1691_v32 = vld [vmem:[#allocation2 + $0x10e] sm:$0xff] }
 0x1ac   : > { %1967 = vst.msk [vmem:[#allocation2 + $0x70] sm:$0xff] %vm9846_vm14, %v6935_v50  ;;  %v6958_v12 = vmax.f32 %v1835_v35, %v9847_v33  ;;  %v1466_v31 = vmax.f32 %v6796_v11, %v1434_v3  ;;  %v1498_v52 = vld [vmem:[#allocation2 + $0x107] sm:$0xff]  ;;  %v9852_v11 = vmax.f32 %v6585_v36, %v6762_v14  ;;  %v1723_v45 = vsel %vm6818_vm0, %v1691_v32, -inf  ;;  %v1991_v15 = vld [vmem:[#allocation2 + $0x31] sm:$0xff] }
 0x1ad   : > { %v1989_v29 = vld [vmem:[#allocation2 + $0x21] sm:$0xff]  ;;  %v1990_v35 = vld [vmem:[#allocation2 + $0x29] sm:$0xff]  ;;  %v2055_v8 = vmax.f32 %v6832_v53, %v1991_v15  ;;  %vm9862_vm0 = vcmask 15360  }
 0x1ae   : > { %v1563_v3 = vmax.f32 %v9852_v11, %v1531_v27  ;;  %v2053_v55 = vmax.f32 %v6826_v0, %v1989_v29  ;;  %v1562_v7 = vmax.f32 %v1466_v31, %v1498_v52  ;;  %v1593_v28 = vld [vmem:[#allocation2 + $0x102] sm:$0xff]  ;;  %v2022_v49 = vsel %vm9854_vm8, %v1990_v35, -inf  ;;  %v2087_v1 = vld [vmem:[#allocation2 + $0x2f] sm:$0xff]  ;;  %vm9871_vm9 = vmmov %vm9862_vm0 }
 0x1af   : > { %v9855_v9 = vld [vmem:[#allocation16_spill] sm:$0xff]  ;;  %v1657_v14 = vmax.f32 %v1561_v26, %v1593_v28  ;;  %v2054_v11 = vmax.f32 %v6841_v21, %v2022_v49  ;;  %v9861_v49 = vpack.c.bf16 %v6883_v24, %v6861_v34  ;;  %vm9872_vm11 = vmmov %vm9862_vm0 }
 0x1b0   : > { %vm9856_vm4 = vnez %v9855_v9  ;;  %v1659_v27 = vmax.f32 %v1563_v3, %v6908_v17  ;;  %v1690_v32 = vld [vmem:[#allocation2 + $0x106] sm:$0xff]  ;;  %v1658_v29 = vmax.f32 %v1562_v7, %v1626_v18  ;;  %v9863_v7 = vsel %vm6664_vm1, %v6760_v61, -inf  ;;  %vm9877_vm1 = vmmov %vm9871_vm9 }
 0x1b1   : > { %v2117_v36 = vsel %vm9856_vm4, %v2085_v44, -inf  ;;  %v2086_v41 = vld [vmem:[#allocation2 + $0x27] sm:$0xff]  ;;  %v2089_v44 = vld [vmem:[#allocation2 + $0x3f] sm:$0xff]  ;;  %v7016_v21 = vmax.f32 %v1657_v14, %v9863_v7  ;;  %v9895_v9 = vpack.c.bf16 %v6943_v22, %v6935_v50 }
 0x1b2   : > { %v9857_v0 = vld [vmem:[#allocation4_spill] sm:$0xff]  ;;  %v7000_v6 = vmax.f32 %v2053_v55, %v2117_v36  ;;  %4827 = vmatmul.mubr.msk.bf16.gmra.mrb[36].mxu0 %vm9862_vm0, %v9861_v49  ;;  %v7018_v17 = vmax.f32 %v1659_v27, %v1723_v45  ;;  %v7020_v18 = vld [vmem:[#allocation2 + $0x118] sm:$0xff]  ;;  %v2150_v3 = vmax.f32 %v2054_v11, %v2086_v41  ;;  %v9867_v36 = vpack.c.bf16 %v9830_v48, %v9829_v38  ;;  %v9869_v14 = vld [vmem:[#allocation27_spill] sm:$0xff] }
 0x1b3   : > { %vm9858_vm14 = vnez %v9857_v0  ;;  %v2182_v52 = vld [vmem:[#allocation2 + $0x2a] sm:$0xff]  ;;  %v7004_v15 = vld [vmem:[#allocation2 + $0x22] sm:$0xff]  ;;  %9864 = vst [vmem:[#allocation9_spill] sm:$0xff] %v7016_v21  ;;  %9866 = vst [vmem:[#allocation10_spill] sm:$0xff] %v7020_v18 }
 0x1b4   : > { %v2119_v31 = vsel %vm9858_vm14, %v2087_v1, -inf  ;;  %v9859_v53 = vld [vmem:[#allocation24_spill] sm:$0xff]  ;;  %9865 = vst [vmem:[#allocation99_spill] sm:$0xff] %v7018_v17  ;;  %v7022_v55 = vld [vmem:[#allocation2 + $0x32] sm:$0xff]  ;;  %v2281_v1 = vld [vmem:[#allocation2 + $0x3e] sm:$0xff]  ;;  %4830 = vmatprep.mubr.msk.bf16.mxu0 %vm9862_vm0, %v9867_v36 }
 0x1b5   : > { %v7002_v35 = vmax.f32 %v2055_v8, %v2119_v31  ;;  %vm9860_vm2 = vnez %v9859_v53  ;;  %v1993_v26 = vld [vmem:[#allocation2 + $0x41] sm:$0xff]  ;;  %v7029_v31 = vmax.f32 %v1658_v29, %v1690_v32  ;;  %v1994_v27 = vld [vmem:[#allocation2 + $0x49] sm:$0xff]  ;;  %v1995_v11 = vld [vmem:[#allocation2 + $0x51] sm:$0xff]  ;;  %1785 = vst.msk [vmem:[#allocation2 + $0x100] sm:$0xff] %vm9871_vm9, %v7016_v21 }
 0x1b6   : > { %v2214_v28 = vsel %vm9860_vm2, %v2182_v52, -inf  ;;  %v2057_v8 = vmax.f32 %v6874_v51, %v1993_v26  ;;  %vm9870_vm2 = vnez %v9869_v14  ;;  %v2091_v51 = vld [vmem:[#allocation2 + $0x4f] sm:$0xff]  ;;  %1787 = vst.msk [vmem:[#allocation2 + $0x110] sm:$0xff] %vm9872_vm11, %v7018_v17  ;;  %v2090_v52 = vld [vmem:[#allocation2 + $0x47] sm:$0xff]  ;;  %v9882_v17 = vld [vmem:[#allocation38_spill] sm:$0xff] }
 0x1b7   : > { %9868 = vst [vmem:[#allocation39_spill] sm:$0xff] %v7029_v31  ;;  %v2121_v41 = vsel %vm9870_vm2, %v2089_v44, -inf  ;;  %v7041_v32 = vmax.f32 %v2150_v3, %v2214_v28  ;;  %v9873_v26 = vld [vmem:[#allocation29_spill] sm:$0xff]  ;;  %v9875_v7 = vld [vmem:[#allocation35_spill] sm:$0xff]  ;;  %1786 = vst.msk [vmem:[#allocation2 + $0x108] sm:$0xff] %vm9877_vm1, %v7029_v31  ;;  %v2059_v28 = vmax.f32 %v6861_v34, %v1995_v11 }
 0x1b8   : > { %v2153_v29 = vmax.f32 %v2057_v8, %v2121_v41  ;;  %vm9874_vm0 = vnez %v9873_v26  ;;  %vm9876_vm12 = vnez %v9875_v7  ;;  %v2186_v44 = vld [vmem:[#allocation2 + $0x4a] sm:$0xff]  ;;  %v2185_v61 = vld [vmem:[#allocation2 + $0x42] sm:$0xff]  ;;  %v2188_v18 = vld [vmem:[#allocation2 + $0x5a] sm:$0xff] }
 0x1b9   : > { %v2313_v49 = vsel %vm9874_vm0, %v2281_v1, -inf  ;;  %v2026_v36 = vsel %vm9876_vm12, %v1994_v27, -inf  ;;  %v9878_v3 = vld [vmem:[#allocation36_spill] sm:$0xff]  ;;  %v1996_v1 = vld [vmem:[#allocation2 + $0x59] sm:$0xff]  ;;  %v9880_v7 = vld [vmem:[#allocation37_spill] sm:$0xff]  ;;  %vm9883_vm12 = vnez %v9882_v17 }
 0x1ba   : > { %v2058_v53 = vmax.f32 %v6877_v23, %v2026_v36  ;;  %vm9879_vm9 = vnez %v9878_v3  ;;  %v2283_v41 = vld [vmem:[#allocation2 + $0x4e] sm:$0xff]  ;;  %v2249_v25 = vmax.f32 %v2153_v29, %v2185_v61  ;;  %vm9881_vm11 = vnez %v9880_v7  ;;  %v2093_v31 = vld [vmem:[#allocation2 + $0x5f] sm:$0xff]  ;;  %v2092_v17 = vld [vmem:[#allocation2 + $0x57] sm:$0xff] }
 0x1bb   : > { %v2123_v8 = vsel %vm9879_vm9, %v2091_v51, -inf  ;;  %v2218_v27 = vsel %vm9881_vm11, %v2186_v44, -inf  ;;  %v2315_v21 = vsel %vm9883_vm12, %v2283_v41, -inf  ;;  %v9884_v26 = vld [vmem:[#allocation44_spill] sm:$0xff]  ;;  %v2285_v23 = vld [vmem:[#allocation2 + $0x5e] sm:$0xff]  ;;  %v1999_v29 = vld [vmem:[#allocation2 + $0x71] sm:$0xff] }
 0x1bc   : > { %vm9885_vm1 = vnez %v9884_v26  ;;  %v2154_v36 = vmax.f32 %v2058_v53, %v2090_v52  ;;  %v2155_v34 = vmax.f32 %v2059_v28, %v2123_v8  ;;  %v9886_v51 = vld [vmem:[#allocation46_spill] sm:$0xff]  ;;  %v1998_v61 = vld [vmem:[#allocation2 + $0x69] sm:$0xff]  ;;  %v7064_v44 = vmax.f32 %v2249_v25, %v2313_v49 }
 0x1bd   : > { %v2028_v45 = vsel %vm9885_vm1, %v1996_v1, -inf  ;;  %vm9887_vm13 = vnez %v9886_v51  ;;  %v2095_v7 = vld [vmem:[#allocation2 + $0x6f] sm:$0xff]  ;;  %v9888_v1 = vmax.f32 %v9829_v38, %v6847_v43  ;;  %v2189_v51 = vld [vmem:[#allocation2 + $0x62] sm:$0xff]  ;;  %v9893_v0 = vld [vmem:[#allocation54_spill] sm:$0xff]  ;;  %vm9896_vm12 = vcmask 15360  }
 0x1be   : > { %v2060_v11 = vmax.f32 %v6883_v24, %v2028_v45  ;;  %v2125_v3 = vsel %vm9887_vm13, %v2093_v31, -inf  ;;  %v2187_v41 = vld [vmem:[#allocation2 + $0x52] sm:$0xff]  ;;  %v9891_v52 = vld [vmem:[#allocation48_spill] sm:$0xff]  ;;  %v2250_v28 = vmax.f32 %v2154_v36, %v2218_v27  ;;  %vm9894_vm13 = vnez %v9893_v0  ;;  %4831 = vmatmul.mubr.msk.bf16.gmra.mrb[40].mxu0 %vm9896_vm12, %v9895_v9  ;;  %v7085_v36 = vld [vmem:[#allocation2 + $0x3a] sm:$0xff] }
 0x1bf   : > { %v2157_v26 = vmax.f32 %v9888_v1, %v2125_v3  ;;  %v9889_v14 = vld [vmem:[#allocation45_spill] sm:$0xff]  ;;  %vm9892_vm1 = vnez %v9891_v52  ;;  %v2251_v31 = vmax.f32 %v2155_v34, %v2187_v41  ;;  %v2030_v25 = vsel %vm9894_vm13, %v1998_v61, -inf  ;;  %v2282_v43 = vld [vmem:[#allocation2 + $0x46] sm:$0xff] }
 0x1c0   : > { %vm9890_vm11 = vnez %v9889_v14  ;;  %v2317_v24 = vsel %vm9892_vm1, %v2285_v23, -inf  ;;  %v2190_v45 = vld [vmem:[#allocation2 + $0x6a] sm:$0xff]  ;;  %v2156_v8 = vmax.f32 %v2060_v11, %v2092_v17  ;;  %v2063_v3 = vmax.f32 %v6935_v50, %v1999_v29  ;;  %v9897_v23 = vld [vmem:[#allocation55_spill] sm:$0xff]  ;;  %v9902_v29 = vld [vmem:[#allocation58_spill] sm:$0xff] }
 0x1c1   : > { %v2220_v53 = vsel %vm9890_vm11, %v2188_v18, -inf  ;;  %v2287_v49 = vld [vmem:[#allocation2 + $0x6e] sm:$0xff]  ;;  %v2253_v38 = vmax.f32 %v2157_v26, %v2189_v51  ;;  %v2062_v18 = vmax.f32 %v9830_v48, %v2030_v25  ;;  %vm9898_vm11 = vnez %v9897_v23  ;;  %v7083_v17 = vld [vmem:[#allocation2 + $0x39] sm:$0xff] }
 0x1c2   : > { %v2127_v27 = vsel %vm9898_vm11, %v2095_v7, -inf  ;;  %v7087_v34 = vmax.f32 %v2250_v28, %v2282_v43  ;;  %v7089_v11 = vmax.f32 %v2251_v31, %v2315_v21  ;;  %v2094_v61 = vld [vmem:[#allocation2 + $0x67] sm:$0xff]  ;;  %v2252_v41 = vmax.f32 %v2156_v8, %v2220_v53  ;;  %v9899_v9 = vld [vmem:[#allocation57_spill] sm:$0xff] }
 0x1c3   : > { %vm9900_vm12 = vnez %v9899_v9  ;;  %vm9901_vm13 = vcmask 15360   ;;  %v2284_v48 = vld [vmem:[#allocation2 + $0x56] sm:$0xff]  ;;  %v7095_v50 = vmax.f32 %v2253_v38, %v2317_v24  ;;  %v2158_v7 = vmax.f32 %v2062_v18, %v2094_v61  ;;  %v7099_v28 = vld [vmem:[#allocation2 + $0xc8] sm:$0xff] }
 0x1c4   : > { %v2222_v26 = vsel %vm9900_vm12, %v2190_v45, -inf  ;;  %2377 = vst.msk [vmem:[#allocation2 + $0x40] sm:$0xff] %vm9901_vm13, %v7064_v44  ;;  %v2159_v51 = vmax.f32 %v2063_v3, %v2127_v27  ;;  %vm9903_vm11 = vnez %v9902_v29  ;;  %vm9904_vm1 = vmmov %vm9901_vm13  ;;  %v2286_v21 = vld [vmem:[#allocation2 + $0x66] sm:$0xff]  ;;  %v7105_v53 = vmax.f32 %v2252_v41, %v2284_v48  ;;  %v2191_v45 = vld [vmem:[#allocation2 + $0x72] sm:$0xff] }
 0x1c5   : > { %v2319_v1 = vsel %vm9903_vm11, %v2287_v49, -inf  ;;  %2378 = vst.msk [vmem:[#allocation2 + $0x48] sm:$0xff] %vm9904_vm1, %v7087_v34  ;;  %vm9905_vm9 = vmmov %vm9904_vm1  ;;  %v9906_v24 = vmax.f32 %v6946_v2, %v6886_v54  ;;  %v9907_v8 = vmax.f32 %v6955_v56, %v6904_v39  ;;  %v9908_v49 = vld [vmem:[#allocation68_spill] sm:$0xff]  ;;  %v9909_v43 = vmax.f32 %v9844_v62, %v6904_v39  ;;  %v9915_v27 = vld [vmem:[#allocation62_spill] sm:$0xff] }
 0x1c6   : > { %2379 = vst.msk [vmem:[#allocation2 + $0x50] sm:$0xff] %vm9905_vm9, %v7089_v11  ;;  %vm9910_vm13 = vmmov %vm9904_vm1  ;;  %v2254_v18 = vmax.f32 %v2158_v7, %v2222_v26  ;;  %v2255_v3 = vmax.f32 %v2159_v51, %v2191_v45  ;;  %v9911_v2 = vmax.f32 %v9845_v16, %v6906_v37  ;;  %v1840_v61 = vmax.f32 %v9915_v27, %v7099_v28  ;;  %v2277_v41 = vld [vmem:[#allocation2 + $0x1e] sm:$0xff]  ;;  %v9927_v27 = vld [vmem:[#allocation41_spill] sm:$0xff] }
 0x1c7   : > { %v7111_v31 = vmax.f32 %v9906_v24, %v6395_v10  ;;  %v7117_v25 = vmax.f32 %v9907_v8, %v6402_v47  ;;  %v1872_v38 = vmax.f32 %v9909_v43, %v9908_v49  ;;  %2381 = vst.msk [vmem:[#allocation2 + $0x60] sm:$0xff] %vm9910_vm13, %v7095_v50  ;;  %v1905_v10 = vmax.f32 %v6958_v12, %v6906_v37  ;;  %vm9912_vm9 = vmmov %vm9904_vm1  ;;  %v7154_v45 = vld [vmem:[#allocation2 + $0xd8] sm:$0xff] }
 0x1c8   : > { %v1873_v56 = vmax.f32 %v9911_v2, %v6863_v60  ;;  %2380 = vst.msk [vmem:[#allocation2 + $0x58] sm:$0xff] %vm9912_vm9, %v7105_v53  ;;  %vm9913_vm12 = vmmov %vm9904_vm1  ;;  %v9914_v12 = vmax.f32 %v9848_v63, %v6925_v4  ;;  %v7146_v26 = vmax.f32 %v2254_v18, %v2286_v21  ;;  %v7148_v48 = vmax.f32 %v2255_v3, %v2319_v1  ;;  %v7156_v24 = vld [vmem:[#allocation2 + $0x77] sm:$0xff] }
 0x1c9   : > { %1969 = vst.msk [vmem:[#allocation2 + $0x80] sm:$0xff] %vm9904_vm1, %v7111_v31  ;;  %v3212_v47 = vpack.c.bf16 %v7117_v25, %v7111_v31  ;;  %v1906_v62 = vmax.f32 %v1872_v38, %v6925_v4  ;;  %v7151_v7 = vmax.f32 %v1905_v10, %v6404_v40  ;;  %v7158_v8 = vld [vmem:[#allocation2 + $0x76] sm:$0xff]  ;;  %v9917_v40 = vmax.f32 %v9849_v58, %v6927_v30  ;;  %v2279_v38 = vld [vmem:[#allocation2 + $0x2e] sm:$0xff]  ;;  %vm9918_vm13 = vmmov %vm9904_vm1 }
 0x1ca   : > { %1970 = vst.msk [vmem:[#allocation2 + $0x88] sm:$0xff] %vm9913_vm12, %v7117_v25  ;;  %v1874_v16 = vmax.f32 %v9914_v12, %v6865_v42  ;;  %v1907_v51 = vmax.f32 %v1873_v56, %v6927_v30  ;;  %vm9916_vm12 = vmmov %vm9904_vm1  ;;  %v1876_v43 = vmax.f32 %v1840_v61, %v6904_v39  ;;  %v7179_v18 = vld [vmem:[#allocation2 + $0xd0] sm:$0xff]  ;;  %v9920_v58 = vld [vmem:[#allocation76_spill] sm:$0xff] }
 0x1cb   : > { %4834 = vmatprep.mubr.msk.bf16.mxu0 %vm9916_vm12, %v3212_v47  ;;  %v7162_v63 = vmax.f32 %v1906_v62, %v9824_v46  ;;  %v1875_v1 = vmax.f32 %v9917_v40, %v6886_v54  ;;  %2382 = vst.msk [vmem:[#allocation2 + $0x68] sm:$0xff] %vm9918_vm13, %v7146_v26  ;;  %vm9919_vm9 = vmmov %vm9904_vm1  ;;  %vm9921_vm12 = vnez %v9920_v58  ;;  %v9922_v10 = vld [vmem:[#allocation33_spill] sm:$0xff] }
 0x1cc   : > { %v1908_v21 = vmax.f32 %v1874_v16, %v7099_v28  ;;  %2383 = vst.msk [vmem:[#allocation2 + $0x70] sm:$0xff] %vm9919_vm9, %v7148_v48  ;;  %v7177_v46 = vmax.f32 %v1907_v51, %v9847_v33  ;;  %v2024_v3 = vsel %vm9921_vm12, %v7083_v17, -inf  ;;  %vm9923_vm11 = vnez %v9922_v10  ;;  %v9924_v56 = vld [vmem:[#allocation17_spill] sm:$0xff]  ;;  %vm9926_vm9 = vmmov %vm9904_vm1  ;;  %v2278_v16 = vld [vmem:[#allocation2 + $0x26] sm:$0xff] }
 0x1cd   : > { %1971 = vst.msk [vmem:[#allocation2 + $0x90] sm:$0xff] %vm9904_vm1, %v7151_v7  ;;  %v2216_v2 = vsel %vm9923_vm11, %v7085_v36, -inf  ;;  %vm9925_vm13 = vnez %v9924_v56  ;;  %v3213_v33 = vpack.c.bf16 %v7162_v63, %v7151_v7  ;;  %v1909_v12 = vmax.f32 %v1875_v1, %v7179_v18  ;;  %vm9931_vm11 = vmmov %vm9904_vm1 }
 0x1ce   : > { %v2309_v47 = vsel %vm9925_vm13, %v2277_v41, -inf  ;;  %1972 = vst.msk [vmem:[#allocation2 + $0x98] sm:$0xff] %vm9926_vm9, %v7162_v63  ;;  %v7194_v62 = vmax.f32 %v1908_v21, %v9908_v49  ;;  %v1910_v17 = vmax.f32 %v1876_v43, %v7154_v45  ;;  %v2056_v36 = vmax.f32 %v6594_v57, %v2024_v3  ;;  %vm9930_vm9 = vmmov %vm9904_vm1  ;;  %v7227_v43 = vld [vmem:[#allocation2 + $0x40] sm:$0xff] }
 0x1cf   : > { %1973 = vst.msk [vmem:[#allocation2 + $0xa0] sm:$0xff] %vm9904_vm1, %v7177_v46  ;;  %vm9928_vm13 = vnez %v9927_v27  ;;  %v9929_v41 = vmax.f32 %v7000_v6, %v7004_v15  ;;  %v7209_v49 = vmax.f32 %v7041_v32, %v2278_v16  ;;  %4835 = vmatmul.mubr.msk.bf16.gmra.mrb[44].mxu0 %vm9930_vm9, %v3213_v33  ;;  %v7217_v57 = vmax.f32 %v1909_v12, %v6863_v60  ;;  %v2088_v6 = vld [vmem:[#allocation2 + $0x37] sm:$0xff]  ;;  %v9935_v12 = vld [vmem:[#allocation60_spill] sm:$0xff]  ;;  %vm9939_vm12 = vmmov %vm9904_vm1 }
 0x1d0   : > { %v2311_v61 = vsel %vm9928_vm13, %v2279_v38, -inf  ;;  %1974 = vst.msk [vmem:[#allocation2 + $0xa8] sm:$0xff] %vm9931_vm11, %v7194_v62  ;;  %v3214_v21 = vpack.c.bf16 %v7194_v62, %v7177_v46  ;;  %v7220_v40 = vmax.f32 %v1910_v17, %v6865_v42  ;;  %v2280_v15 = vld [vmem:[#allocation2 + $0x36] sm:$0xff]  ;;  %v9932_v32 = vmax.f32 %v7002_v35, %v7022_v55  ;;  %vm9933_vm11 = vmmov %vm9904_vm1  ;;  %v5341_v35 = vld [vmem:[%s9024_s3 + $0x3] sm:$0x1] }
 0x1d1   : > { %v7206_v51 = vmax.f32 %v9929_v41, %v2309_v47  ;;  %v2000_v38 = vld [vmem:[#allocation2 + $0x79] sm:$0xff]  ;;  %v2001_v3 = vld [vmem:[#allocation2 + $0x81] sm:$0xff]  ;;  %v2152_v33 = vmax.f32 %v2056_v36, %v2088_v6  ;;  %2374 = vst.msk [vmem:[#allocation2 + $0x28] sm:$0xff] %vm9904_vm1, %v7209_v49  ;;  %v1841_v60 = vmax.f32 %v6729_v5, %v7179_v18  ;;  %v1842_v42 = vmax.f32 %v6736_v20, %v7154_v45  ;;  %v9937_v36 = vld [vmem:[#allocation65_spill] sm:$0xff] }
 0x1d2   : > { %v7225_v1 = vmax.f32 %v9932_v32, %v2311_v61  ;;  %v2097_v47 = vld [vmem:[#allocation2 + $0x7f] sm:$0xff]  ;;  %vm9934_vm9 = vcmask 1040384   ;;  %vm9936_vm13 = vnez %v9935_v12  ;;  %v2065_v16 = vmax.f32 %v7111_v31, %v2001_v3  ;;  %4838 = vmatprep.mubr.msk.bf16.mxu0 %vm9904_vm1, %v3214_v21  ;;  %1975 = vst.msk [vmem:[#allocation2 + $0xb0] sm:$0xff] %vm9939_vm12, %v7217_v57  ;;  %vm9940_vm0 = vmmov %vm9904_vm1  ;;  %v9942_v31 = vld [vmem:[#allocation64_spill] sm:$0xff] }
 0x1d3   : > { %2373 = vst.msk [vmem:[#allocation2 + $0x20] sm:$0xff] %vm9933_vm11, %v7206_v51  ;;  %v7241_v55 = vsel %vm9934_vm9, %v5341_v35, 0  ;;  %v2032_v17 = vsel %vm9936_vm13, %v2000_v38, -inf  ;;  %vm9938_vm11 = vnez %v9937_v36  ;;  %v2192_v41 = vld [vmem:[#allocation2 + $0x7a] sm:$0xff]  ;;  %v3215_v5 = vpack.c.bf16 %v7220_v40, %v7217_v57  ;;  %vm9941_vm9 = vmmov %vm9940_vm0  ;;  %v2098_v14 = vld [vmem:[#allocation2 + $0x87] sm:$0xff] }
 0x1d4   : > { %v2129_v61 = vsel %vm9938_vm11, %v2097_v47, -inf  ;;  %1976 = vst.msk [vmem:[#allocation2 + $0xb8] sm:$0xff] %vm9940_vm0, %v7220_v40  ;;  %v2064_v20 = vmax.f32 %v6943_v22, %v2032_v17  ;;  %vm9943_vm13 = vnez %v9942_v31  ;;  %v2289_v32 = vld [vmem:[#allocation2 + $0x7e] sm:$0xff]  ;;  %v2248_v38 = vmax.f32 %v2152_v33, %v2216_v2  ;;  %v2002_v12 = vld [vmem:[#allocation2 + $0x89] sm:$0xff] }
 0x1d5   : > { %2375 = vst.msk [vmem:[#allocation2 + $0x30] sm:$0xff] %vm9941_vm9, %v7225_v1  ;;  %v2224_v6 = vsel %vm9943_vm13, %v2192_v41, -inf  ;;  %v7262_v3 = vld [vmem:[#allocation2 + $0xe0] sm:$0xff]  ;;  %v2161_v47 = vmax.f32 %v2065_v16, %v2129_v61  ;;  %v9944_v35 = vld [vmem:[#allocation66_spill] sm:$0xff]  ;;  %v2099_v0 = vld [vmem:[#allocation2 + $0x8f] sm:$0xff]  ;;  %v7267_v56 = vmax.f32 %v1841_v60, %v6906_v37  ;;  %v7270_v22 = vmax.f32 %v1842_v42, %v6925_v4 }
 0x1d6   : > { %vm9945_vm0 = vnez %v9944_v35  ;;  %v2194_v27 = vld [vmem:[#allocation2 + $0x8a] sm:$0xff]  ;;  %v2160_v2 = vmax.f32 %v2064_v20, %v7156_v24  ;;  %v2193_v33 = vld [vmem:[#allocation2 + $0x82] sm:$0xff]  ;;  %v2004_v36 = vld [vmem:[#allocation2 + $0x99] sm:$0xff]  ;;  %v7281_v24 = vmax.f32 %v2248_v38, %v2280_v15 }
 0x1d7   : > { %v2321_v9 = vsel %vm9945_vm0, %v2289_v32, -inf  ;;  %v2003_v17 = vld [vmem:[#allocation2 + $0x91] sm:$0xff]  ;;  %v9946_v41 = vld [vmem:[#allocation71_spill] sm:$0xff]  ;;  %v9948_v16 = vld [vmem:[#allocation72_spill] sm:$0xff]  ;;  %v2257_v10 = vmax.f32 %v2161_v47, %v2193_v33 }
 0x1d8   : > { %vm9947_vm12 = vnez %v9946_v41  ;;  %vm9949_vm1 = vnez %v9948_v16  ;;  %v9950_v32 = vld [vmem:[#allocation74_spill] sm:$0xff]  ;;  %v2067_v42 = vmax.f32 %v7151_v7, %v2003_v17  ;;  %v2291_v35 = vld [vmem:[#allocation2 + $0x8e] sm:$0xff]  ;;  %v2256_v20 = vmax.f32 %v2160_v2, %v2224_v6  ;;  %v2290_v29 = vld [vmem:[#allocation2 + $0x86] sm:$0xff] }
 0x1d9   : > { %v2034_v21 = vsel %vm9947_vm12, %v2002_v12, -inf  ;;  %v2131_v61 = vsel %vm9949_vm1, %v2099_v0, -inf  ;;  %vm9951_vm9 = vnez %v9950_v32  ;;  %v9952_v41 = vld [vmem:[#allocation75_spill] sm:$0xff]  ;;  %v9954_v0 = vld [vmem:[#allocation77_spill] sm:$0xff] }
 0x1da   : > { %v2226_v31 = vsel %vm9951_vm9, %v2194_v27, -inf  ;;  %v2066_v60 = vmax.f32 %v7117_v25, %v2034_v21  ;;  %vm9953_vm13 = vnez %v9952_v41  ;;  %v2005_v16 = vld [vmem:[#allocation2 + $0xa1] sm:$0xff]  ;;  %vm9955_vm12 = vnez %v9954_v0  ;;  %v2100_v7 = vld [vmem:[#allocation2 + $0x97] sm:$0xff]  ;;  %v2198_v47 = vld [vmem:[#allocation2 + $0xaa] sm:$0xff] }
 0x1db   : > { %v2323_v12 = vsel %vm9953_vm13, %v2291_v35, -inf  ;;  %v2036_v32 = vsel %vm9955_vm12, %v2004_v36, -inf  ;;  %v2101_v27 = vld [vmem:[#allocation2 + $0x9f] sm:$0xff]  ;;  %v7289_v25 = vmax.f32 %v2257_v10, %v2321_v9  ;;  %v2163_v33 = vmax.f32 %v2067_v42, %v2131_v61  ;;  %v2195_v35 = vld [vmem:[#allocation2 + $0x92] sm:$0xff]  ;;  %v9963_v42 = vld [vmem:[#allocation80_spill] sm:$0xff] }
 0x1dc   : > { %v2162_v21 = vmax.f32 %v2066_v60, %v2098_v14  ;;  %v2068_v15 = vmax.f32 %v7162_v63, %v2036_v32  ;;  %v2196_v6 = vld [vmem:[#allocation2 + $0x9a] sm:$0xff]  ;;  %vm9956_vm9 = vcmask 15360   ;;  %v7296_v36 = vmax.f32 %v2256_v20, %v7158_v8  ;;  %v2006_v63 = vld [vmem:[#allocation2 + $0xa9] sm:$0xff]  ;;  %v2007_v61 = vld [vmem:[#allocation2 + $0xb1] sm:$0xff] }
 0x1dd   : > { %v2293_v38 = vld [vmem:[#allocation2 + $0x9e] sm:$0xff]  ;;  %4839 = vmatmul.mubr.msk.bf16.gmra.mrb[48].mxu0 %vm9956_vm9, %v3215_v5  ;;  %vm9957_vm13 = vmmov %vm9956_vm9  ;;  %v2069_v2 = vmax.f32 %v7177_v46, %v2005_v16  ;;  %v2259_v32 = vmax.f32 %v2163_v33, %v2195_v35  ;;  %v2103_v20 = vld [vmem:[#allocation2 + $0xaf] sm:$0xff] }
 0x1de   : > { %2376 = vst.msk [vmem:[#allocation2 + $0x38] sm:$0xff] %vm9957_vm13, %v7281_v24  ;;  %v9958_v9 = vld [vmem:[#allocation79_spill] sm:$0xff]  ;;  %v9960_v14 = vld [vmem:[#allocation78_spill] sm:$0xff]  ;;  %vm9962_vm0 = vmmov %vm9956_vm9  ;;  %v2258_v5 = vmax.f32 %v2162_v21, %v2226_v31  ;;  %v2164_v60 = vmax.f32 %v2068_v15, %v2100_v7  ;;  %vm9964_vm13 = vnez %v9963_v42 }
 0x1df   : > { %vm9959_vm12 = vnez %v9958_v9  ;;  %vm9961_vm1 = vnez %v9960_v14  ;;  %2385 = vst.msk [vmem:[#allocation2 + $0x80] sm:$0xff] %vm9962_vm0, %v7289_v25  ;;  %v2325_v8 = vsel %vm9964_vm13, %v2293_v38, -inf  ;;  %vm9965_vm9 = vmmov %vm9962_vm0  ;;  %v9966_v16 = vld [vmem:[#allocation81_spill] sm:$0xff]  ;;  %v9968_v14 = vld [vmem:[#allocation82_spill] sm:$0xff]  ;;  %v7318_v33 = vmax.f32 %v2259_v32, %v2323_v12 }
 0x1e0   : > { %v2133_v10 = vsel %vm9959_vm12, %v2101_v27, -inf  ;;  %v2228_v17 = vsel %vm9961_vm1, %v2196_v6, -inf  ;;  %2384 = vst.msk [vmem:[#allocation2 + $0x78] sm:$0xff] %vm9965_vm9, %v7296_v36  ;;  %vm9967_vm12 = vnez %v9966_v16  ;;  %v2071_v6 = vmax.f32 %v7217_v57, %v2007_v61  ;;  %v2295_v31 = vld [vmem:[#allocation2 + $0xae] sm:$0xff]  ;;  %v2197_v15 = vld [vmem:[#allocation2 + $0xa2] sm:$0xff] }
 0x1e1   : > { %v2165_v46 = vmax.f32 %v2069_v2, %v2133_v10  ;;  %v2038_v27 = vsel %vm9967_vm12, %v2006_v63, -inf  ;;  %vm9969_vm1 = vnez %v9968_v14  ;;  %v7314_v21 = vld [vmem:[#allocation2 + $0x48] sm:$0xff]  ;;  %v7316_v7 = vmax.f32 %v2258_v5, %v2290_v29  ;;  %v7321_v2 = vld [vmem:[#allocation2 + $0x30] sm:$0xff]  ;;  %v9970_v61 = vld [vmem:[#allocation83_spill] sm:$0xff] }
 0x1e2   : > { %v2135_v0 = vsel %vm9969_vm1, %v2103_v20, -inf  ;;  %v2260_v38 = vmax.f32 %v2164_v60, %v2228_v17  ;;  %v2070_v35 = vmax.f32 %v7194_v62, %v2038_v27  ;;  %v2292_v10 = vld [vmem:[#allocation2 + $0x96] sm:$0xff]  ;;  %v2102_v63 = vld [vmem:[#allocation2 + $0xa7] sm:$0xff]  ;;  %vm9971_vm0 = vnez %v9970_v61 }
 0x1e3   : > { %v2261_v16 = vmax.f32 %v2165_v46, %v2197_v15  ;;  %v2167_v57 = vmax.f32 %v2071_v6, %v2135_v0  ;;  %v2230_v20 = vsel %vm9971_vm0, %v2198_v47, -inf  ;;  %v9972_v14 = vld [vmem:[#allocation84_spill] sm:$0xff]  ;;  %vm9974_vm12 = vcmask 15360   ;;  %v2199_v17 = vld [vmem:[#allocation2 + $0xb2] sm:$0xff]  ;;  %v7341_v32 = vld [vmem:[#allocation2 + $0x20] sm:$0xff] }
 0x1e4   : > { %vm9973_vm9 = vnez %v9972_v14  ;;  %v7327_v29 = vld [vmem:[#allocation2 + $0xe8] sm:$0xff]  ;;  %2386 = vst.msk [vmem:[#allocation2 + $0x88] sm:$0xff] %vm9974_vm12, %v7316_v7  ;;  %vm9975_vm1 = vmmov %vm9974_vm12  ;;  %v7333_v62 = vmax.f32 %v2260_v38, %v2292_v10  ;;  %v2166_v12 = vmax.f32 %v2070_v35, %v2102_v63  ;;  %v7335_v5 = vld [vmem:[#allocation2 + $0x50] sm:$0xff]  ;;  %v2437_v0 = vmax.f32 %v7206_v51, %v7321_v2 }
 0x1e5   : > { %v2327_v42 = vsel %vm9973_vm9, %v2295_v31, -inf  ;;  %2387 = vst.msk [vmem:[#allocation2 + $0x90] sm:$0xff] %vm9975_vm1, %v7318_v33  ;;  %v2440_v47 = vmax.f32 %v7281_v24, %v7314_v21  ;;  %v7343_v60 = vmax.f32 %v2261_v16, %v2325_v8  ;;  %v2263_v46 = vmax.f32 %v2167_v57, %v2199_v17  ;;  %v7345_v27 = vld [vmem:[#allocation2 + $0x38] sm:$0xff]  ;;  %v7349_v31 = vld [vmem:[#allocation2 + $0x28] sm:$0xff]  ;;  %vm9977_vm12 = vmmov %vm9975_vm1 }
 0x1e6   : > { %v7347_v6 = vld [vmem:[#allocation2 + $0x58] sm:$0xff]  ;;  %v9976_v15 = vmax.f32 %v7225_v1, %v7227_v43  ;;  %v1912_v51 = vmax.f32 %v7270_v22, %v7327_v29  ;;  %v2294_v24 = vld [vmem:[#allocation2 + $0xa6] sm:$0xff]  ;;  %2388 = vst.msk [vmem:[#allocation2 + $0x98] sm:$0xff] %vm9977_vm12, %v7333_v62  ;;  %v2262_v8 = vmax.f32 %v2166_v12, %v2230_v20  ;;  %v2438_v16 = vmax.f32 %v7209_v49, %v7345_v27  ;;  %vm9980_vm12 = vmmov %vm9975_vm1 }
 0x1e7   : > { %v2473_v35 = vmax.f32 %v2437_v0, %v6589_v13  ;;  %v2476_v10 = vmax.f32 %v2440_v47, %v7349_v31  ;;  %2389 = vst.msk [vmem:[#allocation2 + $0xa0] sm:$0xff] %vm9975_vm1, %v7343_v60  ;;  %v7365_v1 = vmax.f32 %v2263_v46, %v2327_v42  ;;  %v9979_v22 = vmax.f32 %v7267_v56, %v7262_v3  ;;  %v7377_v49 = vld [vmem:[#allocation2 + $0xb7] sm:$0xff]  ;;  %vm9981_vm0 = vmmov %vm9975_vm1 }
 0x1e8   : > { %v2475_v38 = vmax.f32 %v9976_v15, %v7341_v32  ;;  %v7375_v20 = vmax.f32 %v1912_v51, %v6904_v39  ;;  %v7379_v12 = vld [vmem:[#allocation2 + $0xb6] sm:$0xff]  ;;  %v7381_v17 = vmax.f32 %v2262_v8, %v2294_v24  ;;  %v1844_v51 = vmax.f32 %v6753_v59, %v7327_v29 }
 0x1e9   : > { %9978 = vst [vmem:[#allocation93_spill] sm:$0xff] %v7365_v1  ;;  %v7372_v57 = vmax.f32 %v9979_v22, %v6886_v54  ;;  %v5342_v0 = vld [vmem:[#allocation2 + $0x18] sm:$0xff]  ;;  %v2507_v47 = vmax.f32 %v2473_v35, %v7227_v43  ;;  %v2510_v46 = vmax.f32 %v2476_v10, %v7347_v6  ;;  %v7385_v15 = vld [vmem:[#allocation2 + $0xf0] sm:$0xff]  ;;  %2391 = vst.msk [vmem:[#allocation2 + $0xb0] sm:$0xff] %vm9980_vm12, %v7365_v1 }
 0x1ea   : > { %v2509_v63 = vmax.f32 %v2475_v38, %v7335_v5  ;;  %v2474_v42 = vmax.f32 %v2438_v16, %v5342_v0  ;;  %1978 = vst.msk [vmem:[#allocation2 + $0xc8] sm:$0xff] %vm9981_vm0, %v7375_v20  ;;  %v7398_v56 = vld [vmem:[#allocation2 + $0xf8] sm:$0xff]  ;;  %v1843_v38 = vmax.f32 %v6731_v19, %v7262_v3  ;;  %vm9982_vm12 = vmmov %vm9981_vm0  ;;  %v2441_v35 = vmax.f32 %v7064_v44, %v7335_v5  ;;  %v7419_v10 = vld [vmem:[#allocation2 + $0x60] sm:$0xff] }
 0x1eb   : > { %1977 = vst.msk [vmem:[#allocation2 + $0xc0] sm:$0xff] %vm9975_vm1, %v7372_v57  ;;  %v3216_v39 = vpack.c.bf16 %v7375_v20, %v7372_v57  ;;  %v9983_v24 = vld [vmem:[#allocation102_spill] sm:$0xff]  ;;  %v7410_v16 = vmax.f32 %v2510_v46, %v5342_v0  ;;  %vm9985_vm1 = vmmov %vm9981_vm0  ;;  %v1880_v59 = vmax.f32 %v1844_v51, %v7099_v28  ;;  %v9986_v22 = vld [vmem:[#allocation103_spill] sm:$0xff] }
 0x1ec   : > { %v7390_v54 = vmax.f32 %v2509_v63, %v6589_v13  ;;  %2390 = vst.msk [vmem:[#allocation2 + $0xa8] sm:$0xff] %vm9982_vm12, %v7381_v17  ;;  %v2508_v13 = vmax.f32 %v2474_v42, %v7314_v21  ;;  %v7408_v8 = vmax.f32 %v2507_v47, %v9983_v24  ;;  %v1879_v19 = vmax.f32 %v1843_v38, %v6927_v30  ;;  %v9987_v42 = vld [vmem:[#allocation105_spill] sm:$0xff]  ;;  %vm9988_vm12 = vmmov %vm9981_vm0  ;;  %v7434_v46 = vld [vmem:[#allocation2 + $0x68] sm:$0xff] }
 0x1ed   : > { %9984 = vst [vmem:[#allocation98_spill] sm:$0xff] %v7410_v16  ;;  %4842 = vmatprep.mubr.msk.bf16.mxu0 %vm9985_vm1, %v3216_v39  ;;  %v2442_v63 = vmax.f32 %v7087_v34, %v7347_v6  ;;  %v1845_v0 = vmax.f32 %v9986_v22, %v7385_v15  ;;  %2576 = vst.msk [vmem:[#allocation2 + $0x38] sm:$0xff] %vm9981_vm0, %v7410_v16  ;;  %v2477_v39 = vmax.f32 %v2441_v35, %v7321_v2  ;;  %v7437_v34 = vld [vmem:[#allocation2 + $0x100] sm:$0xff]  ;;  %v9989_v38 = vld [vmem:[#allocation106_spill] sm:$0xff] }
 0x1ee   : > { %2575 = vst.msk [vmem:[#allocation2 + $0x30] sm:$0xff] %vm9981_vm0, %v7390_v54  ;;  %v7426_v47 = vmax.f32 %v2508_v13, %v9987_v42  ;;  %v3650_v44 = vpack.c.bf16 %v7410_v16, %v7390_v54  ;;  %v1846_v51 = vmax.f32 %v9989_v38, %v7398_v56  ;;  %v1913_v13 = vmax.f32 %v1879_v19, %v7385_v15  ;;  %vm9990_vm1 = vmmov %vm9981_vm0 }
 0x1ef   : > { %2573 = vst.msk [vmem:[#allocation2 + $0x20] sm:$0xff] %vm9988_vm12, %v7408_v8  ;;  %v1914_v24 = vmax.f32 %v1880_v59, %v7398_v56  ;;  %v2478_v22 = vmax.f32 %v2442_v63, %v7345_v27  ;;  %v1881_v42 = vmax.f32 %v1845_v0, %v7179_v18  ;;  %v2511_v35 = vmax.f32 %v2477_v39, %v7419_v10  ;;  %v7460_v0 = vld [vmem:[#allocation2 + $0x108] sm:$0xff]  ;;  %vm9991_vm12 = vmmov %vm9981_vm0 }
 0x1f0   : > { %2574 = vst.msk [vmem:[#allocation2 + $0x28] sm:$0xff] %vm9990_vm1, %v7426_v47  ;;  %v3649_v61 = vpack.c.bf16 %v7426_v47, %v7408_v8  ;;  %v1882_v16 = vmax.f32 %v1846_v51, %v7154_v45  ;;  %v2443_v38 = vmax.f32 %v7089_v11, %v7419_v10  ;;  %v7454_v19 = vmax.f32 %v1913_v13, %v6906_v37  ;;  %v9992_v13 = vld [vmem:[#allocation61_spill] sm:$0xff]  ;;  %vm9996_vm9 = vmmov %vm9990_vm1 }
 0x1f1   : > { %v7457_v59 = vmax.f32 %v1914_v24, %v6925_v4  ;;  %v2512_v63 = vmax.f32 %v2478_v22, %v7434_v46  ;;  %v1915_v14 = vmax.f32 %v1881_v42, %v7437_v34  ;;  %v7465_v41 = vmax.f32 %v2511_v35, %v7341_v32 }
 0x1f2   : > { %4890 = vmatprep.mubr.msk.bf16.mxu1 %vm9991_vm12, %v3649_v61  ;;  %v2008_v39 = vld [vmem:[#allocation2 + $0xb9] sm:$0xff]  ;;  %v2009_v9 = vld [vmem:[#allocation2 + $0xc1] sm:$0xff]  ;;  %v1916_v37 = vmax.f32 %v1882_v16, %v7460_v0  ;;  %v2444_v4 = vmax.f32 %v7105_v53, %v7434_v46  ;;  %v2479_v11 = vmax.f32 %v2443_v38, %v7227_v43  ;;  %vm9993_vm0 = vnez %v9992_v13  ;;  %vm9995_vm12 = vmmov %vm9990_vm1 }
 0x1f3   : > { %v2105_v51 = vld [vmem:[#allocation2 + $0xbf] sm:$0xff]  ;;  %v2040_v24 = vsel %vm9993_vm0, %v2008_v39, -inf  ;;  %v2073_v22 = vmax.f32 %v7372_v57, %v2009_v9  ;;  %4891 = vmatmul.mubr.msk.bf16.vlgmr.msra.gmra.mrb[16].mxu1 %vm9990_vm1, %v3650_v44  ;;  %1979 = vst.msk [vmem:[#allocation2 + $0xd0] sm:$0xff] %vm9995_vm12, %v7454_v19  ;;  %v3217_v53 = vpack.c.bf16 %v7457_v59, %v7454_v19  ;;  %v9997_v16 = vld [vmem:[#allocation5_spill] sm:$0xff]  ;;  %v7488_v35 = vmax.f32 %v2512_v63, %v7349_v31  ;;  %vm10003_vm12 = vmmov %vm9990_vm1 }
 0x1f4   : > { %v2137_v61 = vsel %vm6271_vm7, %v2105_v51, -inf  ;;  %v2200_v1 = vld [vmem:[#allocation2 + $0xba] sm:$0xff]  ;;  %1980 = vst.msk [vmem:[#allocation2 + $0xd8] sm:$0xff] %vm9996_vm9, %v7457_v59  ;;  %v2072_v32 = vmax.f32 %v7220_v40, %v2040_v24  ;;  %vm9998_vm0 = vnez %v9997_v16  ;;  %4923 = vmatpush3.bf16.msra.mxu1 %v7241_v55  ;;  %v7493_v44 = vmax.f32 %v1915_v14, %v6927_v30  ;;  %v7495_v38 = vld [vmem:[#allocation2 + $0x70] sm:$0xff]  ;;  %vm10001_vm9 = vmmov %vm9990_vm1 }
 0x1f5   : > { %v2232_v9 = vsel %vm9998_vm0, %v2200_v1, -inf  ;;  %v2297_v57 = vld [vmem:[#allocation2 + $0xbe] sm:$0xff]  ;;  %9999 = vst [vmem:[#allocation92_spill] sm:$0xff] %v7488_v35  ;;  %2577 = vst.msk [vmem:[#allocation2 + $0x40] sm:$0xff] %vm9990_vm1, %v7465_v41  ;;  %v2607_v40 = vld [vmem:[#allocation2 + $0x31] sm:$0xff]  ;;  %v2169_v24 = vmax.f32 %v2073_v22, %v2137_v61  ;;  %4843 = vmatmul.mubr.msk.bf16.gmra.mrb[52].mxu0 %vm10001_vm9, %v3217_v53  ;;  %v7503_v55 = vmax.f32 %v1916_v37, %v7099_v28 }
 0x1f6   : > { %v7497_v39 = vld [vmem:[#allocation2 + $0x78] sm:$0xff]  ;;  %v2329_v16 = vsel %vm6285_vm10, %v2297_v57, -inf  ;;  %v2480_v31 = vmax.f32 %v2444_v4, %v7314_v21  ;;  %v2671_v30 = vmax.f32 %v7390_v54, %v2607_v40  ;;  %v2168_v13 = vmax.f32 %v2072_v32, %v7377_v49  ;;  %v2201_v42 = vld [vmem:[#allocation2 + $0xc2] sm:$0xff]  ;;  %2578 = vst.msk [vmem:[#allocation2 + $0x48] sm:$0xff] %vm10003_vm12, %v7488_v35  ;;  %vm10004_vm9 = vmmov %vm9990_vm1 }
 0x1f7   : > { %v2701_v51 = vld [vmem:[#allocation2 + $0x1f] sm:$0xff]  ;;  %v3651_v22 = vpack.c.bf16 %v7488_v35, %v7465_v41  ;;  %1981 = vst.msk [vmem:[#allocation2 + $0xe0] sm:$0xff] %vm9990_vm1, %v7493_v44  ;;  %v2606_v37 = vld [vmem:[#allocation2 + $0x29] sm:$0xff]  ;;  %v2265_v4 = vmax.f32 %v2169_v24, %v2201_v42  ;;  %v3218_v54 = vpack.c.bf16 %v7503_v55, %v7493_v44  ;;  %v2513_v49 = vmax.f32 %v2479_v11, %v7495_v38  ;;  %vm10019_vm12 = vmmov %vm9990_vm1 }
 0x1f8   : > { %v2733_v63 = vsel %vm9856_vm4, %v2701_v51, -inf  ;;  %v2605_v28 = vld [vmem:[#allocation2 + $0x21] sm:$0xff]  ;;  %1982 = vst.msk [vmem:[#allocation2 + $0xe8] sm:$0xff] %vm10004_vm9, %v7503_v55  ;;  %v2514_v61 = vmax.f32 %v2480_v31, %v7497_v39  ;;  %v2638_v32 = vsel %vm9854_vm8, %v2606_v37, -inf  ;;  %v2703_v40 = vld [vmem:[#allocation2 + $0x2f] sm:$0xff]  ;;  %v2264_v51 = vmax.f32 %v2168_v13, %v2232_v9  ;;  %vm10006_vm4 = vmmov %vm9990_vm1 }
 0x1f9   : > { %v2669_v57 = vmax.f32 %v7408_v8, %v2605_v28  ;;  %4894 = vmatprep.mubr.msk.bf16.mxu1 %vm10006_vm4, %v3651_v22  ;;  %v10007_v42 = vld [vmem:[#allocation104_spill] sm:$0xff]  ;;  %v7529_v14 = vmax.f32 %v7426_v47, %v2638_v32  ;;  %v2735_v31 = vsel %vm9858_vm14, %v2703_v40, -inf  ;;  %v7535_v37 = vmax.f32 %v2265_v4, %v2329_v16  ;;  %vm10012_vm8 = vmmov %vm9990_vm1  ;;  %v1817_v4 = vld [vmem:[#allocation2 + $0x110] sm:$0xff] }
 0x1fa   : > { %v1847_v24 = vmax.f32 %v10007_v42, %v7437_v34  ;;  %v7531_v35 = vld [vmem:[#allocation2 + $0x27] sm:$0xff]  ;;  %4846 = vmatprep.mubr.msk.bf16.mxu0 %vm10012_vm8, %v3218_v54  ;;  %v7539_v8 = vmax.f32 %v2513_v49, %v7321_v2  ;;  %v7543_v9 = vmax.f32 %v2671_v30, %v2735_v31  ;;  %v7546_v47 = vmax.f32 %v2264_v51, %v7379_v12  ;;  %v2107_v32 = vld [vmem:[#allocation2 + $0xcf] sm:$0xff]  ;;  %vm10016_vm14 = vmmov %vm9990_vm1 }
 0x1fb   : > { %10008 = vst [vmem:[#allocation94_spill] sm:$0xff] %v7529_v14  ;;  %10009 = vst [vmem:[#allocation85_spill] sm:$0xff] %v7531_v35  ;;  %v2106_v1 = vld [vmem:[#allocation2 + $0xc7] sm:$0xff]  ;;  %v7541_v13 = vmax.f32 %v2669_v57, %v2733_v63  ;;  %v2011_v28 = vld [vmem:[#allocation2 + $0xd1] sm:$0xff]  ;;  %v7549_v40 = vmax.f32 %v2514_v61, %v7345_v27  ;;  %v2139_v12 = vsel %vm6444_vm15, %v2107_v32, -inf }
 0x1fc   : > { %v2298_v53 = vld [vmem:[#allocation2 + $0xc6] sm:$0xff]  ;;  %10011 = vst [vmem:[#allocation87_spill] sm:$0xff] %v7535_v37  ;;  %10014 = vst [vmem:[#allocation31_spill] sm:$0xff] %v7543_v9  ;;  %v2075_v30 = vmax.f32 %v7454_v19, %v2011_v28  ;;  %v2299_v57 = vld [vmem:[#allocation2 + $0xce] sm:$0xff]  ;;  %v1883_v49 = vmax.f32 %v1847_v24, %v7262_v3 }
 0x1fd   : > { %10013 = vst [vmem:[#allocation86_spill] sm:$0xff] %v7541_v13  ;;  %v2010_v22 = vld [vmem:[#allocation2 + $0xc9] sm:$0xff]  ;;  %10015 = vst [vmem:[#allocation88_spill] sm:$0xff] %v7549_v40  ;;  %v2705_v51 = vld [vmem:[#allocation2 + $0x3f] sm:$0xff]  ;;  %v3652_v19 = vpack.c.bf16 %v7549_v40, %v7539_v8  ;;  %v2331_v32 = vsel %vm6464_vm5, %v2299_v57, -inf }
 0x1fe   : > { %2393 = vst.msk [vmem:[#allocation2 + $0xc0] sm:$0xff] %vm10016_vm14, %v7535_v37  ;;  %v2042_v63 = vsel %vm6425_vm3, %v2010_v22, -inf  ;;  %v2202_v54 = vld [vmem:[#allocation2 + $0xca] sm:$0xff]  ;;  %vm10021_vm9 = vmmov %vm9990_vm1  ;;  %v2171_v31 = vmax.f32 %v2075_v30, %v2139_v12  ;;  %v2203_v22 = vld [vmem:[#allocation2 + $0xd2] sm:$0xff] }
 0x1ff   : > { %2579 = vst.msk [vmem:[#allocation2 + $0x50] sm:$0xff] %vm10019_vm12, %v7539_v8  ;;  %v2074_v27 = vmax.f32 %v7375_v20, %v2042_v63  ;;  %v2234_v61 = vsel %vm6438_vm6, %v2202_v54, -inf  ;;  %v10022_v42 = vld [vmem:[#allocation109_spill] sm:$0xff]  ;;  %v2609_v20 = vld [vmem:[#allocation2 + $0x41] sm:$0xff]  ;;  %v2737_v54 = vsel %vm9870_vm2, %v2705_v51, -inf  ;;  %v2012_v13 = vld [vmem:[#allocation2 + $0xd9] sm:$0xff] }
 0x200   : > { %2392 = vst.msk [vmem:[#allocation2 + $0xb8] sm:$0xff] %vm9990_vm1, %v7546_v47  ;;  %v1848_v11 = vmax.f32 %v10022_v42, %v7460_v0  ;;  %v2897_v16 = vld [vmem:[#allocation2 + $0x3e] sm:$0xff]  ;;  %v2673_v9 = vmax.f32 %v7465_v41, %v2609_v20  ;;  %v10025_v35 = vld [vmem:[#allocation29_spill] sm:$0xff]  ;;  %vm10027_vm8 = vmmov %vm9990_vm1  ;;  %v2267_v57 = vmax.f32 %v2171_v31, %v2203_v22 }
 0x201   : > { %2580 = vst.msk [vmem:[#allocation2 + $0x58] sm:$0xff] %vm10021_vm9, %v7549_v40  ;;  %v2170_v2 = vmax.f32 %v2074_v27, %v2106_v1  ;;  %vm10026_vm4 = vnez %v10025_v35  ;;  %v2013_v42 = vld [vmem:[#allocation2 + $0xe1] sm:$0xff]  ;;  %4895 = vmatmul.mubr.msk.bf16.gmra.mrb[20].mxu1 %vm10027_vm8, %v3652_v19  ;;  %v10028_v40 = vld [vmem:[#allocation73_spill] sm:$0xff]  ;;  %v10032_v20 = vld [vmem:[#allocation42_spill] sm:$0xff] }
 0x202   : > { %v2929_v14 = vsel %vm10026_vm4, %v2897_v16, -inf  ;;  %v2109_v30 = vld [vmem:[#allocation2 + $0xdf] sm:$0xff]  ;;  %v1884_v12 = vmax.f32 %v1848_v11, %v7327_v29  ;;  %vm10029_vm14 = vnez %v10028_v40  ;;  %v2077_v63 = vmax.f32 %v7493_v44, %v2013_v42  ;;  %v10030_v24 = vld [vmem:[#allocation8_spill] sm:$0xff]  ;;  %v2108_v31 = vld [vmem:[#allocation2 + $0xd7] sm:$0xff] }
 0x203   : > { %v2044_v51 = vsel %vm10029_vm14, %v2012_v13, -inf  ;;  %vm10031_vm2 = vnez %v10030_v24  ;;  %v2204_v41 = vld [vmem:[#allocation2 + $0xda] sm:$0xff]  ;;  %v2266_v27 = vmax.f32 %v2170_v2, %v2234_v61  ;;  %v2769_v35 = vmax.f32 %v2673_v9, %v2737_v54  ;;  %v2801_v44 = vld [vmem:[#allocation2 + $0x42] sm:$0xff]  ;;  %vm10037_vm9 = vmmov %vm10027_vm8 }
 0x204   : > { %v2141_v1 = vsel %vm10031_vm2, %v2109_v30, -inf  ;;  %v2076_v16 = vmax.f32 %v7457_v59, %v2044_v51  ;;  %vm10033_vm12 = vnez %v10032_v20  ;;  %v2301_v19 = vld [vmem:[#allocation2 + $0xde] sm:$0xff]  ;;  %v2300_v22 = vld [vmem:[#allocation2 + $0xd6] sm:$0xff]  ;;  %v7593_v13 = vmax.f32 %v2267_v57, %v2331_v32  ;;  %v10038_v37 = vld [vmem:[#allocation36_spill] sm:$0xff] }
 0x205   : > { %v2236_v28 = vsel %vm10033_vm12, %v2204_v41, -inf  ;;  %v7591_v11 = vld [vmem:[#allocation2 + $0x120] sm:$0xff]  ;;  %v2173_v42 = vmax.f32 %v2077_v63, %v2141_v1  ;;  %v1917_v2 = vmax.f32 %v1883_v49, %v1817_v4  ;;  %v7597_v9 = vmax.f32 %v2266_v27, %v2298_v53  ;;  %v10036_v20 = vld [vmem:[#allocation10_spill] sm:$0xff]  ;;  %vm10042_vm12 = vmmov %vm10037_vm9 }
 0x206   : > { %v10034_v40 = vld [vmem:[#allocation91_spill] sm:$0xff]  ;;  %v2865_v59 = vmax.f32 %v2769_v35, %v2801_v44  ;;  %v2172_v61 = vmax.f32 %v2076_v16, %v2108_v31  ;;  %v2707_v51 = vld [vmem:[#allocation2 + $0x4f] sm:$0xff]  ;;  %v1918_v24 = vmax.f32 %v1884_v12, %v10036_v20  ;;  %2395 = vst.msk [vmem:[#allocation2 + $0xd0] sm:$0xff] %vm10037_vm9, %v7593_v13  ;;  %vm10039_vm4 = vnez %v10038_v37  ;;  %v10040_v1 = vld [vmem:[#allocation38_spill] sm:$0xff] }
 0x207   : > { %vm10035_vm1 = vnez %v10034_v40  ;;  %v2205_v54 = vld [vmem:[#allocation2 + $0xe2] sm:$0xff]  ;;  %v2899_v41 = vld [vmem:[#allocation2 + $0x4e] sm:$0xff]  ;;  %v2739_v63 = vsel %vm10039_vm4, %v2707_v51, -inf  ;;  %vm10041_vm8 = vnez %v10040_v1  ;;  %v7607_v53 = vmax.f32 %v1917_v2, %v7179_v18  ;;  %2394 = vst.msk [vmem:[#allocation2 + $0xc8] sm:$0xff] %vm10042_vm12, %v7597_v9  ;;  %v7621_v31 = vld [vmem:[#allocation2 + $0x39] sm:$0xff] }
 0x208   : > { %v2333_v30 = vsel %vm10035_vm1, %v2301_v19, -inf  ;;  %v2269_v32 = vmax.f32 %v2173_v42, %v2205_v54  ;;  %v2611_v57 = vld [vmem:[#allocation2 + $0x51] sm:$0xff]  ;;  %v2931_v49 = vsel %vm10041_vm8, %v2899_v41, -inf  ;;  %v7611_v27 = vmax.f32 %v2865_v59, %v2929_v14  ;;  %v7617_v19 = vld [vmem:[#allocation2 + $0x80] sm:$0xff]  ;;  %v7619_v37 = vld [vmem:[#allocation2 + $0x88] sm:$0xff] }
 0x209   : > { %v2268_v12 = vmax.f32 %v2172_v61, %v2236_v28  ;;  %v2675_v35 = vmax.f32 %v7539_v8, %v2611_v57  ;;  %v7615_v16 = vmax.f32 %v1918_v24, %v7154_v45  ;;  %1983 = vst.msk [vmem:[#allocation2 + $0xf0] sm:$0xff] %vm10037_vm9, %v7607_v53  ;;  %v10044_v18 = vld [vmem:[#allocation9_spill] sm:$0xff]  ;;  %v10045_v28 = vld [vmem:[#allocation99_spill] sm:$0xff]  ;;  %vm10051_vm12 = vmmov %vm10037_vm9  ;;  %v2445_v41 = vmax.f32 %v7095_v50, %v7495_v38 }
 0x20a   : > { %10043 = vst [vmem:[#allocation89_spill] sm:$0xff] %v7611_v27  ;;  %v7623_v44 = vmax.f32 %v2269_v32, %v2333_v30  ;;  %v1849_v14 = vmax.f32 %v10044_v18, %v1817_v4  ;;  %v1851_v42 = vmax.f32 %v10045_v28, %v7591_v11  ;;  %v10046_v8 = vld [vmem:[#allocation39_spill] sm:$0xff]  ;;  %vm10052_vm4 = vmmov %vm10037_vm9  ;;  %v2803_v32 = vld [vmem:[#allocation2 + $0x52] sm:$0xff]  ;;  %v2446_v1 = vmax.f32 %v7146_v26, %v7497_v39 }
 0x20b   : > { %v10047_v45 = vmax.f32 %v10046_v8, %v10036_v20  ;;  %v7634_v2 = vld [vmem:[#allocation2 + $0x47] sm:$0xff]  ;;  %v7636_v59 = vld [vmem:[#allocation2 + $0x3a] sm:$0xff]  ;;  %v7644_v51 = vmax.f32 %v2268_v12, %v2300_v22  ;;  %v2771_v4 = vmax.f32 %v2675_v35, %v2739_v63  ;;  %1984 = vst.msk [vmem:[#allocation2 + $0xf8] sm:$0xff] %vm10051_vm12, %v7615_v16  ;;  %v3219_v20 = vpack.c.bf16 %v7615_v16, %v7607_v53  ;;  %vm10053_vm8 = vmmov %vm10052_vm4 }
 0x20c   : > { %10048 = vst [vmem:[#allocation67_spill] sm:$0xff] %v7634_v2  ;;  %10049 = vst [vmem:[#allocation50_spill] sm:$0xff] %v7636_v59  ;;  %v7638_v61 = vld [vmem:[#allocation2 + $0x46] sm:$0xff]  ;;  %v1885_v22 = vmax.f32 %v1849_v14, %v7385_v15  ;;  %v2447_v12 = vmax.f32 %v7148_v48, %v7617_v19  ;;  %v2481_v35 = vmax.f32 %v2445_v41, %v7335_v5  ;;  %v7665_v18 = vld [vmem:[#allocation2 + $0x90] sm:$0xff] }
 0x20d   : > { %v1886_v24 = vmax.f32 %v10047_v45, %v7398_v56  ;;  %10050 = vst [vmem:[#allocation90_spill] sm:$0xff] %v7638_v61  ;;  %v7640_v30 = vld [vmem:[#allocation2 + $0xe7] sm:$0xff]  ;;  %2993 = vst.msk [vmem:[#allocation2 + $0x40] sm:$0xff] %vm10052_vm4, %v7611_v27  ;;  %v2867_v50 = vmax.f32 %v2771_v4, %v2803_v32  ;;  %v2448_v14 = vmax.f32 %v7296_v36, %v7619_v37  ;;  %v7670_v8 = vld [vmem:[#allocation2 + $0x130] sm:$0xff] }
 0x20e   : > { %v7642_v54 = vld [vmem:[#allocation2 + $0xe6] sm:$0xff]  ;;  %vm10054_vm9 = vmmov %vm10052_vm4  ;;  %v1887_v28 = vmax.f32 %v1851_v42, %v7437_v34  ;;  %v1919_v26 = vmax.f32 %v1885_v22, %v7591_v11  ;;  %v2482_v45 = vmax.f32 %v2446_v1, %v7347_v6  ;;  %v2483_v4 = vmax.f32 %v2447_v12, %v7419_v10  ;;  %v10057_v42 = vld [vmem:[#allocation97_spill] sm:$0xff] }
 0x20f   : > { %2397 = vst.msk [vmem:[#allocation2 + $0xe0] sm:$0xff] %vm10053_vm8, %v7623_v44  ;;  %v5343_v57 = vld [vmem:[#allocation2 + $0x128] sm:$0xff]  ;;  %vm10055_vm12 = vmmov %vm10052_vm4  ;;  %v7682_v41 = vmax.f32 %v2867_v50, %v2931_v49  ;;  %v2515_v36 = vmax.f32 %v2481_v35, %v7617_v19  ;;  %v2484_v34 = vmax.f32 %v2448_v14, %v7434_v46  ;;  %v10058_v32 = vld [vmem:[#allocation110_spill] sm:$0xff] }
 0x210   : > { %v1920_v63 = vmax.f32 %v1886_v24, %v5343_v57  ;;  %2396 = vst.msk [vmem:[#allocation2 + $0xd8] sm:$0xff] %vm10054_vm9, %v7644_v51  ;;  %4847 = vmatmul.mubr.msk.bf16.gmra.mrb[56].mxu0 %vm10055_vm12, %v3219_v20  ;;  %v7677_v24 = vld [vmem:[#allocation2 + $0x98] sm:$0xff]  ;;  %v10059_v22 = vmax.f32 %v10057_v42, %v10058_v32  ;;  %v7690_v57 = vld [vmem:[#allocation2 + $0x49] sm:$0xff]  ;;  %v2516_v49 = vmax.f32 %v2482_v45, %v7619_v37  ;;  %vm10063_vm8 = vmmov %vm10052_vm4 }
 0x211   : > { %v7680_v20 = vld [vmem:[#allocation2 + $0x138] sm:$0xff]  ;;  %10056 = vst [vmem:[#allocation3_spill] sm:$0xff] %v7682_v41  ;;  %v2517_v1 = vmax.f32 %v2483_v4, %v7665_v18  ;;  %v1921_v12 = vmax.f32 %v1887_v28, %v7670_v8  ;;  %v7702_v35 = vld [vmem:[#allocation2 + $0x4a] sm:$0xff]  ;;  %v2449_v4 = vmax.f32 %v7289_v25, %v7665_v18  ;;  %vm10070_vm6 = vmmov %vm10063_vm8 }
 0x212   : > { %v7674_v48 = vmax.f32 %v1920_v63, %v7327_v29  ;;  %v1888_v29 = vmax.f32 %v10059_v22, %v7460_v0  ;;  %v7693_v63 = vmax.f32 %v1919_v26, %v7262_v3  ;;  %v7700_v50 = vld [vmem:[#allocation2 + $0x57] sm:$0xff]  ;;  %10061 = vst [vmem:[#allocation55_spill] sm:$0xff] %v7702_v35  ;;  %v2014_v0 = vld [vmem:[#allocation2 + $0xe9] sm:$0xff]  ;;  %v7707_v3 = vmax.f32 %v2515_v36, %v7227_v43  ;;  %v10064_v22 = vld [vmem:[#allocation11_spill] sm:$0xff] }
 0x213   : > { %10060 = vst [vmem:[#allocation48_spill] sm:$0xff] %v7700_v50  ;;  %v7704_v14 = vld [vmem:[#allocation2 + $0x56] sm:$0xff]  ;;  %v2206_v32 = vld [vmem:[#allocation2 + $0xea] sm:$0xff]  ;;  %v2518_v26 = vmax.f32 %v2484_v34, %v7677_v24  ;;  %vm10065_vm9 = vnez %v10064_v22  ;;  %v10068_v35 = vld [vmem:[#allocation95_spill] sm:$0xff] }
 0x214   : > { %1986 = vst.msk [vmem:[#allocation2 + $0x108] sm:$0xff] %vm10052_vm4, %v7674_v48  ;;  %10062 = vst [vmem:[#allocation68_spill] sm:$0xff] %v7704_v14  ;;  %v2111_v42 = vld [vmem:[#allocation2 + $0xef] sm:$0xff]  ;;  %v1922_v45 = vmax.f32 %v1888_v29, %v7680_v20  ;;  %v2046_v27 = vsel %vm10065_vm9, %v2014_v0, -inf  ;;  %vm10069_vm4 = vnez %v10068_v35  ;;  %v3220_v36 = vpack.c.bf16 %v7674_v48, %v7693_v63 }
 0x215   : > { %2995 = vst.msk [vmem:[#allocation2 + $0x50] sm:$0xff] %vm10063_vm8, %v7682_v41  ;;  %v2015_v28 = vld [vmem:[#allocation2 + $0xf1] sm:$0xff]  ;;  %v10066_v14 = vld [vmem:[#allocation12_spill] sm:$0xff]  ;;  %v2238_v43 = vsel %vm10069_vm4, %v2206_v32, -inf  ;;  %v2078_v25 = vmax.f32 %v7503_v55, %v2046_v27  ;;  %v7728_v41 = vmax.f32 %v2516_v49, %v7314_v21  ;;  %vm10072_vm8 = vmmov %vm10070_vm6  ;;  %v7733_v0 = vmax.f32 %v2517_v1, %v7335_v5 }
 0x216   : > { %vm10067_vm12 = vnez %v10066_v14  ;;  %1985 = vst.msk [vmem:[#allocation2 + $0x100] sm:$0xff] %vm10070_vm6, %v7693_v63  ;;  %v2079_v34 = vmax.f32 %v7607_v53, %v2015_v28  ;;  %v2303_v29 = vld [vmem:[#allocation2 + $0xee] sm:$0xff]  ;;  %vm10075_vm14 = vmmov %vm10072_vm8  ;;  %v7741_v55 = vmax.f32 %v2518_v26, %v7347_v6  ;;  %v7744_v53 = vmax.f32 %v1921_v12, %v7385_v15 }
 0x217   : > { %v2143_v61 = vsel %vm10067_vm12, %v2111_v42, -inf  ;;  %10071 = vst [vmem:[#allocation62_spill] sm:$0xff] %v7728_v41  ;;  %2581 = vst.msk [vmem:[#allocation2 + $0x60] sm:$0xff] %vm10072_vm8, %v7707_v3  ;;  %v7735_v42 = vld [vmem:[#allocation2 + $0xa0] sm:$0xff]  ;;  %v10073_v32 = vld [vmem:[#allocation96_spill] sm:$0xff]  ;;  %4850 = vmatprep.mubr.msk.bf16.mxu0 %vm10075_vm14, %v3220_v36  ;;  %v7747_v21 = vmax.f32 %v1922_v45, %v7398_v56  ;;  %v2174_v5 = vmax.f32 %v2078_v25, %v7640_v30 }
 0x218   : > { %vm10074_vm6 = vnez %v10073_v32  ;;  %10076 = vst [vmem:[#allocation76_spill] sm:$0xff] %v7741_v55  ;;  %v7749_v27 = vld [vmem:[#allocation2 + $0xa8] sm:$0xff]  ;;  %v2175_v49 = vmax.f32 %v2079_v34, %v2143_v61  ;;  %2582 = vst.msk [vmem:[#allocation2 + $0x68] sm:$0xff] %vm10072_vm8, %v7728_v41  ;;  %v3653_v1 = vpack.c.bf16 %v7728_v41, %v7707_v3  ;;  %v2450_v6 = vmax.f32 %v7316_v7, %v7677_v24  ;;  %v7760_v15 = vld [vmem:[#allocation2 + $0xb0] sm:$0xff] }
 0x219   : > { %v2335_v59 = vsel %vm10074_vm6, %v2303_v29, -inf  ;;  %vm10077_vm14 = vmmov %vm10072_vm8  ;;  %v2207_v56 = vld [vmem:[#allocation2 + $0xf2] sm:$0xff]  ;;  %v3654_v61 = vpack.c.bf16 %v7741_v55, %v7733_v0  ;;  %v3221_v30 = vpack.c.bf16 %v7747_v21, %v7744_v53  ;;  %v2485_v7 = vmax.f32 %v2449_v4, %v7495_v38 }
 0x21a   : > { %2583 = vst.msk [vmem:[#allocation2 + $0x70] sm:$0xff] %vm10077_vm14, %v7733_v0  ;;  %vm10078_vm3 = vmmov %vm10072_vm8  ;;  %v2451_v12 = vmax.f32 %v7318_v33, %v7735_v42  ;;  %v2270_v26 = vmax.f32 %v2174_v5, %v2238_v43  ;;  %v2271_v45 = vmax.f32 %v2175_v49, %v2207_v56  ;;  %v2486_v28 = vmax.f32 %v2450_v6, %v7497_v39  ;;  %v7782_v34 = vld [vmem:[#allocation2 + $0xb8] sm:$0xff]  ;;  %v10088_v33 = vld [vmem:[#allocation13_spill] sm:$0xff] }
 0x21b   : > { %2584 = vst.msk [vmem:[#allocation2 + $0x78] sm:$0xff] %vm10078_vm3, %v7741_v55  ;;  %vm10079_vm8 = vmmov %vm10078_vm3  ;;  %v2452_v36 = vmax.f32 %v7333_v62, %v7749_v27  ;;  %v2519_v25 = vmax.f32 %v2485_v7, %v7735_v42  ;;  %v10084_v6 = vld [vmem:[#allocation22_spill] sm:$0xff] }
 0x21c   : > { %1987 = vst.msk [vmem:[#allocation2 + $0x110] sm:$0xff] %vm10079_vm8, %v7744_v53  ;;  %vm10080_vm0 = vmmov %vm10078_vm3  ;;  %v2487_v4 = vmax.f32 %v2451_v12, %v7617_v19  ;;  %v7791_v29 = vmax.f32 %v2270_v26, %v7642_v54  ;;  %v7793_v62 = vmax.f32 %v2271_v45, %v2335_v59  ;;  %v10085_v56 = vld [vmem:[#allocation18_spill] sm:$0xff] }
 0x21d   : > { %1988 = vst.msk [vmem:[#allocation2 + $0x118] sm:$0xff] %vm10080_vm0, %v7747_v21  ;;  %vm10081_vm3 = vmmov %vm10080_vm0  ;;  %4851 = vmatmul.mubr.msk.bf16.gmra.mrb[60].mxu0 %vm10080_vm0, %v3221_v30  ;;  %v2016_v5 = vld [vmem:[#allocation2 + $0xf9] sm:$0xff]  ;;  %v2017_v49 = vld [vmem:[#allocation2 + $0x101] sm:$0xff]  ;;  %v2520_v30 = vmax.f32 %v2486_v28, %v7749_v27  ;;  %v7801_v7 = vmax.f32 %v2452_v36, %v7619_v37 }
 0x21e   : > { %4898 = vmatprep.mubr.msk.bf16.mxu1 %vm10081_vm3, %v3653_v1  ;;  %vm10082_vm14 = vmmov %vm10080_vm0  ;;  %v2113_v1 = vld [vmem:[#allocation2 + $0xff] sm:$0xff]  ;;  %v2112_v12 = vld [vmem:[#allocation2 + $0xf7] sm:$0xff]  ;;  %v2081_v59 = vmax.f32 %v7693_v63, %v2017_v49 }
 0x21f   : > { %4899 = vmatmul.mubr.msk.bf16.gmra.mrb[24].mxu1 %vm10082_vm14, %v3654_v61  ;;  %v10086_v61 = vpack.c.bf16 %v10084_v6, %v10085_v56  ;;  %vm10087_vm3 = vmmov %vm10080_vm0  ;;  %v2304_v43 = vld [vmem:[#allocation2 + $0xf6] sm:$0xff]  ;;  %vm10089_vm14 = vnez %v10088_v33  ;;  %v7809_v6 = vmax.f32 %v2519_v25, %v7419_v10  ;;  %v10093_v36 = vld [vmem:[#allocation100_spill] sm:$0xff]  ;;  %v7819_v49 = vmax.f32 %v2520_v30, %v7434_v46 }
 0x220   : > { %v2048_v54 = vsel %vm10089_vm14, %v2016_v5, -inf  ;;  %v10090_v26 = vld [vmem:[#allocation14_spill] sm:$0xff]  ;;  %2398 = vst.msk [vmem:[#allocation2 + $0xe8] sm:$0xff] %vm10087_vm3, %v7791_v29  ;;  %vm10092_vm8 = vmmov %vm10087_vm3  ;;  %vm10094_vm6 = vnez %v10093_v36  ;;  %v10096_v25 = vld [vmem:[#allocation52_spill] sm:$0xff] }
 0x221   : > { %4856 = vmatprep.mubr.msk.bf16.mxu0 %vm10087_vm3, %v10086_v61  ;;  %vm10091_vm0 = vnez %v10090_v26  ;;  %v2208_v55 = vld [vmem:[#allocation2 + $0xfa] sm:$0xff]  ;;  %2399 = vst.msk [vmem:[#allocation2 + $0xf0] sm:$0xff] %vm10092_vm8, %v7793_v62  ;;  %v2080_v28 = vmax.f32 %v7615_v16, %v2048_v54  ;;  %10095 = vst [vmem:[#allocation102_spill] sm:$0xff] %v7819_v49  ;;  %v2209_v46 = vld [vmem:[#allocation2 + $0x102] sm:$0xff] }
 0x222   : > { %v2145_v45 = vsel %vm10091_vm0, %v2113_v1, -inf  ;;  %v2240_v5 = vsel %vm10094_vm6, %v2208_v55, -inf  ;;  %v2305_v56 = vld [vmem:[#allocation2 + $0xfe] sm:$0xff]  ;;  %v2521_v1 = vmax.f32 %v2487_v4, %v7760_v15  ;;  %vm10097_vm0 = vnez %v10096_v25  ;;  %2585 = vst.msk [vmem:[#allocation2 + $0x80] sm:$0xff] %vm10092_vm8, %v7809_v6  ;;  %v2615_v54 = vld [vmem:[#allocation2 + $0x71] sm:$0xff] }
 0x223   : > { %v2709_v63 = vld [vmem:[#allocation2 + $0x5f] sm:$0xff]  ;;  %v2177_v10 = vmax.f32 %v2081_v59, %v2145_v45  ;;  %v2337_v61 = vsel %vm10097_vm0, %v2305_v56, -inf  ;;  %v2176_v55 = vmax.f32 %v2080_v28, %v2112_v12  ;;  %vm10100_vm6 = vnez %v9891_v52  ;;  %v2711_v59 = vld [vmem:[#allocation2 + $0x6f] sm:$0xff]  ;;  %vm10101_vm0 = vmmov %vm10092_vm8 }
 0x224   : > { %v2613_v41 = vld [vmem:[#allocation2 + $0x61] sm:$0xff]  ;;  %v10098_v26 = vld [vmem:[#allocation46_spill] sm:$0xff]  ;;  %2586 = vst.msk [vmem:[#allocation2 + $0x88] sm:$0xff] %vm10101_vm0, %v7819_v49  ;;  %v2679_v56 = vmax.f32 %v7733_v0, %v2615_v54  ;;  %v2903_v28 = vld [vmem:[#allocation2 + $0x6e] sm:$0xff]  ;;  %v7841_v52 = vmax.f32 %v2521_v1, %v7495_v38 }
 0x225   : > { %vm10099_vm3 = vnez %v10098_v26  ;;  %v2901_v50 = vld [vmem:[#allocation2 + $0x5e] sm:$0xff]  ;;  %v2677_v30 = vmax.f32 %v7707_v3, %v2613_v41  ;;  %v3655_v26 = vpack.c.bf16 %v7819_v49, %v7809_v6  ;;  %v2273_v45 = vmax.f32 %v2177_v10, %v2209_v46  ;;  %v2019_v41 = vld [vmem:[#allocation2 + $0x111] sm:$0xff] }
 0x226   : > { %v2741_v33 = vsel %vm10099_vm3, %v2709_v63, -inf  ;;  %v2933_v4 = vsel %vm10100_vm6, %v2901_v50, -inf  ;;  %vm10102_vm3 = vnez %v9897_v23  ;;  %v2018_v63 = vld [vmem:[#allocation2 + $0x109] sm:$0xff]  ;;  %v2272_v3 = vmax.f32 %v2176_v55, %v2240_v5  ;;  %v10103_v25 = vld [vmem:[#allocation58_spill] sm:$0xff]  ;;  %v10105_v49 = vld [vmem:[#allocation23_spill] sm:$0xff] }
 0x227   : > { %v2743_v12 = vsel %vm10102_vm3, %v2711_v59, -inf  ;;  %v2114_v50 = vld [vmem:[#allocation2 + $0x107] sm:$0xff]  ;;  %v2773_v16 = vmax.f32 %v2677_v30, %v2741_v33  ;;  %vm10104_vm6 = vnez %v10103_v25  ;;  %v2020_v2 = vld [vmem:[#allocation2 + $0x119] sm:$0xff]  ;;  %vm10106_vm0 = vnez %v10105_v49  ;;  %v2115_v0 = vld [vmem:[#allocation2 + $0x10f] sm:$0xff]  ;;  %4902 = vmatprep.mubr.msk.bf16.mxu1 %vm10092_vm8, %v3655_v26 }
 0x228   : > { %v2935_v36 = vsel %vm10104_vm6, %v2903_v28, -inf  ;;  %v2050_v10 = vsel %vm10106_vm0, %v2018_v63, -inf  ;;  %v7848_v23 = vmax.f32 %v2273_v45, %v2337_v61  ;;  %v2805_v46 = vld [vmem:[#allocation2 + $0x62] sm:$0xff]  ;;  %v2775_v54 = vmax.f32 %v2679_v56, %v2743_v12  ;;  %v10107_v59 = vld [vmem:[#allocation21_spill] sm:$0xff]  ;;  %v2212_v1 = vld [vmem:[#allocation2 + $0x11a] sm:$0xff] }
 0x229   : > { %vm10108_vm3 = vnez %v10107_v59  ;;  %v2082_v5 = vmax.f32 %v7674_v48, %v2050_v10  ;;  %v2210_v33 = vld [vmem:[#allocation2 + $0x10a] sm:$0xff]  ;;  %vm10109_vm6 = vmmov %vm10092_vm8  ;;  %v10110_v25 = vld [vmem:[#allocation19_spill] sm:$0xff]  ;;  %v7859_v61 = vmax.f32 %v2272_v3, %v2304_v43  ;;  %v2869_v45 = vmax.f32 %v2773_v16, %v2805_v46 }
 0x22a   : > { %v2052_v38 = vsel %vm10108_vm3, %v2020_v2, -inf  ;;  %2587 = vst.msk [vmem:[#allocation2 + $0x90] sm:$0xff] %vm10109_vm6, %v7841_v52  ;;  %v10111_v55 = vld [vmem:[#allocation15_spill] sm:$0xff]  ;;  %vm10113_vm0 = vmmov %vm10109_vm6  ;;  %v2807_v56 = vld [vmem:[#allocation2 + $0x72] sm:$0xff]  ;;  %v2083_v12 = vmax.f32 %v7744_v53, %v2019_v41 }
 0x22b   : > { %v10112_v30 = vpack.c.bf16 %v10110_v25, %v10111_v55  ;;  %v2306_v26 = vld [vmem:[#allocation2 + $0x106] sm:$0xff]  ;;  %v2084_v2 = vmax.f32 %v7747_v21, %v2052_v38  ;;  %v2307_v48 = vld [vmem:[#allocation2 + $0x10e] sm:$0xff]  ;;  %v10114_v28 = vld [vmem:[#allocation34_spill] sm:$0xff]  ;;  %v2871_v25 = vmax.f32 %v2775_v54, %v2807_v56  ;;  %v2178_v16 = vmax.f32 %v2082_v5, %v2114_v50 }
 0x22c   : > { %v10115_v63 = vld [vmem:[#allocation28_spill] sm:$0xff]  ;;  %vm10117_vm8 = vmmov %vm10113_vm0  ;;  %v2116_v55 = vld [vmem:[#allocation2 + $0x117] sm:$0xff]  ;;  %v7877_v21 = vmax.f32 %v2869_v45, %v2933_v4 }
 0x22d   : > { %4857 = vmatmul.mubr.msk.bf16.vlgmr.msra.gmra.mrb[32].mxu0 %vm10113_vm0, %v10112_v30  ;;  %v10116_v10 = vpack.c.bf16 %v10114_v28, %v10115_v63  ;;  %vm10118_vm6 = vmmov %vm10113_vm0  ;;  %v10119_v30 = vld [vmem:[#allocation25_spill] sm:$0xff]  ;;  %v10121_v3 = vld [vmem:[#allocation107_spill] sm:$0xff]  ;;  %v2180_v38 = vmax.f32 %v2084_v2, %v2116_v55 }
 0x22e   : > { %2401 = vst.msk [vmem:[#allocation2 + $0x100] sm:$0xff] %vm10118_vm6, %v7848_v23  ;;  %vm10120_vm0 = vnez %v10119_v30  ;;  %vm10122_vm3 = vnez %v10121_v3  ;;  %v7873_v41 = vld [vmem:[#allocation2 + $0xc0] sm:$0xff]  ;;  %vm10123_vm14 = vmmov %vm10118_vm6  ;;  %v2211_v28 = vld [vmem:[#allocation2 + $0x112] sm:$0xff] }
 0x22f   : > { %4860 = vmatprep.mubr.msk.bf16.mxu0 %vm10117_vm8, %v10116_v10  ;;  %v2147_v43 = vsel %vm10120_vm0, %v2115_v0, -inf  ;;  %v2242_v53 = vsel %vm10122_vm3, %v2210_v33, -inf  ;;  %2400 = vst.msk [vmem:[#allocation2 + $0xf8] sm:$0xff] %vm10123_vm14, %v7859_v61  ;;  %10124 = vst [vmem:[#allocation103_spill] sm:$0xff] %v7877_v21  ;;  %v10125_v63 = vld [vmem:[#allocation101_spill] sm:$0xff]  ;;  %v2713_v56 = vld [vmem:[#allocation2 + $0x7f] sm:$0xff]  ;;  %v7881_v0 = vmax.f32 %v2871_v25, %v2935_v36 }
 0x230   : > { %v2179_v46 = vmax.f32 %v2083_v12, %v2147_v43  ;;  %vm10126_vm8 = vnez %v10125_v63  ;;  %v2905_v10 = vld [vmem:[#allocation2 + $0x7e] sm:$0xff]  ;;  %v2274_v50 = vmax.f32 %v2178_v16, %v2242_v53  ;;  %v2308_v5 = vld [vmem:[#allocation2 + $0x116] sm:$0xff]  ;;  %v10128_v33 = vld [vmem:[#allocation108_spill] sm:$0xff]  ;;  %v2745_v4 = vsel %vm9938_vm11, %v2713_v56, -inf }
 0x231   : > { %v2244_v54 = vsel %vm10126_vm8, %v2212_v1, -inf  ;;  %10127 = vst [vmem:[#allocation105_spill] sm:$0xff] %v7881_v0  ;;  %vm10129_vm6 = vnez %v10128_v33  ;;  %v2617_v3 = vld [vmem:[#allocation2 + $0x81] sm:$0xff]  ;;  %v7889_v12 = vld [vmem:[#allocation2 + $0x59] sm:$0xff]  ;;  %v7896_v16 = vld [vmem:[#allocation2 + $0xd0] sm:$0xff]  ;;  %vm10138_vm11 = vcmask 15360  }
 0x232   : > { %v2339_v59 = vsel %vm10129_vm6, %v2307_v48, -inf  ;;  %v7887_v45 = vld [vmem:[#allocation2 + $0xc8] sm:$0xff]  ;;  %v7891_v2 = vld [vmem:[#allocation2 + $0x5a] sm:$0xff]  ;;  %v2275_v1 = vmax.f32 %v2179_v46, %v2211_v28  ;;  %v2276_v55 = vmax.f32 %v2180_v38, %v2244_v54  ;;  %v2681_v36 = vmax.f32 %v7809_v6, %v2617_v3  ;;  %vm10143_vm8 = vmmov %vm10138_vm11 }
 0x233   : > { %v10131_v25 = vld [vmem:[#allocation66_spill] sm:$0xff]  ;;  %v7898_v48 = vld [vmem:[#allocation2 + $0xe0] sm:$0xff]  ;;  %v7900_v53 = vld [vmem:[#allocation2 + $0x69] sm:$0xff]  ;;  %v7906_v63 = vmax.f32 %v2274_v50, %v2306_v26  ;;  %v10134_v46 = vmax.f32 %v7801_v7, %v7782_v34  ;;  %v2454_v3 = vmax.f32 %v7381_v17, %v7782_v34  ;;  %v10136_v38 = vmax.f32 %v7343_v60, %v7760_v15 }
 0x234   : > { %vm10132_vm14 = vnez %v10131_v25  ;;  %v7902_v30 = vld [vmem:[#allocation2 + $0x67] sm:$0xff]  ;;  %v7924_v26 = vld [vmem:[#allocation2 + $0x77] sm:$0xff]  ;;  %v7928_v7 = vmax.f32 %v2275_v1, %v2339_v59  ;;  %v2777_v50 = vmax.f32 %v2681_v36, %v2745_v4  ;;  %v7932_v17 = vld [vmem:[#allocation2 + $0x8f] sm:$0xff] }
 0x235   : > { %v2937_v43 = vsel %vm10132_vm14, %v2905_v10, -inf  ;;  %v7904_v56 = vld [vmem:[#allocation2 + $0x66] sm:$0xff]  ;;  %v7912_v6 = vmax.f32 %v10134_v46, %v7497_v39  ;;  %v2489_v28 = vmax.f32 %v10136_v38, %v7665_v18  ;;  %10139 = vst [vmem:[#allocation104_spill] sm:$0xff] %v7924_v26  ;;  %v7926_v10 = vld [vmem:[#allocation2 + $0x76] sm:$0xff]  ;;  %v7930_v39 = vmax.f32 %v2276_v55, %v2308_v5  ;;  %v7934_v25 = vld [vmem:[#allocation2 + $0x8e] sm:$0xff] }
 0x236   : > { %10133 = vst [vmem:[#allocation106_spill] sm:$0xff] %v7904_v56  ;;  %v7920_v54 = vld [vmem:[#allocation2 + $0x6a] sm:$0xff]  ;;  %2997 = vst.msk [vmem:[#allocation2 + $0x60] sm:$0xff] %vm10138_vm11, %v7877_v21  ;;  %v7936_v60 = vld [vmem:[#allocation2 + $0xd8] sm:$0xff]  ;;  %v2456_v55 = vmax.f32 %v7546_v47, %v7887_v45 }
 0x237   : > { %10135 = vst [vmem:[#allocation16_spill] sm:$0xff] %v7912_v6  ;;  %10137 = vst [vmem:[#allocation20_spill] sm:$0xff] %v7920_v54  ;;  %v10141_v46 = vld [vmem:[#allocation93_spill] sm:$0xff]  ;;  %v2809_v59 = vld [vmem:[#allocation2 + $0x82] sm:$0xff]  ;;  %v3656_v36 = vpack.c.bf16 %v7912_v6, %v7841_v52  ;;  %v2523_v26 = vmax.f32 %v2489_v28, %v7873_v41  ;;  %v2458_v28 = vmax.f32 %v7597_v9, %v7936_v60 }
 0x238   : > { %10140 = vst [vmem:[#allocation4_spill] sm:$0xff] %v7926_v10  ;;  %v2455_v38 = vmax.f32 %v10141_v46, %v7873_v41  ;;  %vm10142_vm14 = vmmov %vm10138_vm11  ;;  %v10144_v5 = vld [vmem:[#allocation72_spill] sm:$0xff]  ;;  %v10146_v1 = vld [vmem:[#allocation75_spill] sm:$0xff]  ;;  %v2490_v46 = vmax.f32 %v2454_v3, %v7677_v24  ;;  %v2873_v4 = vmax.f32 %v2777_v50, %v2809_v59  ;;  %v2492_v59 = vmax.f32 %v2456_v55, %v7749_v27 }
 0x239   : > { %2999 = vst.msk [vmem:[#allocation2 + $0x70] sm:$0xff] %vm10142_vm14, %v7881_v0  ;;  %vm10145_vm6 = vnez %v10144_v5  ;;  %vm10147_vm3 = vnez %v10146_v1  ;;  %v10148_v10 = vld [vmem:[#allocation30_spill] sm:$0xff]  ;;  %vm10151_vm14 = vmmov %vm10143_vm8  ;;  %v10153_v3 = vld [vmem:[#allocation53_spill] sm:$0xff] }
 0x23a   : > { %2402 = vst.msk [vmem:[#allocation2 + $0x108] sm:$0xff] %vm10138_vm11, %v7906_v63  ;;  %v10149_v0 = vld [vmem:[#allocation26_spill] sm:$0xff]  ;;  %vm10152_vm11 = vmmov %vm10143_vm8  ;;  %v10154_v21 = vld [vmem:[#allocation47_spill] sm:$0xff] }
 0x23b   : > { %2588 = vst.msk [vmem:[#allocation2 + $0x98] sm:$0xff] %vm10143_vm8, %v7912_v6  ;;  %v10150_v56 = vpack.c.bf16 %v10148_v10, %v10149_v0  ;;  %2403 = vst.msk [vmem:[#allocation2 + $0x110] sm:$0xff] %vm10143_vm8, %v7928_v7  ;;  %v2491_v6 = vmax.f32 %v2455_v38, %v7735_v42  ;;  %v10155_v54 = vpack.c.bf16 %v10153_v3, %v10154_v21  ;;  %v7971_v0 = vld [vmem:[#allocation2 + $0xe8] sm:$0xff]  ;;  %v10158_v10 = vld [vmem:[#allocation87_spill] sm:$0xff] }
 0x23c   : > { %2404 = vst.msk [vmem:[#allocation2 + $0x118] sm:$0xff] %vm10152_vm11, %v7930_v39  ;;  %vm10156_vm0 = vmmov %vm10143_vm8  ;;  %v2457_v50 = vmax.f32 %v10158_v10, %v7896_v16  ;;  %v7979_v47 = vld [vmem:[#allocation2 + $0xf0] sm:$0xff]  ;;  %v2459_v38 = vmax.f32 %v7593_v13, %v7898_v48  ;;  %v7983_v21 = vmax.f32 %v2873_v4, %v2937_v43  ;;  %v7992_v3 = vld [vmem:[#allocation2 + $0x7a] sm:$0xff]  ;;  %v2494_v13 = vmax.f32 %v2458_v28, %v7782_v34 }
 0x23d   : > { %4861 = vmatmul.mubr.msk.bf16.gmra.mrb[36].mxu0 %vm10151_vm14, %v10150_v56  ;;  %vm10157_vm14 = vmmov %vm10156_vm0  ;;  %v2524_v56 = vmax.f32 %v2490_v46, %v7887_v45  ;;  %v7990_v46 = vld [vmem:[#allocation2 + $0x79] sm:$0xff]  ;;  %v8005_v4 = vld [vmem:[#allocation2 + $0x86] sm:$0xff] }
 0x23e   : > { %4864 = vmatprep.mubr.msk.bf16.mxu0 %vm10156_vm0, %v10155_v54  ;;  %4903 = vmatmul.mubr.msk.bf16.gmra.mrb[28].mxu1 %vm10157_vm14, %v3656_v36  ;;  %10159 = vst [vmem:[#allocation109_spill] sm:$0xff] %v7983_v21  ;;  %v7986_v54 = vmax.f32 %v2523_v26, %v7617_v19  ;;  %v2525_v36 = vmax.f32 %v2491_v6, %v7896_v16  ;;  %v7999_v43 = vld [vmem:[#allocation2 + $0xf8] sm:$0xff]  ;;  %v8003_v26 = vld [vmem:[#allocation2 + $0x87] sm:$0xff]  ;;  %vm10161_vm8 = vmmov %vm10156_vm0 }
 0x23f   : > { %v7995_v9 = vmax.f32 %v2524_v56, %v7619_v37  ;;  %v2493_v10 = vmax.f32 %v2457_v50, %v7760_v15  ;;  %v2460_v19 = vmax.f32 %v7644_v51, %v7971_v0  ;;  %v2526_v6 = vmax.f32 %v2492_v59, %v7936_v60  ;;  %3001 = vst.msk [vmem:[#allocation2 + $0x80] sm:$0xff] %vm10161_vm8, %v7983_v21  ;;  %vm10162_vm11 = vmmov %vm10156_vm0  ;;  %v10190_v1 = vld [vmem:[#allocation84_spill] sm:$0xff] }
 0x240   : > { %2589 = vst.msk [vmem:[#allocation2 + $0xa0] sm:$0xff] %vm10156_vm0, %v7986_v54  ;;  %v8011_v37 = vmax.f32 %v2525_v36, %v7665_v18  ;;  %v2495_v55 = vmax.f32 %v2459_v38, %v7873_v41  ;;  %v2461_v56 = vmax.f32 %v7623_v44, %v7979_v47  ;;  %v2528_v28 = vmax.f32 %v2494_v13, %v7971_v0  ;;  %vm10164_vm14 = vmmov %vm10156_vm0  ;;  %v8031_v36 = vld [vmem:[#allocation2 + $0x100] sm:$0xff] }
 0x241   : > { %10160 = vst [vmem:[#allocation27_spill] sm:$0xff] %v7995_v9  ;;  %2590 = vst.msk [vmem:[#allocation2 + $0xa8] sm:$0xff] %vm10162_vm11, %v7995_v9  ;;  %v3657_v51 = vpack.c.bf16 %v7995_v9, %v7986_v54  ;;  %v2527_v50 = vmax.f32 %v2493_v10, %v7898_v48  ;;  %v2496_v18 = vmax.f32 %v2460_v19, %v7887_v45 }
 0x242   : > { %v2619_v59 = vld [vmem:[#allocation2 + $0x91] sm:$0xff]  ;;  %v8026_v38 = vmax.f32 %v2526_v6, %v7677_v24  ;;  %2591 = vst.msk [vmem:[#allocation2 + $0xb0] sm:$0xff] %vm10164_vm14, %v8011_v37  ;;  %v2529_v44 = vmax.f32 %v2495_v55, %v7979_v47  ;;  %v2462_v21 = vmax.f32 %v7791_v29, %v7999_v43  ;;  %v2497_v10 = vmax.f32 %v2461_v56, %v7896_v16  ;;  %v8045_v55 = vld [vmem:[#allocation2 + $0x108] sm:$0xff]  ;;  %vm10166_vm8 = vmmov %vm10156_vm0 }
 0x243   : > { %v2683_v13 = vmax.f32 %v7841_v52, %v2619_v59  ;;  %4906 = vmatprep.mubr.msk.bf16.mxu1 %vm10156_vm0, %v3657_v51  ;;  %v8039_v19 = vmax.f32 %v2527_v50, %v7735_v42  ;;  %v8042_v24 = vmax.f32 %v2528_v28, %v7749_v27  ;;  %v2530_v6 = vmax.f32 %v2496_v18, %v7999_v43  ;;  %v2433_v9 = vld [vmem:[#allocation2 + $0x110] sm:$0xff]  ;;  %v10168_v51 = vld [vmem:[#allocation43_spill] sm:$0xff]  ;;  %vm10170_vm11 = vmmov %vm10156_vm0 }
 0x244   : > { %10163 = vst [vmem:[#allocation29_spill] sm:$0xff] %v8026_v38  ;;  %2592 = vst.msk [vmem:[#allocation2 + $0xb8] sm:$0xff] %vm10166_vm8, %v8026_v38  ;;  %v3658_v29 = vpack.c.bf16 %v8026_v38, %v8011_v37  ;;  %v8052_v52 = vmax.f32 %v2529_v44, %v7760_v15  ;;  %v2498_v42 = vmax.f32 %v2462_v21, %v7936_v60  ;;  %v10167_v27 = vld [vmem:[#allocation49_spill] sm:$0xff]  ;;  %v2434_v28 = vld [vmem:[#allocation2 + $0x118] sm:$0xff]  ;;  %v10171_v18 = vsel %vm10145_vm6, %v7932_v17, -inf }
 0x245   : > { %10165 = vst [vmem:[#allocation91_spill] sm:$0xff] %v8042_v24  ;;  %v2531_v56 = vmax.f32 %v2497_v10, %v8031_v36  ;;  %v10169_v50 = vpack.c.bf16 %v10167_v27, %v10168_v51  ;;  %v2779_v59 = vmax.f32 %v2683_v13, %v10171_v18  ;;  %vm10172_vm14 = vmmov %vm10156_vm0  ;;  %v3659_v15 = vpack.c.bf16 %v8042_v24, %v8039_v19  ;;  %v10174_v44 = vld [vmem:[#allocation70_spill] sm:$0xff]  ;;  %v10175_v10 = vld [vmem:[#allocation63_spill] sm:$0xff] }
 0x246   : > { %2593 = vst.msk [vmem:[#allocation2 + $0xc0] sm:$0xff] %vm10172_vm14, %v8039_v19  ;;  %v8071_v21 = vmax.f32 %v2530_v6, %v7782_v34  ;;  %v10176_v27 = vpack.c.bf16 %v10174_v44, %v10175_v10  ;;  %vm10177_vm8 = vmmov %vm10156_vm0  ;;  %v2463_v17 = vmax.f32 %v7793_v62, %v8031_v36  ;;  %v2811_v5 = vld [vmem:[#allocation2 + $0x92] sm:$0xff]  ;;  %v2532_v13 = vmax.f32 %v2498_v42, %v8045_v55 }
 0x247   : > { %4865 = vmatmul.mubr.msk.bf16.gmra.mrb[40].mxu0 %vm10170_vm11, %v10169_v50  ;;  %2594 = vst.msk [vmem:[#allocation2 + $0xc8] sm:$0xff] %vm10156_vm0, %v8042_v24  ;;  %vm10178_vm6 = vmmov %vm10156_vm0  ;;  %v8084_v51 = vmax.f32 %v2531_v56, %v7873_v41  ;;  %v2464_v34 = vmax.f32 %v7859_v61, %v8045_v55  ;;  %v2465_v6 = vmax.f32 %v7848_v23, %v2433_v9  ;;  %v2717_v18 = vld [vmem:[#allocation2 + $0x9f] sm:$0xff] }
 0x248   : > { %10173 = vst [vmem:[#allocation10_spill] sm:$0xff] %v8071_v21  ;;  %4868 = vmatprep.mubr.msk.bf16.mxu0 %vm10177_vm8, %v10176_v27  ;;  %4907 = vmatmul.mubr.msk.bf16.gmra.mrb[0].mxu1 %vm10178_vm6, %v3658_v29  ;;  %vm10179_vm11 = vmmov %vm10156_vm0  ;;  %v2875_v50 = vmax.f32 %v2779_v59, %v2811_v5  ;;  %v2909_v44 = vld [vmem:[#allocation2 + $0x9e] sm:$0xff]  ;;  %v3660_v62 = vpack.c.bf16 %v8071_v21, %v8052_v52  ;;  %v8106_v27 = vld [vmem:[#allocation2 + $0x128] sm:$0xff] }
 0x249   : > { %2595 = vst.msk [vmem:[#allocation2 + $0xd0] sm:$0xff] %vm10179_vm11, %v8052_v52  ;;  %vm10180_vm14 = vmmov %vm10156_vm0  ;;  %v2499_v29 = vmax.f32 %v2463_v17, %v7898_v48  ;;  %v2466_v41 = vmax.f32 %v7906_v63, %v2434_v28  ;;  %v2621_v42 = vld [vmem:[#allocation2 + $0xa1] sm:$0xff]  ;;  %v2941_v59 = vsel %vm9964_vm13, %v2909_v44, -inf  ;;  %v8101_v10 = vmax.f32 %v2532_v13, %v7887_v45  ;;  %v8115_v44 = vld [vmem:[#allocation2 + $0xae] sm:$0xff] }
 0x24a   : > { %4910 = vmatprep.mubr.msk.bf16.mxu1 %vm10180_vm14, %v3659_v15  ;;  %2596 = vst.msk [vmem:[#allocation2 + $0xd8] sm:$0xff] %vm10156_vm0, %v8071_v21  ;;  %v10181_v56 = vld [vmem:[#allocation79_spill] sm:$0xff]  ;;  %vm10184_vm6 = vmmov %vm10156_vm0  ;;  %v2500_v15 = vmax.f32 %v2464_v34, %v7971_v0  ;;  %v10186_v63 = vsel %vm10147_vm3, %v7934_v25, -inf  ;;  %v2685_v5 = vmax.f32 %v7986_v54, %v2621_v42  ;;  %v2467_v13 = vmax.f32 %v7928_v7, %v7591_v11  ;;  %v10188_v34 = vld [vmem:[#allocation82_spill] sm:$0xff] }
 0x24b   : > { %vm10182_vm8 = vnez %v10181_v56  ;;  %2597 = vst.msk [vmem:[#allocation2 + $0xe0] sm:$0xff] %vm10184_vm6, %v8084_v51  ;;  %10185 = vst [vmem:[#allocation36_spill] sm:$0xff] %v8106_v27  ;;  %v8112_v17 = vmax.f32 %v2875_v50, %v10186_v63  ;;  %v2533_v45 = vmax.f32 %v2499_v29, %v2433_v9  ;;  %v8119_v56 = vld [vmem:[#allocation2 + $0x89] sm:$0xff]  ;;  %vm10189_vm13 = vnez %v10188_v34  ;;  %v8132_v29 = vld [vmem:[#allocation2 + $0x97] sm:$0xff] }
 0x24c   : > { %v2749_v61 = vsel %vm10182_vm8, %v2717_v18, -inf  ;;  %v2719_v18 = vld [vmem:[#allocation2 + $0xaf] sm:$0xff]  ;;  %vm10191_vm11 = vnez %v10190_v1  ;;  %vm10192_vm3 = vmmov %vm10156_vm0  ;;  %v3661_v54 = vpack.c.bf16 %v8101_v10, %v8084_v51  ;;  %v2534_v50 = vmax.f32 %v2500_v15, %v2434_v28  ;;  %v2813_v28 = vld [vmem:[#allocation2 + $0xa2] sm:$0xff] }
 0x24d   : > { %10187 = vst [vmem:[#allocation38_spill] sm:$0xff] %v8112_v17  ;;  %v2751_v23 = vsel %vm10189_vm13, %v2719_v18, -inf  ;;  %v2943_v25 = vsel %vm10191_vm11, %v8115_v44, -inf  ;;  %2598 = vst.msk [vmem:[#allocation2 + $0xe8] sm:$0xff] %vm10192_vm3, %v8101_v10  ;;  %v8130_v9 = vld [vmem:[#allocation2 + $0x8a] sm:$0xff]  ;;  %v8134_v7 = vld [vmem:[#allocation2 + $0x96] sm:$0xff]  ;;  %v2781_v42 = vmax.f32 %v2685_v5, %v2749_v61  ;;  %v8137_v18 = vmax.f32 %v2533_v45, %v7896_v16 }
 0x24e   : > { %10193 = vst [vmem:[#allocation9_spill] sm:$0xff] %v8134_v7  ;;  %v2623_v63 = vld [vmem:[#allocation2 + $0xb1] sm:$0xff]  ;;  %v2468_v44 = vmax.f32 %v7930_v39, %v8106_v27  ;;  %v2501_v34 = vmax.f32 %v2465_v6, %v7979_v47  ;;  %vm10194_vm14 = vmmov %vm10156_vm0  ;;  %v2625_v1 = vld [vmem:[#allocation2 + $0xc1] sm:$0xff]  ;;  %v8146_v24 = vmax.f32 %v2534_v50, %v7936_v60  ;;  %v2502_v61 = vmax.f32 %v2466_v41, %v7999_v43 }
 0x24f   : > { %3003 = vst.msk [vmem:[#allocation2 + $0x90] sm:$0xff] %vm10194_vm14, %v8112_v17  ;;  %v2687_v15 = vmax.f32 %v8011_v37, %v2623_v63  ;;  %v2721_v21 = vld [vmem:[#allocation2 + $0xbf] sm:$0xff]  ;;  %v10195_v16 = vld [vmem:[#allocation69_spill] sm:$0xff]  ;;  %v8154_v39 = vmax.f32 %v2467_v13, %v8031_v36  ;;  %v2877_v6 = vmax.f32 %v2781_v42, %v2813_v28  ;;  %v2689_v17 = vmax.f32 %v8039_v19, %v2625_v1  ;;  %vm10199_vm8 = vmmov %vm10156_vm0 }
 0x250   : > { %v10196_v5 = vld [vmem:[#allocation59_spill] sm:$0xff]  ;;  %v2753_v37 = vsel %vm6271_vm7, %v2721_v21, -inf  ;;  %v2723_v7 = vld [vmem:[#allocation2 + $0xcf] sm:$0xff]  ;;  %2599 = vst.msk [vmem:[#allocation2 + $0xf0] sm:$0xff] %vm10199_vm8, %v8137_v18  ;;  %v2535_v41 = vmax.f32 %v2501_v34, %v7591_v11  ;;  %vm10203_vm7 = vmmov %vm10156_vm0  ;;  %v2504_v19 = vmax.f32 %v2468_v44, %v8045_v55  ;;  %vm10223_vm8 = vnez %v9920_v58 }
 0x251   : > { %v10197_v45 = vpack.c.bf16 %v10195_v16, %v10196_v5  ;;  %v2913_v63 = vld [vmem:[#allocation2 + $0xbe] sm:$0xff]  ;;  %v2915_v60 = vld [vmem:[#allocation2 + $0xce] sm:$0xff]  ;;  %v2783_v50 = vmax.f32 %v2687_v15, %v2751_v23  ;;  %v2755_v42 = vsel %vm6444_vm15, %v2723_v7, -inf  ;;  %4911 = vmatmul.mubr.msk.bf16.gmra.mrb[4].mxu1 %vm10203_vm7, %v3660_v62  ;;  %vm10204_vm6 = vmmov %vm10156_vm0  ;;  %v8175_v11 = vmax.f32 %v2877_v6, %v2941_v59 }
 0x252   : > { %v2945_v5 = vsel %vm6285_vm10, %v2913_v63, -inf  ;;  %v2627_v36 = vld [vmem:[#allocation2 + $0xd1] sm:$0xff]  ;;  %v2947_v38 = vsel %vm6464_vm5, %v2915_v60, -inf  ;;  %2600 = vst.msk [vmem:[#allocation2 + $0xf8] sm:$0xff] %vm10204_vm6, %v8146_v24  ;;  %v8171_v21 = vld [vmem:[#allocation2 + $0x99] sm:$0xff]  ;;  %v2785_v34 = vmax.f32 %v2689_v17, %v2753_v37  ;;  %vm10205_vm10 = vmmov %vm10156_vm0  ;;  %v3662_v62 = vpack.c.bf16 %v8146_v24, %v8137_v18 }
 0x253   : > { %4869 = vmatmul.mubr.msk.bf16.gmra.mrb[44].mxu0 %vm10156_vm0, %v10197_v45  ;;  %v8173_v28 = vld [vmem:[#allocation2 + $0x9a] sm:$0xff]  ;;  %v2815_v23 = vld [vmem:[#allocation2 + $0xb2] sm:$0xff]  ;;  %v2691_v15 = vmax.f32 %v8052_v52, %v2627_v36  ;;  %4914 = vmatprep.mubr.msk.bf16.mxu1 %vm10205_vm10, %v3661_v54  ;;  %v2817_v63 = vld [vmem:[#allocation2 + $0xc2] sm:$0xff]  ;;  %v2536_v17 = vmax.f32 %v2502_v61, %v8106_v27 }
 0x254   : > { %v2725_v1 = vld [vmem:[#allocation2 + $0xdf] sm:$0xff]  ;;  %v2879_v45 = vmax.f32 %v2783_v50, %v2815_v23  ;;  %v8189_v52 = vld [vmem:[#allocation2 + $0xa7] sm:$0xff]  ;;  %v2881_v37 = vmax.f32 %v2785_v34, %v2817_v63  ;;  %v2819_v36 = vld [vmem:[#allocation2 + $0xd2] sm:$0xff]  ;;  %v8194_v50 = vmax.f32 %v2535_v41, %v7898_v48  ;;  %v2537_v48 = vmax.f32 %v8154_v39, %v7670_v8 }
 0x255   : > { %v8178_v7 = vld [vmem:[#allocation2 + $0xde] sm:$0xff]  ;;  %v2757_v16 = vsel %vm10031_vm2, %v2725_v1, -inf  ;;  %v8191_v6 = vld [vmem:[#allocation2 + $0xa6] sm:$0xff]  ;;  %v2787_v54 = vmax.f32 %v2691_v15, %v2755_v42  ;;  %vm10207_vm15 = vmmov %vm10156_vm0  ;;  %v8207_v42 = vmax.f32 %v2536_v17, %v7971_v0 }
 0x256   : > { %v2629_v13 = vld [vmem:[#allocation2 + $0xe1] sm:$0xff]  ;;  %v8197_v23 = vld [vmem:[#allocation2 + $0xa9] sm:$0xff]  ;;  %3005 = vst.msk [vmem:[#allocation2 + $0xa0] sm:$0xff] %vm10207_vm15, %v8175_v11  ;;  %v8203_v61 = vmax.f32 %v2879_v45, %v2943_v25  ;;  %v8211_v41 = vld [vmem:[#allocation2 + $0xb9] sm:$0xff]  ;;  %v8217_v34 = vmax.f32 %v2881_v37, %v2945_v5  ;;  %v10231_v58 = vsel %vm10035_vm1, %v8178_v7, -inf }
 0x257   : > { %v8199_v1 = vld [vmem:[#allocation2 + $0xaa] sm:$0xff]  ;;  %v2693_v60 = vmax.f32 %v8084_v51, %v2629_v13  ;;  %v8213_v55 = vld [vmem:[#allocation2 + $0xb7] sm:$0xff]  ;;  %v2883_v15 = vmax.f32 %v2787_v54, %v2819_v36  ;;  %vm10210_vm5 = vmmov %vm10156_vm0  ;;  %v2538_v51 = vmax.f32 %v2504_v19, %v7680_v20  ;;  %v3663_v20 = vpack.c.bf16 %v8207_v42, %v8194_v50 }
 0x258   : > { %10208 = vst [vmem:[#allocation99_spill] sm:$0xff] %v8203_v61  ;;  %v8215_v44 = vld [vmem:[#allocation2 + $0xba] sm:$0xff]  ;;  %10209 = vst [vmem:[#allocation39_spill] sm:$0xff] %v8217_v34  ;;  %v8227_v8 = vld [vmem:[#allocation2 + $0xc7] sm:$0xff]  ;;  %v8236_v54 = vmax.f32 %v2537_v48, %v7979_v47 }
 0x259   : > { %2601 = vst.msk [vmem:[#allocation2 + $0x100] sm:$0xff] %vm10210_vm5, %v8194_v50  ;;  %v10211_v0 = vld [vmem:[#allocation35_spill] sm:$0xff]  ;;  %v8225_v45 = vld [vmem:[#allocation2 + $0xb6] sm:$0xff]  ;;  %v2789_v63 = vmax.f32 %v2693_v60, %v2757_v16  ;;  %v2630_v17 = vld [vmem:[#allocation2 + $0xe9] sm:$0xff]  ;;  %v8243_v16 = vmax.f32 %v2883_v15, %v2947_v38  ;;  %4915 = vmatmul.mubr.msk.bf16.gmra.mrb[8].mxu1 %vm10156_vm0, %v3662_v62  ;;  %v8257_v22 = vmax.f32 %v2538_v51, %v7999_v43 }
 0x25a   : > { %vm10212_vm2 = vnez %v10211_v0  ;;  %v8229_v39 = vld [vmem:[#allocation2 + $0xc6] sm:$0xff]  ;;  %v2727_v5 = vld [vmem:[#allocation2 + $0xef] sm:$0xff]  ;;  %vm10214_vm13 = vmmov %vm10156_vm0  ;;  %v2662_v60 = vsel %vm10065_vm9, %v2630_v17, -inf }
 0x25b   : > { %v2642_v25 = vsel %vm10212_vm2, %v7690_v57, -inf  ;;  %10213 = vst [vmem:[#allocation97_spill] sm:$0xff] %v8229_v39  ;;  %v2822_v37 = vld [vmem:[#allocation2 + $0xea] sm:$0xff]  ;;  %2602 = vst.msk [vmem:[#allocation2 + $0x108] sm:$0xff] %vm10214_vm13, %v8207_v42  ;;  %v2821_v13 = vld [vmem:[#allocation2 + $0xe2] sm:$0xff]  ;;  %v2759_v0 = vsel %vm10067_vm12, %v2727_v5, -inf  ;;  %v2694_v38 = vmax.f32 %v8101_v10, %v2662_v60  ;;  %vm10221_vm12 = vnez %v10073_v32 }
 0x25c   : > { %v10215_v57 = vld [vmem:[#allocation44_spill] sm:$0xff]  ;;  %vm10217_vm3 = vmmov %vm10156_vm0  ;;  %10218 = vst [vmem:[#allocation110_spill] sm:$0xff] %v8243_v16  ;;  %v2631_v19 = vld [vmem:[#allocation2 + $0xf1] sm:$0xff]  ;;  %v2854_v47 = vsel %vm10069_vm4, %v2822_v37, -inf  ;;  %v10224_v10 = vsel %vm10223_vm8, %v7621_v31, -inf }
 0x25d   : > { %vm10216_vm11 = vnez %v10215_v57  ;;  %3007 = vst.msk [vmem:[#allocation2 + $0xb0] sm:$0xff] %vm10217_vm3, %v8203_v61  ;;  %v2798_v48 = vld [vmem:[#allocation2 + $0x2a] sm:$0xff]  ;;  %vm10219_vm14 = vmmov %vm10156_vm0  ;;  %v2885_v57 = vmax.f32 %v2789_v63, %v2821_v13  ;;  %v2695_v15 = vmax.f32 %v8137_v18, %v2631_v19  ;;  %v10225_v18 = vld [vmem:[#allocation98_spill] sm:$0xff] }
 0x25e   : > { %v2644_v36 = vsel %vm10216_vm11, %v7889_v12, -inf  ;;  %3009 = vst.msk [vmem:[#allocation2 + $0xc0] sm:$0xff] %vm10219_vm14, %v8217_v34  ;;  %v2726_v12 = vld [vmem:[#allocation2 + $0xe7] sm:$0xff]  ;;  %vm10220_vm9 = vmmov %vm10156_vm0  ;;  %v8271_v63 = vmax.f32 %v10225_v18, %v10224_v10  ;;  %v8281_v37 = vld [vmem:[#allocation2 + $0xd7] sm:$0xff] }
 0x25f   : > { %v2919_v59 = vld [vmem:[#allocation2 + $0xee] sm:$0xff]  ;;  %2603 = vst.msk [vmem:[#allocation2 + $0x110] sm:$0xff] %vm10220_vm9, %v8236_v54  ;;  %vm10222_vm4 = vmmov %vm10156_vm0  ;;  %v8283_v32 = vld [vmem:[#allocation2 + $0xd6] sm:$0xff]  ;;  %v8289_v31 = vmax.f32 %v2885_v57, %v10231_v58  ;;  %v2791_v13 = vmax.f32 %v2695_v15, %v2759_v0 }
 0x260   : > { %v8261_v35 = vld [vmem:[#allocation2 + $0xc9] sm:$0xff]  ;;  %v2951_v14 = vsel %vm10221_vm12, %v2919_v59, -inf  ;;  %4918 = vmatprep.mubr.msk.bf16.mxu1 %vm10222_vm4, %v3663_v20  ;;  %10229 = vst [vmem:[#allocation12_spill] sm:$0xff] %v8281_v37  ;;  %10230 = vst [vmem:[#allocation95_spill] sm:$0xff] %v8283_v32  ;;  %v2790_v20 = vmax.f32 %v2694_v38, %v2726_v12  ;;  %v2823_v60 = vld [vmem:[#allocation2 + $0xf2] sm:$0xff]  ;;  %vm10265_vm12 = vnez %v10105_v49 }
 0x261   : > { %v10226_v62 = vld [vmem:[#allocation92_spill] sm:$0xff]  ;;  %10232 = vst [vmem:[#allocation96_spill] sm:$0xff] %v8289_v31  ;;  %vm10233_vm7 = vmmov %vm10156_vm0  ;;  %v10235_v7 = vld [vmem:[#allocation67_spill] sm:$0xff] }
 0x262   : > { %v8274_v43 = vmax.f32 %v10226_v62, %v2642_v25  ;;  %v10227_v51 = vld [vmem:[#allocation88_spill] sm:$0xff]  ;;  %2604 = vst.msk [vmem:[#allocation2 + $0x118] sm:$0xff] %vm10233_vm7, %v8257_v22  ;;  %v3664_v25 = vpack.c.bf16 %v8257_v22, %v8236_v54  ;;  %vm10234_vm6 = vmmov %vm10156_vm0  ;;  %v8306_v10 = vld [vmem:[#allocation2 + $0xd9] sm:$0xff]  ;;  %v2886_v62 = vmax.f32 %v2790_v20, %v2854_v47 }
 0x263   : > { %v8277_v17 = vmax.f32 %v10227_v51, %v2644_v36  ;;  %v8279_v5 = vld [vmem:[#allocation2 + $0xca] sm:$0xff]  ;;  %v2704_v36 = vld [vmem:[#allocation2 + $0x37] sm:$0xff]  ;;  %v8295_v19 = vld [vmem:[#allocation2 + $0x22] sm:$0xff]  ;;  %10239 = vst [vmem:[#allocation22_spill] sm:$0xff] %v8306_v10  ;;  %v2887_v51 = vmax.f32 %v2791_v13, %v2823_v60 }
 0x264   : > { %10228 = vst [vmem:[#allocation11_spill] sm:$0xff] %v8279_v5  ;;  %v2918_v59 = vld [vmem:[#allocation2 + $0xe6] sm:$0xff]  ;;  %3011 = vst.msk [vmem:[#allocation2 + $0xd0] sm:$0xff] %vm10234_vm6, %v8243_v16  ;;  %v2768_v40 = vmax.f32 %v8271_v63, %v2704_v36  ;;  %v2770_v57 = vmax.f32 %v8274_v43, %v10235_v7  ;;  %v8308_v18 = vld [vmem:[#allocation2 + $0xda] sm:$0xff]  ;;  %vm10271_vm6 = vnez %v10128_v33 }
 0x265   : > { %v10236_v12 = vld [vmem:[#allocation48_spill] sm:$0xff]  ;;  %10240 = vst [vmem:[#allocation18_spill] sm:$0xff] %v8308_v18  ;;  %v2632_v58 = vld [vmem:[#allocation2 + $0xf9] sm:$0xff]  ;;  %v10242_v63 = vld [vmem:[#allocation33_spill] sm:$0xff]  ;;  %v8328_v18 = vmax.f32 %v2887_v51, %v2951_v14 }
 0x266   : > { %v10237_v38 = vld [vmem:[#allocation24_spill] sm:$0xff]  ;;  %v2729_v27 = vld [vmem:[#allocation2 + $0xff] sm:$0xff]  ;;  %vm10243_vm10 = vnez %v10242_v63  ;;  %v10245_v7 = vld [vmem:[#allocation37_spill] sm:$0xff] }
 0x267   : > { %vm10238_vm1 = vnez %v10237_v38  ;;  %v2824_v32 = vld [vmem:[#allocation2 + $0xfa] sm:$0xff]  ;;  %vm10246_vm15 = vnez %v10245_v7  ;;  %vm10247_vm5 = vmmov %vm10156_vm0  ;;  %v10248_v38 = vld [vmem:[#allocation13_spill] sm:$0xff]  ;;  %10255 = vst [vmem:[#allocation46_spill] sm:$0xff] %v8328_v18 }
 0x268   : > { %v2830_v15 = vsel %vm10238_vm1, %v2798_v48, -inf  ;;  %v10241_v34 = vld [vmem:[#allocation50_spill] sm:$0xff]  ;;  %v10244_v43 = vld [vmem:[#allocation55_spill] sm:$0xff]  ;;  %3013 = vst.msk [vmem:[#allocation2 + $0xe0] sm:$0xff] %vm10247_vm5, %v8289_v31  ;;  %vm10249_vm2 = vnez %v10248_v38  ;;  %v10252_v13 = vld [vmem:[#allocation100_spill] sm:$0xff] }
 0x269   : > { %v2832_v36 = vsel %vm10243_vm10, %v10241_v34, -inf  ;;  %v2834_v0 = vsel %vm10246_vm15, %v10244_v43, -inf  ;;  %v2633_v48 = vld [vmem:[#allocation2 + $0x101] sm:$0xff]  ;;  %v2664_v39 = vsel %vm10249_vm2, %v2632_v58, -inf  ;;  %v10250_v47 = vld [vmem:[#allocation14_spill] sm:$0xff]  ;;  %vm10253_vm11 = vnez %v10252_v13  ;;  %v2634_v13 = vld [vmem:[#allocation2 + $0x109] sm:$0xff] }
 0x26a   : > { %vm10251_vm13 = vnez %v10250_v47  ;;  %v2856_v60 = vsel %vm10253_vm11, %v2824_v32, -inf  ;;  %v2799_v16 = vld [vmem:[#allocation2 + $0x32] sm:$0xff]  ;;  %v8326_v43 = vmax.f32 %v2886_v62, %v2918_v59  ;;  %v2696_v31 = vmax.f32 %v8146_v24, %v2664_v39  ;;  %v2921_v38 = vld [vmem:[#allocation2 + $0xfe] sm:$0xff]  ;;  %v10256_v47 = vld [vmem:[#allocation52_spill] sm:$0xff] }
 0x26b   : > { %v2761_v20 = vsel %vm10251_vm13, %v2729_v27, -inf  ;;  %v10254_v34 = vld [vmem:[#allocation86_spill] sm:$0xff]  ;;  %v2697_v58 = vmax.f32 %v8194_v50, %v2633_v48  ;;  %vm10257_vm3 = vnez %v10256_v47  ;;  %v2731_v32 = vld [vmem:[#allocation2 + $0x10f] sm:$0xff]  ;;  %v10263_v51 = vld [vmem:[#allocation31_spill] sm:$0xff]  ;;  %v2666_v39 = vsel %vm10265_vm12, %v2634_v13, -inf }
 0x26c   : > { %v2861_v63 = vmax.f32 %v10254_v34, %v8295_v19  ;;  %v2728_v61 = vld [vmem:[#allocation2 + $0xf7] sm:$0xff]  ;;  %v2953_v27 = vsel %vm10257_vm3, %v2921_v38, -inf  ;;  %v2826_v37 = vld [vmem:[#allocation2 + $0x10a] sm:$0xff]  ;;  %v2863_v10 = vmax.f32 %v10263_v51, %v2799_v16  ;;  %3014 = vst.msk [vmem:[#allocation2 + $0xe8] sm:$0xff] %vm10156_vm0, %v8326_v43  ;;  %vm10264_vm9 = vmmov %vm10156_vm0  ;;  %v2864_v49 = vmax.f32 %v2768_v40, %v2832_v36 }
 0x26d   : > { %v2920_v7 = vld [vmem:[#allocation2 + $0xf6] sm:$0xff]  ;;  %v2792_v24 = vmax.f32 %v2696_v31, %v2728_v61  ;;  %v2793_v50 = vmax.f32 %v2697_v58, %v2761_v20  ;;  %vm10268_vm8 = vmmov %vm10156_vm0  ;;  %v2825_v38 = vld [vmem:[#allocation2 + $0x102] sm:$0xff] }
 0x26e   : > { %v10258_v5 = vld [vmem:[#allocation45_spill] sm:$0xff]  ;;  %v10260_v34 = vld [vmem:[#allocation94_spill] sm:$0xff]  ;;  %3015 = vst.msk [vmem:[#allocation2 + $0xf0] sm:$0xff] %vm10264_vm9, %v8328_v18  ;;  %4919 = vmatmul.mubr.msk.bf16.gmra.mrb[12].mxu1 %vm10268_vm8, %v3664_v25  ;;  %v2730_v31 = vld [vmem:[#allocation2 + $0x107] sm:$0xff] }
 0x26f   : > { %vm10259_vm14 = vnez %v10258_v5  ;;  %v10261_v59 = vld [vmem:[#allocation85_spill] sm:$0xff]  ;;  %v2636_v47 = vld [vmem:[#allocation2 + $0x119] sm:$0xff]  ;;  %v2888_v20 = vmax.f32 %v2792_v24, %v2856_v60  ;;  %v2889_v58 = vmax.f32 %v2793_v50, %v2825_v38  ;;  %v10276_v24 = vmax.f32 %v8277_v17, %v10236_v12  ;;  %vm10281_vm2 = vmmov %vm10156_vm0 }
 0x270   : > { %v2836_v19 = vsel %vm10259_vm14, %v7891_v2, -inf  ;;  %v10262_v62 = vmax.f32 %v10260_v34, %v10261_v59  ;;  %v10266_v48 = vld [vmem:[#allocation25_spill] sm:$0xff]  ;;  %v2698_v34 = vmax.f32 %v8207_v42, %v2666_v39  ;;  %v10269_v59 = vld [vmem:[#allocation107_spill] sm:$0xff]  ;;  %vm10282_vm13 = vmmov %vm10156_vm0 }
 0x271   : > { %vm10267_vm4 = vnez %v10266_v48  ;;  %v2923_v5 = vld [vmem:[#allocation2 + $0x10e] sm:$0xff]  ;;  %vm10270_vm7 = vnez %v10269_v59  ;;  %v2828_v51 = vld [vmem:[#allocation2 + $0x11a] sm:$0xff]  ;;  %v2866_v59 = vmax.f32 %v2770_v57, %v2834_v0  ;;  %v8361_v33 = vmax.f32 %v2888_v20, %v2920_v7  ;;  %vm10285_vm11 = vmmov %vm10156_vm0 }
 0x272   : > { %v2862_v14 = vmax.f32 %v10262_v62, %v2830_v15  ;;  %v2763_v2 = vsel %vm10267_vm4, %v2731_v32, -inf  ;;  %v2893_v15 = vld [vmem:[#allocation2 + $0x1e] sm:$0xff]  ;;  %v2635_v16 = vld [vmem:[#allocation2 + $0x111] sm:$0xff]  ;;  %v2858_v62 = vsel %vm10270_vm7, %v2826_v37, -inf  ;;  %v2955_v61 = vsel %vm10271_vm6, %v2923_v5, -inf  ;;  %vm10286_vm3 = vmmov %vm10156_vm0 }
 0x273   : > { %v10272_v13 = vld [vmem:[#allocation21_spill] sm:$0xff]  ;;  %v2699_v25 = vmax.f32 %v8236_v54, %v2635_v16  ;;  %v2794_v42 = vmax.f32 %v2698_v34, %v2730_v31  ;;  %v8363_v40 = vmax.f32 %v2889_v58, %v2953_v27  ;;  %v2868_v50 = vmax.f32 %v10276_v24, %v2836_v19  ;;  %v2922_v54 = vld [vmem:[#allocation2 + $0x106] sm:$0xff]  ;;  %3016 = vst.msk [vmem:[#allocation2 + $0xf8] sm:$0xff] %vm10281_vm2, %v8361_v33  ;;  %vm10287_vm14 = vmmov %vm10156_vm0 }
 0x274   : > { %vm10273_vm1 = vnez %v10272_v13  ;;  %v2895_v48 = vld [vmem:[#allocation2 + $0x2e] sm:$0xff]  ;;  %v2732_v36 = vld [vmem:[#allocation2 + $0x117] sm:$0xff]  ;;  %v8387_v20 = vld [vmem:[#allocation2 + $0x40] sm:$0xff] }
 0x275   : > { %v2668_v32 = vsel %vm10273_vm1, %v2636_v47, -inf  ;;  %v10274_v39 = vld [vmem:[#allocation101_spill] sm:$0xff]  ;;  %v2795_v60 = vmax.f32 %v2699_v25, %v2763_v2  ;;  %v2890_v16 = vmax.f32 %v2794_v42, %v2858_v62  ;;  %3017 = vst.msk [vmem:[#allocation2 + $0x100] sm:$0xff] %vm10282_vm13, %v8363_v40  ;;  %v8389_v58 = vld [vmem:[#allocation2 + $0x60] sm:$0xff]  ;;  %vm10290_vm9 = vmmov %vm10281_vm2 }
 0x276   : > { %v2700_v18 = vmax.f32 %v8257_v22, %v2668_v32  ;;  %vm10275_vm10 = vnez %v10274_v39  ;;  %v2827_v38 = vld [vmem:[#allocation2 + $0x112] sm:$0xff]  ;;  %v2894_v22 = vld [vmem:[#allocation2 + $0x26] sm:$0xff]  ;;  %vm10291_vm12 = vmmov %vm10281_vm2 }
 0x277   : > { %v2860_v37 = vsel %vm10275_vm10, %v2828_v51, -inf  ;;  %v10277_v47 = vld [vmem:[#allocation17_spill] sm:$0xff]  ;;  %v2891_v0 = vmax.f32 %v2795_v60, %v2827_v38  ;;  %v8380_v19 = vmax.f32 %v2890_v16, %v2922_v54  ;;  %vm10292_vm4 = vmmov %vm10281_vm2  ;;  %v10293_v51 = vld [vmem:[#allocation62_spill] sm:$0xff] }
 0x278   : > { %v2796_v5 = vmax.f32 %v2700_v18, %v2732_v36  ;;  %vm10278_vm15 = vnez %v10277_v47  ;;  %v10279_v31 = vld [vmem:[#allocation41_spill] sm:$0xff]  ;;  %v8378_v18 = vmax.f32 %v2862_v14, %v2894_v22  ;;  %vm10294_vm8 = vmmov %vm10281_vm2  ;;  %v10296_v39 = vld [vmem:[#allocation60_spill] sm:$0xff] }
 0x279   : > { %v2925_v34 = vsel %vm10278_vm15, %v2893_v15, -inf  ;;  %vm10280_vm5 = vnez %v10279_v31  ;;  %v2896_v17 = vld [vmem:[#allocation2 + $0x36] sm:$0xff]  ;;  %v8391_v32 = vmax.f32 %v2891_v0, %v2955_v61  ;;  %3018 = vst.msk [vmem:[#allocation2 + $0x108] sm:$0xff] %vm10290_vm9, %v8380_v19  ;;  %vm10295_vm7 = vmmov %vm10281_vm2  ;;  %vm10297_vm6 = vnez %v10296_v39  ;;  %v10299_v60 = vld [vmem:[#allocation71_spill] sm:$0xff] }
 0x27a   : > { %v2927_v57 = vsel %vm10280_vm5, %v2895_v48, -inf  ;;  %v8376_v12 = vmax.f32 %v2861_v63, %v2925_v34  ;;  %v2892_v27 = vmax.f32 %v2796_v5, %v2860_v37  ;;  %v8382_v2 = vmax.f32 %v2864_v49, %v2896_v17  ;;  %v10283_v15 = vld [vmem:[#allocation90_spill] sm:$0xff]  ;;  %v10284_v63 = vld [vmem:[#allocation68_spill] sm:$0xff]  ;;  %2990 = vst.msk [vmem:[#allocation2 + $0x28] sm:$0xff] %vm10286_vm3, %v8378_v18  ;;  %v8412_v61 = vld [vmem:[#allocation2 + $0x50] sm:$0xff] }
 0x27b   : > { %v2959_v7 = vmax.f32 %v2863_v10, %v2927_v57  ;;  %v8385_v62 = vmax.f32 %v2866_v59, %v10283_v15  ;;  %v2924_v13 = vld [vmem:[#allocation2 + $0x116] sm:$0xff]  ;;  %v8394_v25 = vmax.f32 %v2868_v50, %v10284_v63  ;;  %v2648_v37 = vsel %vm10297_vm6, %v7990_v46, -inf  ;;  %v10298_v59 = vld [vmem:[#allocation3_spill] sm:$0xff]  ;;  %vm10301_vm10 = vmmov %vm10281_vm2 }
 0x27c   : > { %2989 = vst.msk [vmem:[#allocation2 + $0x20] sm:$0xff] %vm10285_vm11, %v8376_v12  ;;  %v10288_v10 = vld [vmem:[#allocation54_spill] sm:$0xff]  ;;  %v8404_v49 = vmax.f32 %v2892_v27, %v2924_v13  ;;  %v8415_v42 = vld [vmem:[#allocation2 + $0x70] sm:$0xff]  ;;  %v3059_v36 = vmax.f32 %v10298_v59, %v8389_v58  ;;  %vm10300_vm1 = vnez %v10299_v60  ;;  %v10302_v54 = vld [vmem:[#allocation20_spill] sm:$0xff] }
 0x27d   : > { %2991 = vst.msk [vmem:[#allocation2 + $0x30] sm:$0xff] %vm10287_vm14, %v2959_v7  ;;  %vm10289_vm0 = vnez %v10288_v10  ;;  %v2650_v24 = vsel %vm10300_vm1, %v8119_v56, -inf  ;;  %v10303_v5 = vld [vmem:[#allocation57_spill] sm:$0xff]  ;;  %v10305_v16 = vld [vmem:[#allocation76_spill] sm:$0xff]  ;;  %v10306_v47 = vld [vmem:[#allocation102_spill] sm:$0xff] }
 0x27e   : > { %v2646_v14 = vsel %vm10289_vm0, %v7900_v53, -inf  ;;  %2992 = vst.msk [vmem:[#allocation2 + $0x38] sm:$0xff] %vm10291_vm12, %v8382_v2  ;;  %v3055_v53 = vmax.f32 %v2959_v7, %v8387_v20  ;;  %vm10304_vm15 = vnez %v10303_v5  ;;  %v2680_v22 = vmax.f32 %v10305_v16, %v2648_v37  ;;  %v10307_v34 = vld [vmem:[#allocation89_spill] sm:$0xff]  ;;  %v10308_v57 = vld [vmem:[#allocation64_spill] sm:$0xff]  ;;  %v10310_v0 = vld [vmem:[#allocation103_spill] sm:$0xff] }
 0x27f   : > { %2994 = vst.msk [vmem:[#allocation2 + $0x48] sm:$0xff] %vm10292_vm4, %v8385_v62  ;;  %v2678_v48 = vmax.f32 %v10293_v51, %v2646_v14  ;;  %v2838_v38 = vsel %vm10304_vm15, %v10302_v54, -inf  ;;  %v2682_v46 = vmax.f32 %v10306_v47, %v2650_v24  ;;  %v3057_v31 = vmax.f32 %v10307_v34, %v8412_v61  ;;  %v10313_v15 = vld [vmem:[#allocation104_spill] sm:$0xff]  ;;  %v8450_v10 = vld [vmem:[#allocation2 + $0x80] sm:$0xff]  ;;  %v3086_v47 = vld [vmem:[#allocation2 + $0x18] sm:$0xff] }
 0x280   : > { %3019 = vst.msk [vmem:[#allocation2 + $0x110] sm:$0xff] %vm10294_vm8, %v8391_v32  ;;  %vm10309_vm5 = vnez %v10308_v57  ;;  %v3061_v17 = vmax.f32 %v10310_v0, %v8415_v42  ;;  %v2776_v13 = vmax.f32 %v2680_v22, %v10313_v15  ;;  %v10314_v14 = vld [vmem:[#allocation16_spill] sm:$0xff]  ;;  %v10320_v34 = vld [vmem:[#allocation105_spill] sm:$0xff]  ;;  %vm10322_vm14 = vmmov %vm10286_vm3 }
 0x281   : > { %2996 = vst.msk [vmem:[#allocation2 + $0x58] sm:$0xff] %vm10295_vm7, %v8394_v25  ;;  %v2774_v50 = vmax.f32 %v2678_v48, %v7902_v30  ;;  %v2840_v56 = vsel %vm10309_vm5, %v7992_v3, -inf  ;;  %v10311_v30 = vld [vmem:[#allocation77_spill] sm:$0xff]  ;;  %v2778_v63 = vmax.f32 %v2682_v46, %v8003_v26  ;;  %v8454_v48 = vmax.f32 %v3059_v36, %v8387_v20  ;;  %v10315_v3 = vld [vmem:[#allocation74_spill] sm:$0xff]  ;;  %vm10323_vm0 = vmmov %vm10286_vm3 }
 0x282   : > { %3020 = vst.msk [vmem:[#allocation2 + $0x118] sm:$0xff] %vm10301_vm10, %v8404_v49  ;;  %vm10312_vm2 = vnez %v10311_v30  ;;  %vm10316_vm13 = vnez %v10315_v3  ;;  %v8460_v37 = vmax.f32 %v3061_v17, %v8412_v61  ;;  %v3085_v26 = vld [vmem:[#allocation2 + $0x10] sm:$0xff]  ;;  %v2872_v36 = vmax.f32 %v2776_v13, %v2840_v56  ;;  %v10321_v17 = vld [vmem:[#allocation4_spill] sm:$0xff]  ;;  %vm10328_vm12 = vmmov %vm10323_vm0 }
 0x283   : > { %v2652_v7 = vsel %vm10312_vm2, %v8171_v21, -inf  ;;  %v2870_v27 = vmax.f32 %v2774_v50, %v2838_v38  ;;  %v2842_v39 = vsel %vm10316_vm13, %v8130_v9, -inf  ;;  %v10317_v21 = vld [vmem:[#allocation78_spill] sm:$0xff]  ;;  %v3087_v24 = vld [vmem:[#allocation2 + $0x20] sm:$0xff]  ;;  %v3063_v57 = vmax.f32 %v10320_v34, %v8450_v10  ;;  %v3156_v3 = vld [vmem:[#allocation2 + $0x8] sm:$0xff] }
 0x284   : > { %v2684_v51 = vmax.f32 %v10314_v14, %v2652_v7  ;;  %vm10318_vm11 = vnez %v10317_v21  ;;  %v8465_v60 = vld [vmem:[#allocation2 + $0x30] sm:$0xff]  ;;  %v10319_v50 = vld [vmem:[#allocation106_spill] sm:$0xff]  ;;  %v2874_v5 = vmax.f32 %v2778_v63, %v2842_v39  ;;  %v3131_v39 = vmax.f32 %v8460_v37, %v8450_v10  ;;  %vm10337_vm6 = vmmov %vm10323_vm0 }
 0x285   : > { %v2844_v59 = vsel %vm10318_vm11, %v8173_v28, -inf  ;;  %v8468_v54 = vmax.f32 %v2870_v27, %v10319_v50  ;;  %v8471_v16 = vld [vmem:[#allocation2 + $0x38] sm:$0xff]  ;;  %v3053_v22 = vmax.f32 %v8376_v12, %v8465_v60  ;;  %v3091_v28 = vmax.f32 %v3055_v53, %v3087_v24  ;;  %vm10338_vm1 = vmmov %vm10323_vm0 }
 0x286   : > { %v2780_v38 = vmax.f32 %v2684_v51, %v8132_v29  ;;  %v8473_v9 = vld [vmem:[#allocation2 + $0x48] sm:$0xff]  ;;  %v3093_v46 = vmax.f32 %v3057_v31, %v8465_v60  ;;  %v3054_v56 = vmax.f32 %v8378_v18, %v8471_v16  ;;  %v2968_v12 = vmax.f32 %v2872_v36, %v10321_v17  ;;  %v3155_v51 = vld [vmem:[#allocation2] sm:$0xff]  ;;  %v10326_v36 = vld [vmem:[#allocation9_spill] sm:$0xff] }
 0x287   : > { %v3056_v29 = vmax.f32 %v8382_v2, %v8473_v9  ;;  %2998 = vst.msk [vmem:[#allocation2 + $0x68] sm:$0xff] %vm10286_vm3, %v8468_v54  ;;  %v8490_v53 = vmax.f32 %v2874_v5, %v8005_v4  ;;  %v3088_v31 = vld [vmem:[#allocation2 + $0x28] sm:$0xff]  ;;  %v3089_v30 = vmax.f32 %v3053_v22, %v3085_v26  ;;  %v3125_v7 = vmax.f32 %v3091_v28, %v8412_v61  ;;  %v10324_v4 = vld [vmem:[#allocation81_spill] sm:$0xff]  ;;  %vm10340_vm10 = vmmov %vm10323_vm0 }
 0x288   : > { %v8480_v0 = vld [vmem:[#allocation2 + $0x58] sm:$0xff]  ;;  %v3127_v18 = vmax.f32 %v3093_v46, %v8389_v58  ;;  %v3090_v15 = vmax.f32 %v3054_v56, %v3086_v47  ;;  %3000 = vst.msk [vmem:[#allocation2 + $0x78] sm:$0xff] %vm10322_vm14, %v2968_v12  ;;  %v2876_v2 = vmax.f32 %v2780_v38, %v2844_v59  ;;  %vm10325_vm9 = vnez %v10324_v4  ;;  %v10327_v46 = vld [vmem:[#allocation27_spill] sm:$0xff]  ;;  %vm10343_vm5 = vmmov %vm10323_vm0 }
 0x289   : > { %v3058_v27 = vmax.f32 %v8385_v62, %v8480_v0  ;;  %v3092_v13 = vmax.f32 %v3056_v29, %v3088_v31  ;;  %3002 = vst.msk [vmem:[#allocation2 + $0x88] sm:$0xff] %vm10323_vm0, %v8490_v53  ;;  %v2654_v63 = vsel %vm10325_vm9, %v8197_v23, -inf  ;;  %v3123_v14 = vmax.f32 %v3089_v30, %v8387_v20  ;;  %v8513_v23 = vld [vmem:[#allocation2 + $0x90] sm:$0xff]  ;;  %v8535_v4 = vld [vmem:[#allocation2 + $0xa0] sm:$0xff]  ;;  %vm10344_vm2 = vmmov %vm10323_vm0 }
 0x28a   : > { %v3129_v62 = vmax.f32 %v8454_v48, %v8415_v42  ;;  %v3124_v21 = vmax.f32 %v3090_v15, %v8473_v9  ;;  %v8511_v5 = vmax.f32 %v2876_v2, %v10326_v36  ;;  %v3159_v38 = vmax.f32 %v3125_v7, %v3085_v26  ;;  %v10329_v29 = vld [vmem:[#allocation61_spill] sm:$0xff]  ;;  %v10331_v26 = vld [vmem:[#allocation83_spill] sm:$0xff]  ;;  %vm10353_vm3 = vmmov %vm10323_vm0 }
 0x28b   : > { %v3126_v50 = vmax.f32 %v3092_v13, %v8480_v0  ;;  %v3094_v59 = vmax.f32 %v3058_v27, %v8471_v16  ;;  %v3161_v22 = vmax.f32 %v3127_v18, %v3087_v24  ;;  %v3099_v28 = vmax.f32 %v3063_v57, %v8389_v58  ;;  %v10333_v57 = vld [vmem:[#allocation109_spill] sm:$0xff]  ;;  %vm10354_vm14 = vmmov %vm10323_vm0 }
 0x28c   : > { %v2686_v48 = vmax.f32 %v10327_v46, %v2654_v63  ;;  %v3157_v34 = vmax.f32 %v3123_v14, %v3155_v51  ;;  %v3158_v56 = vmax.f32 %v3124_v21, %v3156_v3  ;;  %3004 = vst.msk [vmem:[#allocation2 + $0x98] sm:$0xff] %vm10328_vm12, %v8511_v5  ;;  %vm10330_vm4 = vnez %v10329_v29  ;;  %v10334_v18 = vld [vmem:[#allocation29_spill] sm:$0xff]  ;;  %vm10363_vm9 = vmmov %vm10338_vm1 }
 0x28d   : > { %v3160_v37 = vmax.f32 %v3126_v50, %v3086_v47  ;;  %v2656_v17 = vsel %vm10330_vm4, %v8211_v41, -inf  ;;  %vm10332_vm8 = vnez %v10331_v26  ;;  %v3065_v7 = vmax.f32 %v10333_v57, %v8513_v23  ;;  %v10335_v3 = vld [vmem:[#allocation5_spill] sm:$0xff]  ;;  %vm10366_vm12 = vmmov %vm10338_vm1 }
 0x28e   : > { %v8522_v30 = vld [vmem:[#allocation2 + $0x68] sm:$0xff]  ;;  %v2782_v27 = vmax.f32 %v2686_v48, %v8189_v52  ;;  %v2846_v24 = vsel %vm10332_vm8, %v8199_v1, -inf  ;;  %v2688_v47 = vmax.f32 %v10334_v18, %v2656_v17  ;;  %v3911_v15 = vpack.c.bf16 %v3158_v56, %v3157_v34  ;;  %v8560_v56 = vld [vmem:[#allocation2 + $0xb0] sm:$0xff]  ;;  %vm10367_vm4 = vmmov %vm10338_vm1 }
 0x28f   : > { %v3128_v13 = vmax.f32 %v3094_v59, %v8522_v30  ;;  %v3060_v2 = vmax.f32 %v8394_v25, %v8522_v30  ;;  %v3133_v41 = vmax.f32 %v3099_v28, %v8513_v23  ;;  %v3912_v52 = vpack.c.bf16 %v3160_v37, %v3159_v38  ;;  %v8537_v63 = vld [vmem:[#allocation2 + $0x78] sm:$0xff]  ;;  %vm10368_vm8 = vmmov %vm10338_vm1 }
 0x290   : > { %v8539_v14 = vld [vmem:[#allocation2 + $0x88] sm:$0xff]  ;;  %v2878_v1 = vmax.f32 %v2782_v27, %v2846_v24  ;;  %v2784_v51 = vmax.f32 %v2688_v47, %v8213_v55  ;;  %vm10336_vm7 = vnez %v10335_v3  ;;  %4924 = vmatprep.mubr.msk.bf16.mxu1 %vm10337_vm6, %v3911_v15  ;;  %v3062_v59 = vmax.f32 %v8468_v54, %v8537_v63  ;;  %v10345_v24 = vld [vmem:[#allocation91_spill] sm:$0xff]  ;;  %v10346_v15 = vld [vmem:[#allocation22_spill] sm:$0xff] }
 0x291   : > { %v2848_v21 = vsel %vm10336_vm7, %v8215_v44, -inf  ;;  %v3162_v50 = vmax.f32 %v3128_v13, %v3088_v31  ;;  %v3096_v25 = vmax.f32 %v3060_v2, %v8473_v9  ;;  %v3064_v36 = vmax.f32 %v2968_v12, %v8539_v14  ;;  %4925 = vmatmul.mubr.msk.bf16.vlgmr.msra.gmra.mrb[16].mxu1 %vm10338_vm1, %v3912_v52  ;;  %v10339_v44 = vld [vmem:[#allocation38_spill] sm:$0xff]  ;;  %v10347_v13 = vld [vmem:[#allocation73_spill] sm:$0xff]  ;;  %v10350_v52 = vld [vmem:[#allocation56_spill] sm:$0xff] }
 0x292   : > { %v8552_v38 = vmax.f32 %v2878_v1, %v8191_v6  ;;  %v3101_v55 = vmax.f32 %v3065_v7, %v8415_v42  ;;  %v2880_v28 = vmax.f32 %v2784_v51, %v2848_v21  ;;  %v3067_v46 = vmax.f32 %v10339_v44, %v8535_v4  ;;  %v10352_v51 = vld [vmem:[#allocation10_spill] sm:$0xff]  ;;  %v8603_v21 = vld [vmem:[#allocation2 + $0xd0] sm:$0xff]  ;;  %vm10370_vm7 = vmmov %vm10338_vm1 }
 0x293   : > { %v3913_v48 = vpack.c.bf16 %v3162_v50, %v3161_v22  ;;  %v3130_v31 = vmax.f32 %v3096_v25, %v8537_v63  ;;  %v3098_v34 = vmax.f32 %v3062_v59, %v8480_v0  ;;  %v3100_v54 = vmax.f32 %v3064_v36, %v8522_v30  ;;  %v8563_v37 = vld [vmem:[#allocation2 + $0x98] sm:$0xff]  ;;  %v10341_v22 = vld [vmem:[#allocation51_spill] sm:$0xff]  ;;  %v10355_v59 = vld [vmem:[#allocation12_spill] sm:$0xff] }
 0x294   : > { %v3163_v12 = vmax.f32 %v3129_v62, %v8465_v60  ;;  %3006 = vst.msk [vmem:[#allocation2 + $0xa8] sm:$0xff] %vm10340_vm10, %v8552_v38  ;;  %v8568_v6 = vmax.f32 %v2880_v28, %v8225_v45  ;;  %vm10342_vm15 = vnez %v10341_v22  ;;  %v3066_v62 = vmax.f32 %v8490_v53, %v8563_v37  ;;  %v10357_v28 = vld [vmem:[#allocation42_spill] sm:$0xff]  ;;  %vm10371_vm6 = vmmov %vm10338_vm1 }
 0x295   : > { %v2658_v29 = vsel %vm10342_vm15, %v8261_v35, -inf  ;;  %4928 = vmatprep.mubr.msk.bf16.mxu1 %vm10343_vm5, %v3913_v48  ;;  %v3164_v17 = vmax.f32 %v3130_v31, %v8471_v16  ;;  %v3132_v27 = vmax.f32 %v3098_v34, %v8539_v14  ;;  %v3134_v60 = vmax.f32 %v3100_v54, %v8563_v37  ;;  %v8616_v31 = vld [vmem:[#allocation2 + $0xf0] sm:$0xff]  ;;  %v10360_v34 = vld [vmem:[#allocation110_spill] sm:$0xff]  ;;  %vm10373_vm10 = vmmov %vm10338_vm1 }
 0x296   : > { %v3165_v26 = vmax.f32 %v3131_v39, %v8387_v20  ;;  %v3167_v45 = vmax.f32 %v3133_v41, %v8412_v61  ;;  %3008 = vst.msk [vmem:[#allocation2 + $0xb8] sm:$0xff] %vm10344_vm2, %v8568_v6  ;;  %v2690_v35 = vmax.f32 %v10345_v24, %v2658_v29  ;;  %v3069_v57 = vmax.f32 %v8175_v11, %v8560_v56  ;;  %v8592_v39 = vld [vmem:[#allocation2 + $0xc0] sm:$0xff]  ;;  %v10361_v29 = vld [vmem:[#allocation97_spill] sm:$0xff]  ;;  %vm10374_vm15 = vmmov %vm10338_vm1 }
 0x297   : > { %v3166_v16 = vmax.f32 %v3132_v27, %v8473_v9  ;;  %v3168_v7 = vmax.f32 %v3134_v60, %v8480_v0  ;;  %v3135_v18 = vmax.f32 %v3101_v55, %v8535_v4  ;;  %v3103_v53 = vmax.f32 %v3067_v46, %v8450_v10  ;;  %v8597_v11 = vld [vmem:[#allocation2 + $0xe0] sm:$0xff]  ;;  %v10356_v55 = vld [vmem:[#allocation18_spill] sm:$0xff]  ;;  %vm10375_vm5 = vmmov %vm10338_vm1 }
 0x298   : > { %v3914_v47 = vpack.c.bf16 %v3164_v17, %v3163_v12  ;;  %v3102_v20 = vmax.f32 %v3066_v62, %v8537_v63  ;;  %v2786_v61 = vmax.f32 %v2690_v35, %v8227_v8  ;;  %vm10348_vm13 = vnez %v10347_v13  ;;  %v10349_v0 = vld [vmem:[#allocation11_spill] sm:$0xff]  ;;  %vm10376_vm2 = vmmov %vm10338_vm1 }
 0x299   : > { %v2660_v2 = vsel %vm10348_vm13, %v10346_v15, -inf  ;;  %v3915_v9 = vpack.c.bf16 %v3166_v16, %v3165_v26  ;;  %v3916_v41 = vpack.c.bf16 %v3168_v7, %v3167_v45  ;;  %vm10351_vm11 = vnez %v10350_v52  ;;  %v10359_v46 = vld [vmem:[#allocation99_spill] sm:$0xff]  ;;  %v8638_v16 = vld [vmem:[#allocation2 + $0xf8] sm:$0xff]  ;;  %v10364_v7 = vld [vmem:[#allocation96_spill] sm:$0xff] }
 0x29a   : > { %v2850_v1 = vsel %vm10351_vm11, %v10349_v0, -inf  ;;  %v2692_v3 = vmax.f32 %v10352_v51, %v2660_v2  ;;  %4929 = vmatmul.mubr.msk.bf16.gmra.mrb[20].mxu1 %vm10353_vm3, %v3914_v47  ;;  %v3105_v50 = vmax.f32 %v3069_v57, %v8513_v23  ;;  %vm10358_vm0 = vnez %v10357_v28  ;;  %v10362_v27 = vld [vmem:[#allocation39_spill] sm:$0xff]  ;;  %v8652_v2 = vld [vmem:[#allocation2 + $0x110] sm:$0xff]  ;;  %vm10377_vm13 = vmmov %vm10338_vm1 }
 0x29b   : > { %v2882_v8 = vmax.f32 %v2786_v61, %v2850_v1  ;;  %4932 = vmatprep.mubr.msk.bf16.mxu1 %vm10354_vm14, %v3915_v9  ;;  %v8608_v25 = vld [vmem:[#allocation2 + $0xa8] sm:$0xff]  ;;  %v2852_v44 = vsel %vm10358_vm0, %v10356_v55, -inf  ;;  %v3071_v48 = vmax.f32 %v10359_v46, %v8592_v39  ;;  %v3075_v54 = vmax.f32 %v10360_v34, %v8597_v11  ;;  %v10365_v47 = vld [vmem:[#allocation95_spill] sm:$0xff]  ;;  %v8654_v9 = vld [vmem:[#allocation2 + $0x118] sm:$0xff] }
 0x29c   : > { %v2788_v36 = vmax.f32 %v2692_v3, %v10355_v59  ;;  %v3136_v12 = vmax.f32 %v3102_v20, %v8608_v25  ;;  %v3068_v22 = vmax.f32 %v8511_v5, %v8608_v25  ;;  %v3073_v60 = vmax.f32 %v10362_v27, %v8603_v21  ;;  %v8644_v20 = vld [vmem:[#allocation2 + $0xe8] sm:$0xff]  ;;  %v3051_v0 = vld [vmem:[#allocation2 + $0x120] sm:$0xff]  ;;  %vm10378_vm11 = vmmov %vm10338_vm1 }
 0x29d   : > { %v8624_v17 = vmax.f32 %v2882_v8, %v10361_v29  ;;  %v3169_v62 = vmax.f32 %v3135_v18, %v8389_v58  ;;  %v8629_v26 = vld [vmem:[#allocation2 + $0xb8] sm:$0xff]  ;;  %v3137_v45 = vmax.f32 %v3103_v53, %v8560_v56  ;;  %v3077_v58 = vmax.f32 %v10364_v7, %v8616_v31  ;;  %v3048_v46 = vld [vmem:[#allocation2 + $0x108] sm:$0xff] }
 0x29e   : > { %v2884_v24 = vmax.f32 %v2788_v36, %v2852_v44  ;;  %v3170_v35 = vmax.f32 %v3136_v12, %v8522_v30  ;;  %v3104_v57 = vmax.f32 %v3068_v22, %v8539_v14  ;;  %v3070_v5 = vmax.f32 %v8552_v38, %v8629_v26  ;;  %v10369_v34 = vld [vmem:[#allocation36_spill] sm:$0xff]  ;;  %v3122_v7 = vld [vmem:[#allocation2 + $0x138] sm:$0xff] }
 0x29f   : > { %3010 = vst.msk [vmem:[#allocation2 + $0xc8] sm:$0xff] %vm10363_vm9, %v8624_v17  ;;  %v3139_v18 = vmax.f32 %v3105_v50, %v8592_v39  ;;  %v3111_v30 = vmax.f32 %v3075_v54, %v8592_v39  ;;  %v3107_v13 = vmax.f32 %v3071_v48, %v8535_v4  ;;  %v8650_v38 = vmax.f32 %v3073_v60, %v8560_v56  ;;  %v8664_v50 = vld [vmem:[#allocation2 + $0x100] sm:$0xff] }
 0x2a0   : > { %v2980_v53 = vmax.f32 %v2884_v24, %v10365_v47  ;;  %v3917_v61 = vpack.c.bf16 %v3170_v35, %v3169_v62  ;;  %v3138_v15 = vmax.f32 %v3104_v57, %v8629_v26  ;;  %v3171_v52 = vmax.f32 %v3137_v45, %v8415_v42 }
 0x2a1   : > { %v3078_v1 = vmax.f32 %v8326_v43, %v8638_v16  ;;  %v3106_v3 = vmax.f32 %v3070_v5, %v8563_v37  ;;  %v3113_v59 = vmax.f32 %v3077_v58, %v8603_v21  ;;  %v3145_v42 = vmax.f32 %v3111_v30, %v8616_v31 }
 0x2a2   : > { %3012 = vst.msk [vmem:[#allocation2 + $0xd8] sm:$0xff] %vm10366_vm12, %v2980_v53  ;;  %4933 = vmatmul.mubr.msk.bf16.gmra.mrb[24].mxu1 %vm10367_vm4, %v3916_v41  ;;  %v3172_v51 = vmax.f32 %v3138_v15, %v8537_v63  ;;  %v3076_v8 = vmax.f32 %v2980_v53, %v8644_v20  ;;  %v3081_v36 = vmax.f32 %v8363_v40, %v8652_v2  ;;  %vm4436_vm3 = vcmask 64512  }
 0x2a3   : > { %4936 = vmatprep.mubr.msk.bf16.mxu1 %vm10368_vm8, %v3917_v61  ;;  %v3082_v43 = vmax.f32 %v8380_v19, %v8654_v9  ;;  %v3083_v63 = vmax.f32 %v8391_v32, %v3051_v0  ;;  %v3173_v55 = vmax.f32 %v3139_v18, %v8450_v10  ;;  %v3141_v28 = vmax.f32 %v3107_v13, %v8603_v21  ;;  %v3121_v32 = vld [vmem:[#allocation2 + $0x130] sm:$0xff] }
 0x2a4   : > { %v3918_v41 = vpack.c.bf16 %v3172_v51, %v3171_v52  ;;  %v3143_v44 = vmax.f32 %v8650_v38, %v8597_v11  ;;  %v3084_v54 = vmax.f32 %v8404_v49, %v10369_v34  ;;  %v3117_v40 = vmax.f32 %v3081_v36, %v8616_v31 }
 0x2a5   : > { %v3118_v12 = vmax.f32 %v3082_v43, %v8638_v16  ;;  %v3119_v19 = vmax.f32 %v3083_v63, %v8664_v50  ;;  %v3147_v27 = vmax.f32 %v3113_v59, %v8664_v50  ;;  %v3179_v60 = vmax.f32 %v3145_v42, %v8560_v56  ;;  %v10372_v43 = vld [vmem:[#allocation46_spill] sm:$0xff] }
 0x2a6   : > { %v3040_v48 = vld [vmem:[#allocation2 + $0xc8] sm:$0xff]  ;;  %v3151_v62 = vmax.f32 %v3117_v40, %v3051_v0  ;;  %v3120_v24 = vmax.f32 %v3084_v54, %v3048_v46  ;;  %v3079_v63 = vmax.f32 %v10372_v43, %v8664_v50 }
 0x2a7   : > { %v3140_v22 = vmax.f32 %v3106_v3, %v3040_v48  ;;  %v3072_v10 = vmax.f32 %v8568_v6, %v3040_v48  ;;  %v3112_v29 = vmax.f32 %v3076_v8, %v3040_v48  ;;  %v3152_v45 = vmax.f32 %v3118_v12, %v10369_v34 }
 0x2a8   : > { %v3153_v58 = vmax.f32 %v3119_v19, %v3121_v32  ;;  %v3175_v6 = vmax.f32 %v3141_v28, %v8513_v23  ;;  %v3185_v56 = vmax.f32 %v3151_v62, %v8597_v11  ;;  %v3181_v38 = vmax.f32 %v3147_v27, %v8592_v39 }
 0x2a9   : > { %v3174_v49 = vmax.f32 %v3140_v22, %v8539_v14  ;;  %v3042_v35 = vld [vmem:[#allocation2 + $0xd8] sm:$0xff]  ;;  %v3108_v57 = vmax.f32 %v3072_v10, %v8608_v25  ;;  %v3146_v5 = vmax.f32 %v3112_v29, %v8638_v16  ;;  %v3186_v61 = vmax.f32 %v3152_v45, %v8644_v20 }
 0x2aa   : > { %v3074_v18 = vmax.f32 %v8624_v17, %v3042_v35  ;;  %v3114_v47 = vmax.f32 %v3078_v1, %v3042_v35  ;;  %4937 = vmatmul.mubr.msk.bf16.gmra.mrb[28].mxu1 %vm10370_vm7, %v3918_v41  ;;  %v3154_v0 = vmax.f32 %v3120_v24, %v3122_v7  ;;  %v3187_v1 = vmax.f32 %v3153_v58, %v8616_v31 }
 0x2ab   : > { %v3919_v53 = vpack.c.bf16 %v3174_v49, %v3173_v55  ;;  %v3142_v30 = vmax.f32 %v3108_v57, %v3042_v35  ;;  %v3180_v14 = vmax.f32 %v3146_v5, %v8629_v26  ;;  %v3925_v52 = vpack.c.bf16 %v3186_v61, %v3185_v56 }
 0x2ac   : > { %v3110_v15 = vmax.f32 %v3074_v18, %v8629_v26  ;;  %v3148_v13 = vmax.f32 %v3114_v47, %v3048_v46  ;;  %v3177_v3 = vmax.f32 %v3143_v44, %v8535_v4  ;;  %v3188_v59 = vmax.f32 %v3154_v0, %v8638_v16 }
 0x2ad   : > { %4940 = vmatprep.mubr.msk.bf16.mxu1 %vm10371_vm6, %v3919_v53  ;;  %v3176_v23 = vmax.f32 %v3142_v30, %v8563_v37  ;;  %v3922_v17 = vpack.c.bf16 %v3180_v14, %v3179_v60  ;;  %v3080_v37 = vmax.f32 %v8361_v33, %v3048_v46  ;;  %v3115_v4 = vmax.f32 %v3079_v63, %v8597_v11  ;;  %v8765_v53 = vld [vmem:[%s9025_s4] ss:$0 sm:$0xff] }
 0x2ae   : > { %v3144_v51 = vmax.f32 %v3110_v15, %v8644_v20  ;;  %v3182_v8 = vmax.f32 %v3148_v13, %v3040_v48  ;;  %v3926_v36 = vpack.c.bf16 %v3188_v59, %v3187_v1 }
 0x2af   : > { %v3920_v26 = vpack.c.bf16 %v3176_v23, %v3175_v6  ;;  %v3116_v31 = vmax.f32 %v3080_v37, %v8644_v20  ;;  %v3149_v16 = vmax.f32 %v3115_v4, %v8652_v2 }
 0x2b0   : > { %v3178_v42 = vmax.f32 %v3144_v51, %v8608_v25  ;;  %v3923_v39 = vpack.c.bf16 %v3182_v8, %v3181_v38  ;;  %v8720_v11 = vpop.f32.mrb[48].mxu0 }
 0x2b1   : > { %v3150_v25 = vmax.f32 %v3116_v31, %v8654_v9  ;;  %v3183_v50 = vmax.f32 %v3149_v16, %v8603_v21  ;;  %v8722_v20 = vpop.f32.mrb[49].mxu0 }
 0x2b2   : > { %v3921_v41 = vpack.c.bf16 %v3178_v42, %v3177_v3  ;;  %4941 = vmatmul.mubr.msk.bf16.gmra.mrb[0].mxu1 %vm10338_vm1, %v3920_v26  ;;  %v8724_v2 = vpop.f32.mrb[50].mxu0 }
 0x2b3   : > { %v3184_v33 = vmax.f32 %v3150_v25, %v3042_v35  ;;  %v8726_v9 = vpop.f32.mrb[51].mxu0 }
 0x2b4   : > { %4944 = vmatprep.mubr.msk.bf16.mxu1 %vm10373_vm10, %v3921_v41 }
 0x2b5   : > { %v3924_v55 = vpack.c.bf16 %v3184_v33, %v3183_v50 }
 0x2ba   : > { %4945 = vmatmul.mubr.msk.bf16.gmra.mrb[4].mxu1 %vm10374_vm15, %v3922_v17 }
 0x2bb   : > { %4948 = vmatprep.mubr.msk.bf16.mxu1 %vm10375_vm5, %v3923_v39 }
 0x2c2   : > { %4949 = vmatmul.mubr.msk.bf16.gmra.mrb[8].mxu1 %vm10376_vm2, %v3924_v55 }
 0x2c3   : > { %4952 = vmatprep.mubr.msk.bf16.mxu1 %vm10377_vm13, %v3925_v52 }
 0x2c8   : > { %v8728_v28 = vpop.f32.mrb[52].mxu0 }
 0x2c9   : > { %v8730_v44 = vpop.f32.mrb[53].mxu0 }
 0x2ca   : > { %4953 = vmatmul.mubr.msk.bf16.gmra.mrb[12].mxu1 %vm10378_vm11, %v3926_v36  ;;  %v8732_v21 = vpop.f32.mrb[54].mxu0 }
 0x2cb   : > { %v8734_v46 = vpop.f32.mrb[55].mxu0 }
 0x2e3   : > { %v8736_v48 = vpop.f32.mrb[56].mxu0 }
 0x2e4   : > { %v8738_v34 = vpop.f32.mrb[57].mxu0 }
 0x2e5   : > { %v8740_v54 = vpop.f32.mrb[58].mxu0 }
 0x2e6   : > { %v8742_v40 = vpop.f32.mrb[59].mxu0 }
 0x2f0   : > { %v8744_v12 = vpop.f32.mrb[60].mxu0 }
 0x2f1   : > { %v8746_v19 = vpop.f32.mrb[61].mxu0 }
 0x2f2   : > { %v8748_v32 = vpop.f32.mrb[62].mxu0 }
 0x2f3   : > { %v8750_v22 = vpop.f32.mrb[63].mxu0 }
 0x300   : > { %v4858_v10 = vpop.f32.mrb[32].mxu0 }
 0x301   : > { %v3522_v29 = vpop.f32.mrb[33].mxu0 }
 0x302   : > { %v4859_v27 = vpop.f32.mrb[34].mxu0 }
 0x303   : > { %v3525_v60 = vpop.f32.mrb[35].mxu0 }
 0x310   : > { %v4862_v62 = vpop.f32.mrb[36].mxu0 }
 0x311   : > { %v3538_v45 = vpop.f32.mrb[37].mxu0 }
 0x312   : > { %v4863_v24 = vpop.f32.mrb[38].mxu0 }
 0x313   : > { %v3541_v49 = vpop.f32.mrb[39].mxu0 }
 0x31a   : > { %v4866_v35 = vpop.f32.mrb[40].mxu0 }
 0x31b   : > { %v3554_v57 = vpop.f32.mrb[41].mxu0 }
 0x31c   : > { %v4867_v5 = vpop.f32.mrb[42].mxu0 }
 0x31d   : > { %v8752_v7 = vpop.f32.mrb[43].mxu0 }
 0x326   : > { %v8754_v58 = vpop.f32.mrb[44].mxu0 }
 0x327   : > { %v8756_v6 = vpop.f32.mrb[45].mxu0 }
 0x328   : > { %v8758_v18 = vpop.f32.mrb[46].mxu0 }
 0x329   : > { %v8760_v47 = vpop.f32.mrb[47].mxu0 }
 0x364   : > { %v4926_v56 = vpop.f32.mrb[16].mxu1 }
 0x365   : > { %v4958_v30 = vadd.f32 %v4926_v56, %v4858_v10  ;;  %v4014_v14 = vpop.f32.mrb[17].mxu1 }
 0x366   : > { %v4959_v61 = vadd.f32 %v4014_v14, %v3522_v29  ;;  %v4927_v15 = vpop.f32.mrb[18].mxu1 }
 0x367   : > { %v8768_v13 = vadd.f32 %v4958_v30, %v8765_v53  ;;  %v4960_v38 = vadd.f32 %v4927_v15, %v4859_v27  ;;  %v4017_v0 = vpop.f32.mrb[19].mxu1 }
 0x368   : > { %v8771_v23 = vadd.f32 %v4959_v61, %v8765_v53  ;;  %v4961_v17 = vadd.f32 %v4017_v0, %v3525_v60 }
 0x369   : > { %v4669_v52 = vmul.f32 -1.442695, %v8768_v13  ;;  %v8775_v1 = vadd.f32 %v4960_v38, %v8765_v53 }
 0x36a   : > { %v4667_v51 = vmul.f32 -1.442695, %v8771_v23  ;;  %v8779_v3 = vadd.f32 %v4961_v17, %v8765_v53 }
 0x36b   : > { %5213 = vpow2.f32 %v4669_v52  ;;  %v4670_v8 = vmul.f32 -1.442695, %v8775_v1 }
 0x36c   : > { %5215 = vpow2.f32 %v4667_v51  ;;  %v4668_v59 = vmul.f32 -1.442695, %v8779_v3 }
 0x36d   : > { %v4930_v26 = vpop.f32.mrb[20].mxu1  ;;  %5217 = vpow2.f32 %v4670_v8 }
 0x36e   : > { %v4962_v42 = vadd.f32 %v4930_v26, %v4862_v62  ;;  %v4030_v39 = vpop.f32.mrb[21].mxu1  ;;  %5219 = vpow2.f32 %v4668_v59 }
 0x36f   : > { %v4963_v36 = vadd.f32 %v4030_v39, %v3538_v45  ;;  %v4931_v43 = vpop.f32.mrb[22].mxu1 }
 0x370   : > { %v8784_v63 = vadd.f32 %v4962_v42, %v8765_v53  ;;  %v4964_v37 = vadd.f32 %v4931_v43, %v4863_v24  ;;  %v4033_v41 = vpop.f32.mrb[23].mxu1 }
 0x371   : > { %v8787_v4 = vadd.f32 %v4963_v36, %v8765_v53  ;;  %v4965_v31 = vadd.f32 %v4033_v41, %v3541_v49 }
 0x372   : > { %v4673_v16 = vmul.f32 -1.442695, %v8784_v63  ;;  %v8791_v25 = vadd.f32 %v4964_v37, %v8765_v53 }
 0x373   : > { %v4671_v50 = vmul.f32 -1.442695, %v8787_v4  ;;  %v8795_v33 = vadd.f32 %v4965_v31, %v8765_v53 }
 0x374   : > { %5221 = vpow2.f32 %v4673_v16  ;;  %v4674_v55 = vmul.f32 -1.442695, %v8791_v25 }
 0x375   : > { %5223 = vpow2.f32 %v4671_v50  ;;  %v4672_v10 = vmul.f32 -1.442695, %v8795_v33  ;;  %v4934_v29 = vpop.f32.mrb[24].mxu1  ;;  %v5214_v27 = vpop.eup %5213 }
 0x376   : > { %5225 = vpow2.f32 %v4674_v55  ;;  %v4966_v60 = vadd.f32 %v4934_v29, %v4866_v35  ;;  %v4046_v62 = vpop.f32.mrb[25].mxu1  ;;  %v5216_v45 = vpop.eup %5215  ;;  %v4310_v24 = vadd.f32 1.0, %v5214_v27 }
 0x377   : > { %5227 = vpow2.f32 %v4672_v10  ;;  %v4967_v49 = vadd.f32 %v4046_v62, %v3554_v57  ;;  %v4935_v56 = vpop.f32.mrb[26].mxu1  ;;  %v5218_v30 = vpop.eup %5217  ;;  %v4308_v14 = vadd.f32 1.0, %v5216_v45 }
 0x378   : > { %v8800_v61 = vadd.f32 %v4966_v60, %v8765_v53  ;;  %v4968_v15 = vadd.f32 %v4935_v56, %v4867_v5  ;;  %v4049_v38 = vpop.f32.mrb[27].mxu1  ;;  %v5220_v0 = vpop.eup %5219  ;;  %5229 = vrcp.f32 %v4310_v24  ;;  %v4311_v17 = vadd.f32 1.0, %v5218_v30 }
 0x379   : > { %v8803_v52 = vadd.f32 %v4967_v49, %v8765_v53  ;;  %v4969_v35 = vadd.f32 %v4049_v38, %v8752_v7  ;;  %5231 = vrcp.f32 %v4308_v14  ;;  %v4309_v51 = vadd.f32 1.0, %v5220_v0 }
 0x37a   : > { %v4677_v57 = vmul.f32 -1.442695, %v8800_v61  ;;  %v8808_v8 = vadd.f32 %v4968_v15, %v8765_v53  ;;  %5233 = vrcp.f32 %v4311_v17 }
 0x37b   : > { %v4675_v59 = vmul.f32 -1.442695, %v8803_v52  ;;  %v8812_v5 = vadd.f32 %v4969_v35, %v8765_v53  ;;  %5235 = vrcp.f32 %v4309_v51 }
 0x37c   : > { %v4678_v26 = vmul.f32 -1.442695, %v8808_v8  ;;  %5237 = vpow2.f32 %v4677_v57 }
 0x37d   : > { %v4676_v7 = vmul.f32 -1.442695, %v8812_v5  ;;  %v4938_v42 = vpop.f32.mrb[28].mxu1  ;;  %5239 = vpow2.f32 %v4675_v59 }
 0x37e   : > { %v5222_v39 = vpop.eup %5221  ;;  %v4970_v36 = vadd.f32 %v4938_v42, %v8754_v58  ;;  %v4062_v43 = vpop.f32.mrb[29].mxu1  ;;  %5241 = vpow2.f32 %v4678_v26 }
 0x37f   : > { %v5224_v37 = vpop.eup %5223  ;;  %v4314_v41 = vadd.f32 1.0, %v5222_v39  ;;  %v4971_v31 = vadd.f32 %v4062_v43, %v8756_v6  ;;  %v4939_v16 = vpop.f32.mrb[30].mxu1  ;;  %5243 = vpow2.f32 %v4676_v7 }
 0x380   : > { %v5226_v50 = vpop.eup %5225  ;;  %v4312_v55 = vadd.f32 1.0, %v5224_v37  ;;  %v8820_v10 = vadd.f32 %v4970_v36, %v8765_v53  ;;  %v4972_v29 = vadd.f32 %v4939_v16, %v8758_v18  ;;  %v4065_v27 = vpop.f32.mrb[31].mxu1 }
 0x381   : > { %v5228_v60 = vpop.eup %5227  ;;  %5245 = vrcp.f32 %v4314_v41  ;;  %v4315_v58 = vadd.f32 1.0, %v5226_v50  ;;  %v8824_v62 = vadd.f32 %v4971_v31, %v8765_v53  ;;  %v4973_v45 = vadd.f32 %v4065_v27, %v8760_v47 }
 0x382   : > { %5247 = vrcp.f32 %v4312_v55  ;;  %v4313_v6 = vadd.f32 1.0, %v5228_v60  ;;  %v4681_v24 = vmul.f32 -1.442695, %v8820_v10  ;;  %v8829_v49 = vadd.f32 %v4972_v29, %v8765_v53  ;;  %v5230_v56 = vpop.eup %5229 }
 0x383   : > { %5249 = vrcp.f32 %v4315_v58  ;;  %v4679_v18 = vmul.f32 -1.442695, %v8824_v62  ;;  %v8838_v47 = vadd.f32 %v4973_v45, %v8765_v53  ;;  %v5232_v30 = vpop.eup %5231  ;;  %v4406_v14 = vmul.f32 %v5230_v56, %v8768_v13 }
 0x384   : > { %5251 = vrcp.f32 %v4313_v6  ;;  %v4682_v15 = vmul.f32 -1.442695, %v8829_v49  ;;  %v5234_v38 = vpop.eup %5233  ;;  %v4404_v0 = vmul.f32 %v5232_v30, %v8771_v23 }
 0x385   : > { %5253 = vpow2.f32 %v4681_v24  ;;  %v4680_v17 = vmul.f32 -1.442695, %v8838_v47  ;;  %v4942_v35 = vpop.f32.mrb[0].mxu1  ;;  %v5236_v51 = vpop.eup %5235  ;;  %4439 = vst.msk [vmem:[%s8834_s20 + $0x10] sm:$0xff] %vm4436_vm3, %v4406_v14  ;;  %v4407_v57 = vmul.f32 %v5234_v38, %v8775_v1 }
 0x386   : > { %5255 = vpow2.f32 %v4679_v18  ;;  %v4974_v59 = vadd.f32 %v4942_v35, %v8720_v11  ;;  %v4078_v13 = vpop.f32.mrb[1].mxu1  ;;  %v5238_v26 = vpop.eup %5237  ;;  %4437 = vst.msk [vmem:[%s8834_s20] sm:$0xff] %vm4436_vm3, %v4404_v0  ;;  %v4405_v23 = vmul.f32 %v5236_v51, %v8779_v3 }
 0x387   : > { %5257 = vpow2.f32 %v4682_v15  ;;  %v4975_v7 = vadd.f32 %v4078_v13, %v8722_v20  ;;  %v4943_v42 = vpop.f32.mrb[2].mxu1  ;;  %v5240_v39 = vpop.eup %5239  ;;  %4440 = vst.msk [vmem:[%s8834_s20 + $0x18] sm:$0xff] %vm4436_vm3, %v4407_v57  ;;  %v4318_v36 = vadd.f32 1.0, %v5238_v26 }
 0x388   : > { %5259 = vpow2.f32 %v4680_v17  ;;  %v8855_v1 = vadd.f32 %v4974_v59, %v8765_v53  ;;  %v4976_v11 = vadd.f32 %v4943_v42, %v8724_v2  ;;  %v4081_v43 = vpop.f32.mrb[3].mxu1  ;;  %v5242_v37 = vpop.eup %5241  ;;  %4438 = vst.msk [vmem:[%s8834_s20 + $0x8] sm:$0xff] %vm4436_vm3, %v4405_v23  ;;  %v4316_v41 = vadd.f32 1.0, %v5240_v39 }
 0x389   : > { %v8861_v3 = vadd.f32 %v4975_v7, %v8765_v53  ;;  %v4977_v20 = vadd.f32 %v4081_v43, %v8726_v9  ;;  %v5244_v31 = vpop.eup %5243  ;;  %5261 = vrcp.f32 %v4318_v36  ;;  %v4319_v16 = vadd.f32 1.0, %v5242_v37 }
 0x38a   : > { %v4685_v50 = vmul.f32 -1.442695, %v8855_v1  ;;  %v8866_v55 = vadd.f32 %v4976_v11, %v8765_v53  ;;  %5263 = vrcp.f32 %v4316_v41  ;;  %v4317_v29 = vadd.f32 1.0, %v5244_v31 }
 0x38b   : > { %v5246_v2 = vpop.eup %5245  ;;  %v4683_v27 = vmul.f32 -1.442695, %v8861_v3  ;;  %v8870_v60 = vadd.f32 %v4977_v20, %v8765_v53  ;;  %5265 = vrcp.f32 %v4319_v16 }
 0x38c   : > { %v5248_v58 = vpop.eup %5247  ;;  %v4410_v9 = vmul.f32 %v5246_v2, %v8784_v63  ;;  %v4686_v45 = vmul.f32 -1.442695, %v8866_v55  ;;  %5267 = vrcp.f32 %v4317_v29 }
 0x38d   : > { %v5250_v6 = vpop.eup %5249  ;;  %v4408_v24 = vmul.f32 %v5248_v58, %v8787_v4  ;;  %v4684_v56 = vmul.f32 -1.442695, %v8870_v60  ;;  %v4946_v18 = vpop.f32.mrb[4].mxu1  ;;  %5269 = vpow2.f32 %v4685_v50 }
 0x38e   : > { %v5252_v30 = vpop.eup %5251  ;;  %4443 = vst.msk [vmem:[%s8834_s20 + $0x30] sm:$0xff] %vm4436_vm3, %v4410_v9  ;;  %v4411_v14 = vmul.f32 %v5250_v6, %v8791_v25  ;;  %v4978_v15 = vadd.f32 %v4946_v18, %v8728_v28  ;;  %v4094_v63 = vpop.f32.mrb[5].mxu1  ;;  %5271 = vpow2.f32 %v4683_v27 }
 0x38f   : > { %v5254_v38 = vpop.eup %5253  ;;  %4441 = vst.msk [vmem:[%s8834_s20 + $0x20] sm:$0xff] %vm4436_vm3, %v4408_v24  ;;  %v4409_v4 = vmul.f32 %v5252_v30, %v8795_v33  ;;  %v4979_v0 = vadd.f32 %v4094_v63, %v8730_v44  ;;  %v4947_v17 = vpop.f32.mrb[6].mxu1  ;;  %5273 = vpow2.f32 %v4686_v45 }
 0x390   : > { %v5256_v35 = vpop.eup %5255  ;;  %4444 = vst.msk [vmem:[%s8834_s20 + $0x38] sm:$0xff] %vm4436_vm3, %v4411_v14  ;;  %v4322_v51 = vadd.f32 1.0, %v5254_v38  ;;  %v8887_v25 = vadd.f32 %v4978_v15, %v8765_v53  ;;  %v4980_v28 = vadd.f32 %v4947_v17, %v8732_v21  ;;  %v4097_v57 = vpop.f32.mrb[7].mxu1  ;;  %5275 = vpow2.f32 %v4684_v56 }
 0x391   : > { %v5258_v59 = vpop.eup %5257  ;;  %4442 = vst.msk [vmem:[%s8834_s20 + $0x28] sm:$0xff] %vm4436_vm3, %v4409_v4  ;;  %v4320_v13 = vadd.f32 1.0, %v5256_v35  ;;  %v8893_v33 = vadd.f32 %v4979_v0, %v8765_v53  ;;  %v4981_v44 = vadd.f32 %v4097_v57, %v8734_v46 }
 0x392   : > { %v5260_v26 = vpop.eup %5259  ;;  %5277 = vrcp.f32 %v4322_v51  ;;  %v4323_v23 = vadd.f32 1.0, %v5258_v59  ;;  %v4689_v7 = vmul.f32 -1.442695, %v8887_v25  ;;  %v8898_v42 = vadd.f32 %v4980_v28, %v8765_v53 }
 0x393   : > { %5279 = vrcp.f32 %v4320_v13  ;;  %v4321_v21 = vadd.f32 1.0, %v5260_v26  ;;  %v4687_v39 = vmul.f32 -1.442695, %v8893_v33  ;;  %v8902_v36 = vadd.f32 %v4981_v44, %v8765_v53  ;;  %v5262_v11 = vpop.eup %5261 }
 0x394   : > { %5281 = vrcp.f32 %v4323_v23  ;;  %v4690_v46 = vmul.f32 -1.442695, %v8898_v42  ;;  %v5264_v43 = vpop.eup %5263  ;;  %v4414_v37 = vmul.f32 %v5262_v11, %v8800_v61 }
 0x395   : > { %5283 = vrcp.f32 %v4321_v21  ;;  %v4688_v41 = vmul.f32 -1.442695, %v8902_v36  ;;  %v4950_v20 = vpop.f32.mrb[8].mxu1  ;;  %v5266_v31 = vpop.eup %5265  ;;  %v4412_v16 = vmul.f32 %v5264_v43, %v8803_v52 }
 0x396   : > { %5285 = vpow2.f32 %v4689_v7  ;;  %v4982_v50 = vadd.f32 %v4950_v20, %v8736_v48  ;;  %v4110_v2 = vpop.f32.mrb[9].mxu1  ;;  %v5268_v29 = vpop.eup %5267  ;;  %4447 = vst.msk [vmem:[%s8834_s20 + $0x50] sm:$0xff] %vm4436_vm3, %v4414_v37  ;;  %v4415_v27 = vmul.f32 %v5266_v31, %v8808_v8 }
 0x397   : > { %5287 = vpow2.f32 %v4687_v39  ;;  %v4983_v61 = vadd.f32 %v4110_v2, %v8738_v34  ;;  %v4951_v58 = vpop.f32.mrb[10].mxu1  ;;  %v5270_v9 = vpop.eup %5269  ;;  %4445 = vst.msk [vmem:[%s8834_s20 + $0x40] sm:$0xff] %vm4436_vm3, %v4412_v16  ;;  %v4413_v52 = vmul.f32 %v5268_v29, %v8812_v5 }
 0x398   : > { %5289 = vpow2.f32 %v4690_v46  ;;  %v8917_v48 = vadd.f32 %v4982_v50, %v8765_v53  ;;  %v4984_v45 = vadd.f32 %v4951_v58, %v8740_v54  ;;  %v4113_v6 = vpop.f32.mrb[11].mxu1  ;;  %v5272_v24 = vpop.eup %5271  ;;  %4448 = vst.msk [vmem:[%s8834_s20 + $0x58] sm:$0xff] %vm4436_vm3, %v4415_v27  ;;  %v4326_v8 = vadd.f32 1.0, %v5270_v9 }
 0x399   : > { %5291 = vpow2.f32 %v4688_v41  ;;  %v8923_v34 = vadd.f32 %v4983_v61, %v8765_v53  ;;  %v4985_v56 = vadd.f32 %v4113_v6, %v8742_v40  ;;  %v5274_v18 = vpop.eup %5273  ;;  %4446 = vst.msk [vmem:[%s8834_s20 + $0x48] sm:$0xff] %vm4436_vm3, %v4413_v52  ;;  %v4324_v5 = vadd.f32 1.0, %v5272_v24 }
 0x39a   : > { %v8929_v30 = vadd.f32 %v4984_v45, %v8765_v53  ;;  %v5276_v14 = vpop.eup %5275  ;;  %5293 = vrcp.f32 %v4326_v8  ;;  %v4327_v54 = vadd.f32 1.0, %v5274_v18  ;;  %v4693_v15 = vmul.f32 -1.442695, %v8917_v48 }
 0x39b   : > { %v8933_v63 = vadd.f32 %v4985_v56, %v8765_v53  ;;  %5295 = vrcp.f32 %v4324_v5  ;;  %v4325_v4 = vadd.f32 1.0, %v5276_v14  ;;  %v4691_v40 = vmul.f32 -1.442695, %v8923_v34 }
 0x39c   : > { %v5278_v38 = vpop.eup %5277  ;;  %5297 = vrcp.f32 %v4327_v54  ;;  %v4694_v35 = vmul.f32 -1.442695, %v8929_v30 }
 0x39d   : > { %v5280_v0 = vpop.eup %5279  ;;  %v4418_v17 = vmul.f32 %v5278_v38, %v8820_v10  ;;  %v4954_v51 = vpop.f32.mrb[12].mxu1  ;;  %5299 = vrcp.f32 %v4325_v4  ;;  %v4692_v59 = vmul.f32 -1.442695, %v8933_v63 }
 0x39e   : > { %v5282_v28 = vpop.eup %5281  ;;  %v4416_v57 = vmul.f32 %v5280_v0, %v8824_v62  ;;  %v4986_v13 = vadd.f32 %v4954_v51, %v8744_v12  ;;  %v4126_v44 = vpop.f32.mrb[13].mxu1  ;;  %5301 = vpow2.f32 %v4693_v15 }
 0x39f   : > { %v5284_v26 = vpop.eup %5283  ;;  %4451 = vst.msk [vmem:[%s8834_s20 + $0x70] sm:$0xff] %vm4436_vm3, %v4418_v17  ;;  %v4419_v10 = vmul.f32 %v5282_v28, %v8829_v49  ;;  %v4987_v23 = vadd.f32 %v4126_v44, %v8746_v19  ;;  %v4955_v7 = vpop.f32.mrb[14].mxu1  ;;  %5303 = vpow2.f32 %v4691_v40 }
 0x3a0   : > { %v5286_v21 = vpop.eup %5285  ;;  %4449 = vst.msk [vmem:[%s8834_s20 + $0x60] sm:$0xff] %vm4436_vm3, %v4416_v57  ;;  %v4417_v62 = vmul.f32 %v5284_v26, %v8838_v47  ;;  %v8949_v12 = vadd.f32 %v4986_v13, %v8765_v53  ;;  %v4988_v39 = vadd.f32 %v4955_v7, %v8748_v32  ;;  %v4129_v11 = vpop.f32.mrb[15].mxu1  ;;  %5305 = vpow2.f32 %v4694_v35 }
 0x3a1   : > { %v5288_v46 = vpop.eup %5287  ;;  %4452 = vst.msk [vmem:[%s8834_s20 + $0x78] sm:$0xff] %vm4436_vm3, %v4419_v10  ;;  %v4330_v49 = vadd.f32 1.0, %v5286_v21  ;;  %v8955_v19 = vadd.f32 %v4987_v23, %v8765_v53  ;;  %v4989_v43 = vadd.f32 %v4129_v11, %v8750_v22  ;;  %5307 = vpow2.f32 %v4692_v59 }
 0x3a2   : > { %v5290_v37 = vpop.eup %5289  ;;  %4450 = vst.msk [vmem:[%s8834_s20 + $0x68] sm:$0xff] %vm4436_vm3, %v4417_v62  ;;  %v4328_v47 = vadd.f32 1.0, %v5288_v46  ;;  %v8961_v41 = vadd.f32 %v4988_v39, %v8765_v53  ;;  %v4697_v31 = vmul.f32 -1.442695, %v8949_v12 }
 0x3a3   : > { %v5292_v32 = vpop.eup %5291  ;;  %5309 = vrcp.f32 %v4330_v49  ;;  %v4331_v20 = vadd.f32 1.0, %v5290_v37  ;;  %v8965_v16 = vadd.f32 %v4989_v43, %v8765_v53  ;;  %v4695_v22 = vmul.f32 -1.442695, %v8955_v19 }
 0x3a4   : > { %5311 = vrcp.f32 %v4328_v47  ;;  %v4329_v50 = vadd.f32 1.0, %v5292_v32  ;;  %v5294_v2 = vpop.eup %5293  ;;  %v4698_v29 = vmul.f32 -1.442695, %v8961_v41 }
 0x3a5   : > { %5313 = vrcp.f32 %v4331_v20  ;;  %v5296_v27 = vpop.eup %5295  ;;  %v4422_v61 = vmul.f32 %v5294_v2, %v8855_v1  ;;  %v4696_v58 = vmul.f32 -1.442695, %v8965_v16 }
 0x3a6   : > { %5315 = vrcp.f32 %v4329_v50  ;;  %v5298_v9 = vpop.eup %5297  ;;  %v4420_v53 = vmul.f32 %v5296_v27, %v8861_v3 }
 0x3a7   : > { %5317 = vpow2.f32 %v4697_v31  ;;  %v5300_v52 = vpop.eup %5299  ;;  %4455 = vst.msk [vmem:[%s8834_s20 + $0x90] sm:$0xff] %vm4436_vm3, %v4422_v61  ;;  %v4423_v45 = vmul.f32 %v5298_v9, %v8866_v55 }
 0x3a8   : > { %5319 = vpow2.f32 %v4695_v22  ;;  %v5302_v6 = vpop.eup %5301  ;;  %4453 = vst.msk [vmem:[%s8834_s20 + $0x80] sm:$0xff] %vm4436_vm3, %v4420_v53  ;;  %v4421_v24 = vmul.f32 %v5300_v52, %v8870_v60 }
 0x3a9   : > { %5321 = vpow2.f32 %v4698_v29  ;;  %v5304_v1 = vpop.eup %5303  ;;  %4456 = vst.msk [vmem:[%s8834_s20 + $0x98] sm:$0xff] %vm4436_vm3, %v4423_v45  ;;  %v4334_v8 = vadd.f32 1.0, %v5302_v6 }
 0x3aa   : > { %5323 = vpow2.f32 %v4696_v58  ;;  %v5306_v56 = vpop.eup %5305  ;;  %4454 = vst.msk [vmem:[%s8834_s20 + $0x88] sm:$0xff] %vm4436_vm3, %v4421_v24  ;;  %v4332_v3 = vadd.f32 1.0, %v5304_v1 }
 0x3ab   : > { %v5308_v18 = vpop.eup %5307  ;;  %5325 = vrcp.f32 %v4334_v8  ;;  %v4335_v55 = vadd.f32 1.0, %v5306_v56 }
 0x3ac   : > { %5327 = vrcp.f32 %v4332_v3  ;;  %v4333_v14 = vadd.f32 1.0, %v5308_v18 }
 0x3ad   : > { %v5310_v5 = vpop.eup %5309  ;;  %5329 = vrcp.f32 %v4335_v55 }
 0x3ae   : > { %v5312_v60 = vpop.eup %5311  ;;  %v4426_v54 = vmul.f32 %v5310_v5, %v8887_v25  ;;  %5331 = vrcp.f32 %v4333_v14 }
 0x3af   : > { %v5314_v15 = vpop.eup %5313  ;;  %v4424_v38 = vmul.f32 %v5312_v60, %v8893_v33 }
 0x3b0   : > { %v5316_v4 = vpop.eup %5315  ;;  %4459 = vst.msk [vmem:[%s8834_s20 + $0xb0] sm:$0xff] %vm4436_vm3, %v4426_v54  ;;  %v4427_v40 = vmul.f32 %v5314_v15, %v8898_v42 }
 0x3b1   : > { %v5318_v0 = vpop.eup %5317  ;;  %4457 = vst.msk [vmem:[%s8834_s20 + $0xa0] sm:$0xff] %vm4436_vm3, %v4424_v38  ;;  %v4425_v17 = vmul.f32 %v5316_v4, %v8902_v36 }
 0x3b2   : > { %v5320_v35 = vpop.eup %5319  ;;  %4460 = vst.msk [vmem:[%s8834_s20 + $0xb8] sm:$0xff] %vm4436_vm3, %v4427_v40  ;;  %v4338_v51 = vadd.f32 1.0, %v5318_v0 }
 0x3b3   : > { %v5322_v25 = vpop.eup %5321  ;;  %4458 = vst.msk [vmem:[%s8834_s20 + $0xa8] sm:$0xff] %vm4436_vm3, %v4425_v17  ;;  %v4336_v33 = vadd.f32 1.0, %v5320_v35 }
 0x3b4   : > { %v5324_v28 = vpop.eup %5323  ;;  %5333 = vrcp.f32 %v4338_v51  ;;  %v4339_v57 = vadd.f32 1.0, %v5322_v25 }
 0x3b5   : > { %5335 = vrcp.f32 %v4336_v33  ;;  %v4337_v42 = vadd.f32 1.0, %v5324_v28  ;;  %v5326_v59 = vpop.eup %5325 }
 0x3b6   : > { %5337 = vrcp.f32 %v4339_v57  ;;  %v5328_v36 = vpop.eup %5327  ;;  %v4430_v13 = vmul.f32 %v5326_v59, %v8917_v48 }
 0x3b7   : > { %5339 = vrcp.f32 %v4337_v42  ;;  %v5330_v44 = vpop.eup %5329  ;;  %v4428_v26 = vmul.f32 %v5328_v36, %v8923_v34 }
 0x3b8   : > { %v5332_v10 = vpop.eup %5331  ;;  %4463 = vst.msk [vmem:[%s8834_s20 + $0xd0] sm:$0xff] %vm4436_vm3, %v4430_v13  ;;  %v4431_v23 = vmul.f32 %v5330_v44, %v8929_v30 }
 0x3b9   : > { %4461 = vst.msk [vmem:[%s8834_s20 + $0xc0] sm:$0xff] %vm4436_vm3, %v4428_v26  ;;  %v4429_v7 = vmul.f32 %v5332_v10, %v8933_v63 }
 0x3ba   : > { %4464 = vst.msk [vmem:[%s8834_s20 + $0xd8] sm:$0xff] %vm4436_vm3, %v4431_v23 }
 0x3bb   : > { %4462 = vst.msk [vmem:[%s8834_s20 + $0xc8] sm:$0xff] %vm4436_vm3, %v4429_v7 }
 0x3be   : > { %v5334_v48 = vpop.eup %5333 }
 0x3bf   : > { %v5336_v21 = vpop.eup %5335  ;;  %v4434_v34 = vmul.f32 %v5334_v48, %v8949_v12 }
 0x3c0   : > { %v5338_v62 = vpop.eup %5337  ;;  %v4432_v39 = vmul.f32 %v5336_v21, %v8955_v19 }
 0x3c1   : > { %v5340_v11 = vpop.eup %5339  ;;  %4467 = vst.msk [vmem:[%s8834_s20 + $0xf0] sm:$0xff] %vm4436_vm3, %v4434_v34  ;;  %v4435_v30 = vmul.f32 %v5338_v62, %v8961_v41 }
 0x3c2   : > { %4465 = vst.msk [vmem:[%s8834_s20 + $0xe0] sm:$0xff] %vm4436_vm3, %v4432_v39  ;;  %v4433_v63 = vmul.f32 %v5340_v11, %v8965_v16 }
 0x3c3   : > { %4468 = vst.msk [vmem:[%s8834_s20 + $0xf8] sm:$0xff] %vm4436_vm3, %v4435_v30 }
 0x3c4   : > { %4466 = vst.msk [vmem:[%s8834_s20 + $0xe8] sm:$0xff] %vm4436_vm3, %v4433_v63 }
 0x3c5 PF: > { %s15_s18 = sadd.s32 1, %s5350_s18  }
 0x3c6   : > { %p12_p4 = scmp.ge.s32.totalorder %s15_s18, 4  }
 0x3c8   :  { %14 = sbr.rel (!%p12_p4) target bundleno = 1 (0x1), region = 73 }

</bundles_post_ra>
